<compile_context>
chip_gen: v6e
topology: v6e:2x2x1
jax: 0.10.0
libtpu: 0.0.40
codegen_flags: <defaults>
</compile_context>

<pallas_src>
import math

import jax
import jax.numpy as jnp
from jax import lax
from jax.experimental import pallas as pl
from jax.experimental.pallas import tpu as pltpu

# ----------------------------- tiny config ---------------------------------
VOCAB = 64
MAX_POS = 16
HIDDEN = 32          # roberta hidden_size
N_HEADS = 2
HEAD_DIM = HIDDEN // N_HEADS
FFN = 64
N_LAYERS = 2
SEQ_LEN = 8          # token sequence length

SEQ_FEAT_LEN = 16    # seq_feature_len (LSTM input size)
SEQ_FEAT_T = 8       # number of sequence-feature timesteps
LSTM_HIDDEN = 64     # as in the torch module
N_CLASSES = 2        # task == 'subtask_1'

BF16 = jnp.bfloat16


# ----------------------------- kernel helpers ------------------------------
def _ln(x, g, b, eps=1e-5):
    m = jnp.mean(x, axis=-1, keepdims=True)
    v = jnp.mean((x - m) ** 2, axis=-1, keepdims=True)
    return (x - m) * lax.rsqrt(v + eps) * g + b


def _gelu(x):
    # TODO(synk): tanh-approx GELU; HF RoBERTa uses exact erf GELU (tiny drift).
    return 0.5 * x * (1.0 + jnp.tanh(0.7978845608028654 * (x + 0.044715 * x * x * x)))


# ------------------------------ fused kernel --------------------------------
def hybrid_fused_kernel(
        # encoder inputs
        emb_ref, bias_ref, eg_ref, ed_ref,
        # encoder layer params (stacked on a leading layer axis)
        wq_ref, bq_ref, wk_ref, bk_ref, wv_ref, bv_ref, wo_ref, bo_ref,
        g1_ref, d1_ref, w1_ref, b1_ref, w2_ref, b2_ref, g2_ref, d2_ref,
        # BiLSTM
        xs_ref, wi_ref, bi_ref, whf_ref, whb_ref,
        # pooler + classifier
        wp_ref, bp_ref, wclf_ref, wclb_ref, wcp_ref, bc_ref,
        # output
        o_ref):
    B, S, H = emb_ref.shape
    scale = 1.0 / math.sqrt(HEAD_DIM)

    # ------------------ embedding LayerNorm ------------------
    x = _ln(emb_ref[...].reshape(B * S, H), eg_ref[...], ed_ref[...])   # (B*S, H) f32
    bias = bias_ref[...]                                                # (B, 1, S) f32

    # ------------------ transformer encoder (layers unrolled) ------------------
    for l in range(N_LAYERS):
        xb = x.astype(BF16)

        def proj(w_r, b_r):
            y = jnp.dot(xb, w_r[l], preferred_element_type=jnp.float32) + b_r[l]
            return y.reshape(B, S, H)

        q = proj(wq_ref, bq_ref)
        k = proj(wk_ref, bk_ref)
        v = proj(wv_ref, bv_ref)
        wo = wo_ref[l]                                                  # (H, H) bf16

        # per-head attention; each head's output is folded directly into the
        # output projection by multiplying with the matching rows of Wo, so no
        # lane-axis concatenate is needed.
        attn = bo_ref[l]                                                # (1, H) f32
        for h in range(N_HEADS):
            sl = slice(h * HEAD_DIM, (h + 1) * HEAD_DIM)
            qh = q[..., sl].astype(BF16)
            kh = k[..., sl].astype(BF16)
            vh = v[..., sl].astype(BF16)
            s = jnp.einsum('bqd,bkd->bqk', qh, kh,
                           preferred_element_type=jnp.float32) * scale + bias
            s = s - jnp.max(s, axis=-1, keepdims=True)
            p = jnp.exp(s)
            p = p * pl.reciprocal(jnp.sum(p, axis=-1, keepdims=True), approx=True)
            oh = jnp.einsum('bqk,bkd->bqd', p.astype(BF16), vh,
                            preferred_element_type=jnp.float32)         # (B, S, Hd) f32
            attn = attn + jnp.dot(oh.reshape(B * S, HEAD_DIM).astype(BF16),
                                  wo[sl, :], preferred_element_type=jnp.float32)

        h1 = _ln(x + attn, g1_ref[l], d1_ref[l])                        # (B*S, H) f32
        ff = _gelu(jnp.dot(h1.astype(BF16), w1_ref[l],
                           preferred_element_type=jnp.float32) + b1_ref[l])
        ff = jnp.dot(ff.astype(BF16), w2_ref[l],
                     preferred_element_type=jnp.float32) + b2_ref[l]
        x = _ln(h1 + ff, g2_ref[l], d2_ref[l])

    # ------------------ RoBERTa pooler: tanh(W_p · h_cls + b_p) ------------------
    cls = x.reshape(B, S, H)[:, 0, :]                                   # (B, H)
    pooled = jnp.tanh(jnp.dot(cls.astype(BF16), wp_ref[...],
                              preferred_element_type=jnp.float32) + bp_ref[...])

    # ------------------ BiLSTM over sequence features ------------------
    Bx, T, F = xs_ref.shape
    Hc = whf_ref.shape[0]
    xs = xs_ref[...].reshape(Bx * T, F).astype(BF16)
    # Hoisted input projection: one matmul covers all timesteps, both
    # directions and all 4 gates.  Columns: [fwd i|f|g|o | bwd i|f|g|o].
    gx = jnp.dot(xs, wi_ref[...], preferred_element_type=jnp.float32) + bi_ref[...]
    gx_f = gx[:, :4 * Hc].reshape(Bx, T, 4 * Hc)
    gx_b = gx[:, 4 * Hc:].reshape(Bx, T, 4 * Hc)
    whf = whf_ref[...]                                                  # (Hc, 4Hc) bf16
    whb = whb_ref[...]

    def lstm_cell(gx_t, h, c, wh):
        gates = gx_t + jnp.dot(h.astype(BF16), wh, preferred_element_type=jnp.float32)
        i = jax.nn.sigmoid(gates[:, 0 * Hc:1 * Hc])
        f = jax.nn.sigmoid(gates[:, 1 * Hc:2 * Hc])
        g = jnp.tanh(gates[:, 2 * Hc:3 * Hc])
        o = jax.nn.sigmoid(gates[:, 3 * Hc:4 * Hc])
        c_new = f * c + i * g
        return o * jnp.tanh(c_new), c_new

    zeros = jnp.zeros((Bx, Hc), jnp.float32)
    h_f, c_f = zeros, zeros
    h_b, c_b = zeros, zeros
    # Fully unrolled recurrence (T static); fwd and bwd chains are independent
    # inside each step so the scheduler interleaves them.
    for t in range(T):
        h_f, c_f = lstm_cell(gx_f[:, t, :], h_f, c_f, whf)
        h_b, c_b = lstm_cell(gx_b[:, T - 1 - t, :], h_b, c_b, whb)

    # ------------------ classifier + LogSoftmax ------------------
    # torch: cat([h_fwd | h_bwd | pooled], -1) @ Wc + bc, done as split dots
    # (no non-128-aligned lane concat).
    scores = (jnp.dot(h_f.astype(BF16), wclf_ref[...], preferred_element_type=jnp.float32)
              + jnp.dot(h_b.astype(BF16), wclb_ref[...], preferred_element_type=jnp.float32)
              + jnp.dot(pooled.astype(BF16), wcp_ref[...], preferred_element_type=jnp.float32)
              + bc_ref[...])
    m = jnp.max(scores, axis=-1, keepdims=True)
    lse = m + jnp.log(jnp.sum(jnp.exp(scores - m), axis=-1, keepdims=True))
    o_ref[...] = scores - lse                                           # LogSoftmax(dim=1)


# ------------------------------ parameters ----------------------------------
def init_params(key):
    keys = iter(jax.random.split(key, 64))

    def nrm(shape, scale=0.02, dtype=jnp.float32):
        return (jax.random.normal(next(keys), shape, jnp.float32) * scale).astype(dtype)

    def ones(shape):
        return jnp.ones(shape, jnp.float32)

    def zeros(shape):
        return jnp.zeros(shape, jnp.float32)

    L = N_LAYERS
    p = {
        'word_emb': nrm((VOCAB, HIDDEN)),
        'pos_emb': nrm((MAX_POS, HIDDEN)),
        'emb_ln_g': ones((1, HIDDEN)), 'emb_ln_b': zeros((1, HIDDEN)),
        # encoder layer params, stacked along a leading layer axis; matmul
        # weights stored bf16 (MXU operands), biases / LN params f32.
        'wq': nrm((L, HIDDEN, HIDDEN), dtype=BF16), 'bq': zeros((L, 1, HIDDEN)),
        'wk': nrm((L, HIDDEN, HIDDEN), dtype=BF16), 'bk': zeros((L, 1, HIDDEN)),
        'wv': nrm((L, HIDDEN, HIDDEN), dtype=BF16), 'bv': zeros((L, 1, HIDDEN)),
        'wo': nrm((L, HIDDEN, HIDDEN), dtype=BF16), 'bo': zeros((L, 1, HIDDEN)),
        'ln1_g': ones((L, 1, HIDDEN)), 'ln1_b': zeros((L, 1, HIDDEN)),
        'w1': nrm((L, HIDDEN, FFN), dtype=BF16), 'b1': zeros((L, 1, FFN)),
        'w2': nrm((L, FFN, HIDDEN), dtype=BF16), 'b2': zeros((L, 1, HIDDEN)),
        'ln2_g': ones((L, 1, HIDDEN)), 'ln2_b': zeros((L, 1, HIDDEN)),
    }
    k_scale = 1.0 / math.sqrt(LSTM_HIDDEN)
    # Fused LSTM weights.  Input projection packs both directions and all four
    # gates (PyTorch order i, f, g, o) in the column axis: (F, 8*Hc).
    p['lstm_wi'] = nrm((SEQ_FEAT_LEN, 8 * LSTM_HIDDEN), k_scale, BF16)
    p['lstm_b'] = nrm((1, 8 * LSTM_HIDDEN), k_scale)          # b_ih + b_hh folded
    p['lstm_wh_f'] = nrm((LSTM_HIDDEN, 4 * LSTM_HIDDEN), k_scale, BF16)
    p['lstm_wh_b'] = nrm((LSTM_HIDDEN, 4 * LSTM_HIDDEN), k_scale, BF16)
    p['pool_w'] = nrm((HIDDEN, HIDDEN), dtype=BF16)
    p['pool_b'] = zeros((1, HIDDEN))
    # Classifier weight pre-split into [lstm_fwd rows | lstm_bwd rows | pooled rows]
    p['cls_w_lstm_f'] = nrm((LSTM_HIDDEN, N_CLASSES), dtype=BF16)
    p['cls_w_lstm_b'] = nrm((LSTM_HIDDEN, N_CLASSES), dtype=BF16)
    p['cls_w_pool'] = nrm((HIDDEN, N_CLASSES), dtype=BF16)
    p['cls_b'] = zeros((1, N_CLASSES))
    return p


# -------------------------------- forward -----------------------------------
def forward(params, x_sequence_features, x_input_ids, x_attention_mask):
    B, S = x_input_ids.shape

    # Embedding gathers are glue outside the kernel; everything downstream is
    # ONE fused Pallas kernel (single launch instead of five).
    emb = (jnp.take(params['word_emb'], x_input_ids, axis=0)
           + params['pos_emb'][:S][None, :, :])
    # additive attention mask; -3e4 so it also stays safe if scores ever go bf16
    bias = ((1.0 - x_attention_mask.astype(jnp.float32)) * -30000.0)[:, None, :]

    args = (emb, bias, params['emb_ln_g'], params['emb_ln_b'],
            params['wq'], params['bq'], params['wk'], params['bk'],
            params['wv'], params['bv'], params['wo'], params['bo'],
            params['ln1_g'], params['ln1_b'], params['w1'], params['b1'],
            params['w2'], params['b2'], params['ln2_g'], params['ln2_b'],
            x_sequence_features, params['lstm_wi'], params['lstm_b'],
            params['lstm_wh_f'], params['lstm_wh_b'],
            params['pool_w'], params['pool_b'],
            params['cls_w_lstm_f'], params['cls_w_lstm_b'],
            params['cls_w_pool'], params['cls_b'])

    return pl.pallas_call(
        hybrid_fused_kernel,
        out_shape=jax.ShapeDtypeStruct((B, N_CLASSES), jnp.float32),
        in_specs=[pl.BlockSpec(memory_space=pltpu.MemorySpace.VMEM)] * len(args),
        out_specs=pl.BlockSpec(memory_space=pltpu.MemorySpace.VMEM),
    )(*args)


# ---------------------------------- main -------------------------------------
if __name__ == "__main__":
    key = jax.random.PRNGKey(0)
    kp, kx, kid = jax.random.split(key, 3)
    params = init_params(kp)

    B = 2
    x_seq = jax.random.normal(kx, (B, SEQ_FEAT_T, SEQ_FEAT_LEN), jnp.float32)
    input_ids = jax.random.randint(kid, (B, SEQ_LEN), 0, VOCAB, dtype=jnp.int32)
    attn_mask = jnp.ones((B, SEQ_LEN), jnp.int32).at[1, -2:].set(0)  # exercise padding mask

    out = jax.jit(forward)(params, x_seq, input_ids, attn_mask)
    out = jax.block_until_ready(out)
    assert out.shape == (B, N_CLASSES) and out.dtype == jnp.float32
    print("KERNEL_OK")
</pallas_src>

<mosaic_0001>
module attributes {stable_mosaic.version = 11 : i64} {
  func.func @hybrid_fused_kernel(%arg0: memref<2x8x32xf32, #tpu.memory_space<vmem>>, %arg1: memref<2x1x8xf32, #tpu.memory_space<vmem>>, %arg2: memref<1x32xf32, #tpu.memory_space<vmem>>, %arg3: memref<1x32xf32, #tpu.memory_space<vmem>>, %arg4: memref<2x32x32xbf16, #tpu.memory_space<vmem>>, %arg5: memref<2x1x32xf32, #tpu.memory_space<vmem>>, %arg6: memref<2x32x32xbf16, #tpu.memory_space<vmem>>, %arg7: memref<2x1x32xf32, #tpu.memory_space<vmem>>, %arg8: memref<2x32x32xbf16, #tpu.memory_space<vmem>>, %arg9: memref<2x1x32xf32, #tpu.memory_space<vmem>>, %arg10: memref<2x32x32xbf16, #tpu.memory_space<vmem>>, %arg11: memref<2x1x32xf32, #tpu.memory_space<vmem>>, %arg12: memref<2x1x32xf32, #tpu.memory_space<vmem>>, %arg13: memref<2x1x32xf32, #tpu.memory_space<vmem>>, %arg14: memref<2x32x64xbf16, #tpu.memory_space<vmem>>, %arg15: memref<2x1x64xf32, #tpu.memory_space<vmem>>, %arg16: memref<2x64x32xbf16, #tpu.memory_space<vmem>>, %arg17: memref<2x1x32xf32, #tpu.memory_space<vmem>>, %arg18: memref<2x1x32xf32, #tpu.memory_space<vmem>>, %arg19: memref<2x1x32xf32, #tpu.memory_space<vmem>>, %arg20: memref<2x8x16xf32, #tpu.memory_space<vmem>>, %arg21: memref<16x512xbf16, #tpu.memory_space<vmem>>, %arg22: memref<1x512xf32, #tpu.memory_space<vmem>>, %arg23: memref<64x256xbf16, #tpu.memory_space<vmem>>, %arg24: memref<64x256xbf16, #tpu.memory_space<vmem>>, %arg25: memref<32x32xbf16, #tpu.memory_space<vmem>>, %arg26: memref<1x32xf32, #tpu.memory_space<vmem>>, %arg27: memref<64x2xbf16, #tpu.memory_space<vmem>>, %arg28: memref<64x2xbf16, #tpu.memory_space<vmem>>, %arg29: memref<32x2xbf16, #tpu.memory_space<vmem>>, %arg30: memref<1x2xf32, #tpu.memory_space<vmem>>, %arg31: memref<2x2xf32, #tpu.memory_space<vmem>>) attributes {dimension_semantics = [], scalar_prefetch = 0 : i64, scratch_operands = 0 : i64, tpu.core_type = #tpu.core_type<tc>} {
    %c0 = arith.constant 0 : index
    %c0_0 = arith.constant 0 : index
    %c0_1 = arith.constant 0 : index
    %0 = vector.load %arg0[%c0, %c0_0, %c0_1] : memref<2x8x32xf32, #tpu.memory_space<vmem>>, vector<2x8x32xf32>
    %1 = vector.shape_cast %0 : vector<2x8x32xf32> to vector<16x32xf32>
    %c0_2 = arith.constant 0 : index
    %c0_3 = arith.constant 0 : index
    %2 = vector.load %arg2[%c0_2, %c0_3] : memref<1x32xf32, #tpu.memory_space<vmem>>, vector<1x32xf32>
    %c0_4 = arith.constant 0 : index
    %c0_5 = arith.constant 0 : index
    %3 = vector.load %arg3[%c0_4, %c0_5] : memref<1x32xf32, #tpu.memory_space<vmem>>, vector<1x32xf32>
    %cst = arith.constant dense<0.000000e+00> : vector<16xf32>
    %4 = vector.multi_reduction <add>, %1, %cst [1] : vector<16x32xf32> to vector<16xf32>
    %5 = vector.shape_cast %4 : vector<16xf32> to vector<16x1xf32>
    %cst_6 = arith.constant 3.200000e+01 : f32
    %6 = vector.broadcast %cst_6 : f32 to vector<16x1xf32>
    %7 = arith.divf %5, %6 : vector<16x1xf32>
    %8 = vector.broadcast %7 : vector<16x1xf32> to vector<16x32xf32>
    %9 = arith.subf %1, %8 : vector<16x32xf32>
    %10 = arith.mulf %9, %9 : vector<16x32xf32>
    %cst_7 = arith.constant dense<0.000000e+00> : vector<16xf32>
    %11 = vector.multi_reduction <add>, %10, %cst_7 [1] : vector<16x32xf32> to vector<16xf32>
    %12 = vector.shape_cast %11 : vector<16xf32> to vector<16x1xf32>
    %cst_8 = arith.constant 3.200000e+01 : f32
    %13 = vector.broadcast %cst_8 : f32 to vector<16x1xf32>
    %14 = arith.divf %12, %13 : vector<16x1xf32>
    %15 = vector.broadcast %7 : vector<16x1xf32> to vector<16x32xf32>
    %16 = arith.subf %1, %15 : vector<16x32xf32>
    %cst_9 = arith.constant 9.99999974E-6 : f32
    %17 = vector.broadcast %cst_9 : f32 to vector<16x1xf32>
    %18 = arith.addf %14, %17 : vector<16x1xf32>
    %19 = math.rsqrt %18 : vector<16x1xf32>
    %20 = vector.broadcast %19 : vector<16x1xf32> to vector<16x32xf32>
    %21 = arith.mulf %16, %20 : vector<16x32xf32>
    %22 = vector.broadcast %2 : vector<1x32xf32> to vector<16x32xf32>
    %23 = arith.mulf %21, %22 : vector<16x32xf32>
    %24 = vector.broadcast %3 : vector<1x32xf32> to vector<16x32xf32>
    %25 = arith.addf %23, %24 : vector<16x32xf32>
    %c0_10 = arith.constant 0 : index
    %c0_11 = arith.constant 0 : index
    %c0_12 = arith.constant 0 : index
    %26 = vector.load %arg1[%c0_10, %c0_11, %c0_12] : memref<2x1x8xf32, #tpu.memory_space<vmem>>, vector<2x1x8xf32>
    %27 = arith.truncf %25 : vector<16x32xf32> to vector<16x32xbf16>
    %c0_13 = arith.constant 0 : index
    %c0_14 = arith.constant 0 : index
    %c0_15 = arith.constant 0 : index
    %28 = vector.load %arg4[%c0_13, %c0_14, %c0_15] : memref<2x32x32xbf16, #tpu.memory_space<vmem>>, vector<1x32x32xbf16>
    %29 = vector.shape_cast %28 : vector<1x32x32xbf16> to vector<32x32xbf16>
    %cst_16 = arith.constant dense<0.000000e+00> : vector<16x32xf32>
    %30 = tpu.matmul %27, %29, %cst_16 {dimension_numbers = #tpu.dot_dimension_numbers<[1], [0], [0], [1], [0, 0, 1, 1], [], []>} : vector<16x32xbf16>, vector<32x32xbf16>, vector<16x32xf32> -> vector<16x32xf32>
    %c0_17 = arith.constant 0 : index
    %c0_18 = arith.constant 0 : index
    %c0_19 = arith.constant 0 : index
    %31 = vector.load %arg5[%c0_17, %c0_18, %c0_19] : memref<2x1x32xf32, #tpu.memory_space<vmem>>, vector<1x1x32xf32>
    %32 = vector.shape_cast %31 : vector<1x1x32xf32> to vector<1x32xf32>
    %33 = vector.broadcast %32 : vector<1x32xf32> to vector<16x32xf32>
    %34 = arith.addf %30, %33 : vector<16x32xf32>
    %35 = vector.shape_cast %34 : vector<16x32xf32> to vector<2x8x32xf32>
    %c0_20 = arith.constant 0 : index
    %c0_21 = arith.constant 0 : index
    %c0_22 = arith.constant 0 : index
    %36 = vector.load %arg6[%c0_20, %c0_21, %c0_22] : memref<2x32x32xbf16, #tpu.memory_space<vmem>>, vector<1x32x32xbf16>
    %37 = vector.shape_cast %36 : vector<1x32x32xbf16> to vector<32x32xbf16>
    %cst_23 = arith.constant dense<0.000000e+00> : vector<16x32xf32>
    %38 = tpu.matmul %27, %37, %cst_23 {dimension_numbers = #tpu.dot_dimension_numbers<[1], [0], [0], [1], [0, 0, 1, 1], [], []>} : vector<16x32xbf16>, vector<32x32xbf16>, vector<16x32xf32> -> vector<16x32xf32>
    %c0_24 = arith.constant 0 : index
    %c0_25 = arith.constant 0 : index
    %c0_26 = arith.constant 0 : index
    %39 = vector.load %arg7[%c0_24, %c0_25, %c0_26] : memref<2x1x32xf32, #tpu.memory_space<vmem>>, vector<1x1x32xf32>
    %40 = vector.shape_cast %39 : vector<1x1x32xf32> to vector<1x32xf32>
    %41 = vector.broadcast %40 : vector<1x32xf32> to vector<16x32xf32>
    %42 = arith.addf %38, %41 : vector<16x32xf32>
    %43 = vector.shape_cast %42 : vector<16x32xf32> to vector<2x8x32xf32>
    %c0_27 = arith.constant 0 : index
    %c0_28 = arith.constant 0 : index
    %c0_29 = arith.constant 0 : index
    %44 = vector.load %arg8[%c0_27, %c0_28, %c0_29] : memref<2x32x32xbf16, #tpu.memory_space<vmem>>, vector<1x32x32xbf16>
    %45 = vector.shape_cast %44 : vector<1x32x32xbf16> to vector<32x32xbf16>
    %cst_30 = arith.constant dense<0.000000e+00> : vector<16x32xf32>
    %46 = tpu.matmul %27, %45, %cst_30 {dimension_numbers = #tpu.dot_dimension_numbers<[1], [0], [0], [1], [0, 0, 1, 1], [], []>} : vector<16x32xbf16>, vector<32x32xbf16>, vector<16x32xf32> -> vector<16x32xf32>
    %c0_31 = arith.constant 0 : index
    %c0_32 = arith.constant 0 : index
    %c0_33 = arith.constant 0 : index
    %47 = vector.load %arg9[%c0_31, %c0_32, %c0_33] : memref<2x1x32xf32, #tpu.memory_space<vmem>>, vector<1x1x32xf32>
    %48 = vector.shape_cast %47 : vector<1x1x32xf32> to vector<1x32xf32>
    %49 = vector.broadcast %48 : vector<1x32xf32> to vector<16x32xf32>
    %50 = arith.addf %46, %49 : vector<16x32xf32>
    %51 = vector.shape_cast %50 : vector<16x32xf32> to vector<2x8x32xf32>
    %c0_34 = arith.constant 0 : index
    %c0_35 = arith.constant 0 : index
    %c0_36 = arith.constant 0 : index
    %52 = vector.load %arg10[%c0_34, %c0_35, %c0_36] : memref<2x32x32xbf16, #tpu.memory_space<vmem>>, vector<1x32x32xbf16>
    %53 = vector.shape_cast %52 : vector<1x32x32xbf16> to vector<32x32xbf16>
    %c0_37 = arith.constant 0 : index
    %c0_38 = arith.constant 0 : index
    %c0_39 = arith.constant 0 : index
    %54 = vector.load %arg11[%c0_37, %c0_38, %c0_39] : memref<2x1x32xf32, #tpu.memory_space<vmem>>, vector<1x1x32xf32>
    %55 = vector.shape_cast %54 : vector<1x1x32xf32> to vector<1x32xf32>
    %56 = vector.extract_strided_slice %35 {offsets = [0, 0, 0], sizes = [2, 8, 16], strides = [1, 1, 1]} : vector<2x8x32xf32> to vector<2x8x16xf32>
    %57 = arith.truncf %56 : vector<2x8x16xf32> to vector<2x8x16xbf16>
    %58 = vector.extract_strided_slice %43 {offsets = [0, 0, 0], sizes = [2, 8, 16], strides = [1, 1, 1]} : vector<2x8x32xf32> to vector<2x8x16xf32>
    %59 = arith.truncf %58 : vector<2x8x16xf32> to vector<2x8x16xbf16>
    %60 = vector.extract_strided_slice %51 {offsets = [0, 0, 0], sizes = [2, 8, 16], strides = [1, 1, 1]} : vector<2x8x32xf32> to vector<2x8x16xf32>
    %61 = arith.truncf %60 : vector<2x8x16xf32> to vector<2x8x16xbf16>
    "tpu.trace_start"() <{level = 10 : i32, message = "bqd,bkd->bqk"}> : () -> ()
    %cst_40 = arith.constant dense<0.000000e+00> : vector<2x8x8xf32>
    %62 = tpu.matmul %57, %59, %cst_40 {dimension_numbers = #tpu.dot_dimension_numbers<[2], [2], [1], [1], [0, 0, 0, 1, 1, 1], [0], [0]>} : vector<2x8x16xbf16>, vector<2x8x16xbf16>, vector<2x8x8xf32> -> vector<2x8x8xf32>
    "tpu.trace_stop"() : () -> ()
    %cst_41 = arith.constant 2.500000e-01 : f32
    %63 = vector.broadcast %cst_41 : f32 to vector<2x8x8xf32>
    %64 = arith.mulf %62, %63 : vector<2x8x8xf32>
    %65 = vector.broadcast %26 : vector<2x1x8xf32> to vector<2x8x8xf32>
    %66 = arith.addf %64, %65 : vector<2x8x8xf32>
    %cst_42 = arith.constant dense<0xFF800000> : vector<2x8xf32>
    %67 = vector.multi_reduction <maximumf>, %66, %cst_42 [2] : vector<2x8x8xf32> to vector<2x8xf32>
    %68 = vector.shape_cast %67 : vector<2x8xf32> to vector<2x8x1xf32>
    %69 = vector.broadcast %68 : vector<2x8x1xf32> to vector<2x8x8xf32>
    %70 = arith.subf %66, %69 : vector<2x8x8xf32>
    %71 = math.exp %70 : vector<2x8x8xf32>
    %cst_43 = arith.constant dense<0.000000e+00> : vector<2x8xf32>
    %72 = vector.multi_reduction <add>, %71, %cst_43 [2] : vector<2x8x8xf32> to vector<2x8xf32>
    %73 = vector.shape_cast %72 : vector<2x8xf32> to vector<2x8x1xf32>
    %74 = tpu.reciprocal %73 {approx = true} : vector<2x8x1xf32> -> vector<2x8x1xf32>
    %75 = vector.broadcast %74 : vector<2x8x1xf32> to vector<2x8x8xf32>
    %76 = arith.mulf %71, %75 : vector<2x8x8xf32>
    %77 = arith.truncf %76 : vector<2x8x8xf32> to vector<2x8x8xbf16>
    "tpu.trace_start"() <{level = 10 : i32, message = "bqk,bkd->bqd"}> : () -> ()
    %cst_44 = arith.constant dense<0.000000e+00> : vector<2x8x16xf32>
    %78 = tpu.matmul %77, %61, %cst_44 {dimension_numbers = #tpu.dot_dimension_numbers<[2], [1], [1], [2], [0, 0, 0, 1, 1, 2], [0], [0]>} : vector<2x8x8xbf16>, vector<2x8x16xbf16>, vector<2x8x16xf32> -> vector<2x8x16xf32>
    "tpu.trace_stop"() : () -> ()
    %79 = vector.shape_cast %78 : vector<2x8x16xf32> to vector<16x16xf32>
    %80 = arith.truncf %79 : vector<16x16xf32> to vector<16x16xbf16>
    %81 = vector.extract_strided_slice %53 {offsets = [0, 0], sizes = [16, 32], strides = [1, 1]} : vector<32x32xbf16> to vector<16x32xbf16>
    %cst_45 = arith.constant dense<0.000000e+00> : vector<16x32xf32>
    %82 = tpu.matmul %80, %81, %cst_45 {dimension_numbers = #tpu.dot_dimension_numbers<[1], [0], [0], [1], [0, 0, 1, 1], [], []>} : vector<16x16xbf16>, vector<16x32xbf16>, vector<16x32xf32> -> vector<16x32xf32>
    %83 = vector.broadcast %55 : vector<1x32xf32> to vector<16x32xf32>
    %84 = arith.addf %83, %82 : vector<16x32xf32>
    %85 = vector.extract_strided_slice %35 {offsets = [0, 0, 16], sizes = [2, 8, 16], strides = [1, 1, 1]} : vector<2x8x32xf32> to vector<2x8x16xf32>
    %86 = arith.truncf %85 : vector<2x8x16xf32> to vector<2x8x16xbf16>
    %87 = vector.extract_strided_slice %43 {offsets = [0, 0, 16], sizes = [2, 8, 16], strides = [1, 1, 1]} : vector<2x8x32xf32> to vector<2x8x16xf32>
    %88 = arith.truncf %87 : vector<2x8x16xf32> to vector<2x8x16xbf16>
    %89 = vector.extract_strided_slice %51 {offsets = [0, 0, 16], sizes = [2, 8, 16], strides = [1, 1, 1]} : vector<2x8x32xf32> to vector<2x8x16xf32>
    %90 = arith.truncf %89 : vector<2x8x16xf32> to vector<2x8x16xbf16>
    "tpu.trace_start"() <{level = 10 : i32, message = "bqd,bkd->bqk"}> : () -> ()
    %cst_46 = arith.constant dense<0.000000e+00> : vector<2x8x8xf32>
    %91 = tpu.matmul %86, %88, %cst_46 {dimension_numbers = #tpu.dot_dimension_numbers<[2], [2], [1], [1], [0, 0, 0, 1, 1, 1], [0], [0]>} : vector<2x8x16xbf16>, vector<2x8x16xbf16>, vector<2x8x8xf32> -> vector<2x8x8xf32>
    "tpu.trace_stop"() : () -> ()
    %cst_47 = arith.constant 2.500000e-01 : f32
    %92 = vector.broadcast %cst_47 : f32 to vector<2x8x8xf32>
    %93 = arith.mulf %91, %92 : vector<2x8x8xf32>
    %94 = vector.broadcast %26 : vector<2x1x8xf32> to vector<2x8x8xf32>
    %95 = arith.addf %93, %94 : vector<2x8x8xf32>
    %cst_48 = arith.constant dense<0xFF800000> : vector<2x8xf32>
    %96 = vector.multi_reduction <maximumf>, %95, %cst_48 [2] : vector<2x8x8xf32> to vector<2x8xf32>
    %97 = vector.shape_cast %96 : vector<2x8xf32> to vector<2x8x1xf32>
    %98 = vector.broadcast %97 : vector<2x8x1xf32> to vector<2x8x8xf32>
    %99 = arith.subf %95, %98 : vector<2x8x8xf32>
    %100 = math.exp %99 : vector<2x8x8xf32>
    %cst_49 = arith.constant dense<0.000000e+00> : vector<2x8xf32>
    %101 = vector.multi_reduction <add>, %100, %cst_49 [2] : vector<2x8x8xf32> to vector<2x8xf32>
    %102 = vector.shape_cast %101 : vector<2x8xf32> to vector<2x8x1xf32>
    %103 = tpu.reciprocal %102 {approx = true} : vector<2x8x1xf32> -> vector<2x8x1xf32>
    %104 = vector.broadcast %103 : vector<2x8x1xf32> to vector<2x8x8xf32>
    %105 = arith.mulf %100, %104 : vector<2x8x8xf32>
    %106 = arith.truncf %105 : vector<2x8x8xf32> to vector<2x8x8xbf16>
    "tpu.trace_start"() <{level = 10 : i32, message = "bqk,bkd->bqd"}> : () -> ()
    %cst_50 = arith.constant dense<0.000000e+00> : vector<2x8x16xf32>
    %107 = tpu.matmul %106, %90, %cst_50 {dimension_numbers = #tpu.dot_dimension_numbers<[2], [1], [1], [2], [0, 0, 0, 1, 1, 2], [0], [0]>} : vector<2x8x8xbf16>, vector<2x8x16xbf16>, vector<2x8x16xf32> -> vector<2x8x16xf32>
    "tpu.trace_stop"() : () -> ()
    %108 = vector.shape_cast %107 : vector<2x8x16xf32> to vector<16x16xf32>
    %109 = arith.truncf %108 : vector<16x16xf32> to vector<16x16xbf16>
    %110 = vector.extract_strided_slice %53 {offsets = [16, 0], sizes = [16, 32], strides = [1, 1]} : vector<32x32xbf16> to vector<16x32xbf16>
    %cst_51 = arith.constant dense<0.000000e+00> : vector<16x32xf32>
    %111 = tpu.matmul %109, %110, %cst_51 {dimension_numbers = #tpu.dot_dimension_numbers<[1], [0], [0], [1], [0, 0, 1, 1], [], []>} : vector<16x16xbf16>, vector<16x32xbf16>, vector<16x32xf32> -> vector<16x32xf32>
    %112 = arith.addf %84, %111 : vector<16x32xf32>
    %113 = arith.addf %25, %112 : vector<16x32xf32>
    %c0_52 = arith.constant 0 : index
    %c0_53 = arith.constant 0 : index
    %c0_54 = arith.constant 0 : index
    %114 = vector.load %arg12[%c0_52, %c0_53, %c0_54] : memref<2x1x32xf32, #tpu.memory_space<vmem>>, vector<1x1x32xf32>
    %115 = vector.shape_cast %114 : vector<1x1x32xf32> to vector<1x32xf32>
    %c0_55 = arith.constant 0 : index
    %c0_56 = arith.constant 0 : index
    %c0_57 = arith.constant 0 : index
    %116 = vector.load %arg13[%c0_55, %c0_56, %c0_57] : memref<2x1x32xf32, #tpu.memory_space<vmem>>, vector<1x1x32xf32>
    %117 = vector.shape_cast %116 : vector<1x1x32xf32> to vector<1x32xf32>
    %cst_58 = arith.constant dense<0.000000e+00> : vector<16xf32>
    %118 = vector.multi_reduction <add>, %113, %cst_58 [1] : vector<16x32xf32> to vector<16xf32>
    %119 = vector.shape_cast %118 : vector<16xf32> to vector<16x1xf32>
    %cst_59 = arith.constant 3.200000e+01 : f32
    %120 = vector.broadcast %cst_59 : f32 to vector<16x1xf32>
    %121 = arith.divf %119, %120 : vector<16x1xf32>
    %122 = vector.broadcast %121 : vector<16x1xf32> to vector<16x32xf32>
    %123 = arith.subf %113, %122 : vector<16x32xf32>
    %124 = arith.mulf %123, %123 : vector<16x32xf32>
    %cst_60 = arith.constant dense<0.000000e+00> : vector<16xf32>
    %125 = vector.multi_reduction <add>, %124, %cst_60 [1] : vector<16x32xf32> to vector<16xf32>
    %126 = vector.shape_cast %125 : vector<16xf32> to vector<16x1xf32>
    %cst_61 = arith.constant 3.200000e+01 : f32
    %127 = vector.broadcast %cst_61 : f32 to vector<16x1xf32>
    %128 = arith.divf %126, %127 : vector<16x1xf32>
    %129 = vector.broadcast %121 : vector<16x1xf32> to vector<16x32xf32>
    %130 = arith.subf %113, %129 : vector<16x32xf32>
    %cst_62 = arith.constant 9.99999974E-6 : f32
    %131 = vector.broadcast %cst_62 : f32 to vector<16x1xf32>
    %132 = arith.addf %128, %131 : vector<16x1xf32>
    %133 = math.rsqrt %132 : vector<16x1xf32>
    %134 = vector.broadcast %133 : vector<16x1xf32> to vector<16x32xf32>
    %135 = arith.mulf %130, %134 : vector<16x32xf32>
    %136 = vector.broadcast %115 : vector<1x32xf32> to vector<16x32xf32>
    %137 = arith.mulf %135, %136 : vector<16x32xf32>
    %138 = vector.broadcast %117 : vector<1x32xf32> to vector<16x32xf32>
    %139 = arith.addf %137, %138 : vector<16x32xf32>
    %140 = arith.truncf %139 : vector<16x32xf32> to vector<16x32xbf16>
    %c0_63 = arith.constant 0 : index
    %c0_64 = arith.constant 0 : index
    %c0_65 = arith.constant 0 : index
    %141 = vector.load %arg14[%c0_63, %c0_64, %c0_65] : memref<2x32x64xbf16, #tpu.memory_space<vmem>>, vector<1x32x64xbf16>
    %142 = vector.shape_cast %141 : vector<1x32x64xbf16> to vector<32x64xbf16>
    %cst_66 = arith.constant dense<0.000000e+00> : vector<16x64xf32>
    %143 = tpu.matmul %140, %142, %cst_66 {dimension_numbers = #tpu.dot_dimension_numbers<[1], [0], [0], [1], [0, 0, 1, 1], [], []>} : vector<16x32xbf16>, vector<32x64xbf16>, vector<16x64xf32> -> vector<16x64xf32>
    %c0_67 = arith.constant 0 : index
    %c0_68 = arith.constant 0 : index
    %c0_69 = arith.constant 0 : index
    %144 = vector.load %arg15[%c0_67, %c0_68, %c0_69] : memref<2x1x64xf32, #tpu.memory_space<vmem>>, vector<1x1x64xf32>
    %145 = vector.shape_cast %144 : vector<1x1x64xf32> to vector<1x64xf32>
    %146 = vector.broadcast %145 : vector<1x64xf32> to vector<16x64xf32>
    %147 = arith.addf %143, %146 : vector<16x64xf32>
    %cst_70 = arith.constant 5.000000e-01 : f32
    %148 = vector.broadcast %cst_70 : f32 to vector<16x64xf32>
    %149 = arith.mulf %148, %147 : vector<16x64xf32>
    %cst_71 = arith.constant 4.471500e-02 : f32
    %150 = vector.broadcast %cst_71 : f32 to vector<16x64xf32>
    %151 = arith.mulf %150, %147 : vector<16x64xf32>
    %152 = arith.mulf %151, %147 : vector<16x64xf32>
    %153 = arith.mulf %152, %147 : vector<16x64xf32>
    %154 = arith.addf %147, %153 : vector<16x64xf32>
    %cst_72 = arith.constant 0.797884583 : f32
    %155 = vector.broadcast %cst_72 : f32 to vector<16x64xf32>
    %156 = arith.mulf %155, %154 : vector<16x64xf32>
    %157 = math.tanh %156 : vector<16x64xf32>
    %cst_73 = arith.constant 1.000000e+00 : f32
    %158 = vector.broadcast %cst_73 : f32 to vector<16x64xf32>
    %159 = arith.addf %158, %157 : vector<16x64xf32>
    %160 = arith.mulf %149, %159 : vector<16x64xf32>
    %161 = arith.truncf %160 : vector<16x64xf32> to vector<16x64xbf16>
    %c0_74 = arith.constant 0 : index
    %c0_75 = arith.constant 0 : index
    %c0_76 = arith.constant 0 : index
    %162 = vector.load %arg16[%c0_74, %c0_75, %c0_76] : memref<2x64x32xbf16, #tpu.memory_space<vmem>>, vector<1x64x32xbf16>
    %163 = vector.shape_cast %162 : vector<1x64x32xbf16> to vector<64x32xbf16>
    %cst_77 = arith.constant dense<0.000000e+00> : vector<16x32xf32>
    %164 = tpu.matmul %161, %163, %cst_77 {dimension_numbers = #tpu.dot_dimension_numbers<[1], [0], [0], [1], [0, 0, 1, 1], [], []>} : vector<16x64xbf16>, vector<64x32xbf16>, vector<16x32xf32> -> vector<16x32xf32>
    %c0_78 = arith.constant 0 : index
    %c0_79 = arith.constant 0 : index
    %c0_80 = arith.constant 0 : index
    %165 = vector.load %arg17[%c0_78, %c0_79, %c0_80] : memref<2x1x32xf32, #tpu.memory_space<vmem>>, vector<1x1x32xf32>
    %166 = vector.shape_cast %165 : vector<1x1x32xf32> to vector<1x32xf32>
    %167 = vector.broadcast %166 : vector<1x32xf32> to vector<16x32xf32>
    %168 = arith.addf %164, %167 : vector<16x32xf32>
    %169 = arith.addf %139, %168 : vector<16x32xf32>
    %c0_81 = arith.constant 0 : index
    %c0_82 = arith.constant 0 : index
    %c0_83 = arith.constant 0 : index
    %170 = vector.load %arg18[%c0_81, %c0_82, %c0_83] : memref<2x1x32xf32, #tpu.memory_space<vmem>>, vector<1x1x32xf32>
    %171 = vector.shape_cast %170 : vector<1x1x32xf32> to vector<1x32xf32>
    %c0_84 = arith.constant 0 : index
    %c0_85 = arith.constant 0 : index
    %c0_86 = arith.constant 0 : index
    %172 = vector.load %arg19[%c0_84, %c0_85, %c0_86] : memref<2x1x32xf32, #tpu.memory_space<vmem>>, vector<1x1x32xf32>
    %173 = vector.shape_cast %172 : vector<1x1x32xf32> to vector<1x32xf32>
    %cst_87 = arith.constant dense<0.000000e+00> : vector<16xf32>
    %174 = vector.multi_reduction <add>, %169, %cst_87 [1] : vector<16x32xf32> to vector<16xf32>
    %175 = vector.shape_cast %174 : vector<16xf32> to vector<16x1xf32>
    %cst_88 = arith.constant 3.200000e+01 : f32
    %176 = vector.broadcast %cst_88 : f32 to vector<16x1xf32>
    %177 = arith.divf %175, %176 : vector<16x1xf32>
    %178 = vector.broadcast %177 : vector<16x1xf32> to vector<16x32xf32>
    %179 = arith.subf %169, %178 : vector<16x32xf32>
    %180 = arith.mulf %179, %179 : vector<16x32xf32>
    %cst_89 = arith.constant dense<0.000000e+00> : vector<16xf32>
    %181 = vector.multi_reduction <add>, %180, %cst_89 [1] : vector<16x32xf32> to vector<16xf32>
    %182 = vector.shape_cast %181 : vector<16xf32> to vector<16x1xf32>
    %cst_90 = arith.constant 3.200000e+01 : f32
    %183 = vector.broadcast %cst_90 : f32 to vector<16x1xf32>
    %184 = arith.divf %182, %183 : vector<16x1xf32>
    %185 = vector.broadcast %177 : vector<16x1xf32> to vector<16x32xf32>
    %186 = arith.subf %169, %185 : vector<16x32xf32>
    %cst_91 = arith.constant 9.99999974E-6 : f32
    %187 = vector.broadcast %cst_91 : f32 to vector<16x1xf32>
    %188 = arith.addf %184, %187 : vector<16x1xf32>
    %189 = math.rsqrt %188 : vector<16x1xf32>
    %190 = vector.broadcast %189 : vector<16x1xf32> to vector<16x32xf32>
    %191 = arith.mulf %186, %190 : vector<16x32xf32>
    %192 = vector.broadcast %171 : vector<1x32xf32> to vector<16x32xf32>
    %193 = arith.mulf %191, %192 : vector<16x32xf32>
    %194 = vector.broadcast %173 : vector<1x32xf32> to vector<16x32xf32>
    %195 = arith.addf %193, %194 : vector<16x32xf32>
    %196 = arith.truncf %195 : vector<16x32xf32> to vector<16x32xbf16>
    %c1 = arith.constant 1 : index
    %c0_92 = arith.constant 0 : index
    %c0_93 = arith.constant 0 : index
    %197 = vector.load %arg4[%c1, %c0_92, %c0_93] : memref<2x32x32xbf16, #tpu.memory_space<vmem>>, vector<1x32x32xbf16>
    %198 = vector.shape_cast %197 : vector<1x32x32xbf16> to vector<32x32xbf16>
    %cst_94 = arith.constant dense<0.000000e+00> : vector<16x32xf32>
    %199 = tpu.matmul %196, %198, %cst_94 {dimension_numbers = #tpu.dot_dimension_numbers<[1], [0], [0], [1], [0, 0, 1, 1], [], []>} : vector<16x32xbf16>, vector<32x32xbf16>, vector<16x32xf32> -> vector<16x32xf32>
    %c1_95 = arith.constant 1 : index
    %c0_96 = arith.constant 0 : index
    %c0_97 = arith.constant 0 : index
    %200 = vector.load %arg5[%c1_95, %c0_96, %c0_97] : memref<2x1x32xf32, #tpu.memory_space<vmem>>, vector<1x1x32xf32>
    %201 = vector.shape_cast %200 : vector<1x1x32xf32> to vector<1x32xf32>
    %202 = vector.broadcast %201 : vector<1x32xf32> to vector<16x32xf32>
    %203 = arith.addf %199, %202 : vector<16x32xf32>
    %204 = vector.shape_cast %203 : vector<16x32xf32> to vector<2x8x32xf32>
    %c1_98 = arith.constant 1 : index
    %c0_99 = arith.constant 0 : index
    %c0_100 = arith.constant 0 : index
    %205 = vector.load %arg6[%c1_98, %c0_99, %c0_100] : memref<2x32x32xbf16, #tpu.memory_space<vmem>>, vector<1x32x32xbf16>
    %206 = vector.shape_cast %205 : vector<1x32x32xbf16> to vector<32x32xbf16>
    %cst_101 = arith.constant dense<0.000000e+00> : vector<16x32xf32>
    %207 = tpu.matmul %196, %206, %cst_101 {dimension_numbers = #tpu.dot_dimension_numbers<[1], [0], [0], [1], [0, 0, 1, 1], [], []>} : vector<16x32xbf16>, vector<32x32xbf16>, vector<16x32xf32> -> vector<16x32xf32>
    %c1_102 = arith.constant 1 : index
    %c0_103 = arith.constant 0 : index
    %c0_104 = arith.constant 0 : index
    %208 = vector.load %arg7[%c1_102, %c0_103, %c0_104] : memref<2x1x32xf32, #tpu.memory_space<vmem>>, vector<1x1x32xf32>
    %209 = vector.shape_cast %208 : vector<1x1x32xf32> to vector<1x32xf32>
    %210 = vector.broadcast %209 : vector<1x32xf32> to vector<16x32xf32>
    %211 = arith.addf %207, %210 : vector<16x32xf32>
    %212 = vector.shape_cast %211 : vector<16x32xf32> to vector<2x8x32xf32>
    %c1_105 = arith.constant 1 : index
    %c0_106 = arith.constant 0 : index
    %c0_107 = arith.constant 0 : index
    %213 = vector.load %arg8[%c1_105, %c0_106, %c0_107] : memref<2x32x32xbf16, #tpu.memory_space<vmem>>, vector<1x32x32xbf16>
    %214 = vector.shape_cast %213 : vector<1x32x32xbf16> to vector<32x32xbf16>
    %cst_108 = arith.constant dense<0.000000e+00> : vector<16x32xf32>
    %215 = tpu.matmul %196, %214, %cst_108 {dimension_numbers = #tpu.dot_dimension_numbers<[1], [0], [0], [1], [0, 0, 1, 1], [], []>} : vector<16x32xbf16>, vector<32x32xbf16>, vector<16x32xf32> -> vector<16x32xf32>
    %c1_109 = arith.constant 1 : index
    %c0_110 = arith.constant 0 : index
    %c0_111 = arith.constant 0 : index
    %216 = vector.load %arg9[%c1_109, %c0_110, %c0_111] : memref<2x1x32xf32, #tpu.memory_space<vmem>>, vector<1x1x32xf32>
    %217 = vector.shape_cast %216 : vector<1x1x32xf32> to vector<1x32xf32>
    %218 = vector.broadcast %217 : vector<1x32xf32> to vector<16x32xf32>
    %219 = arith.addf %215, %218 : vector<16x32xf32>
    %220 = vector.shape_cast %219 : vector<16x32xf32> to vector<2x8x32xf32>
    %c1_112 = arith.constant 1 : index
    %c0_113 = arith.constant 0 : index
    %c0_114 = arith.constant 0 : index
    %221 = vector.load %arg10[%c1_112, %c0_113, %c0_114] : memref<2x32x32xbf16, #tpu.memory_space<vmem>>, vector<1x32x32xbf16>
    %222 = vector.shape_cast %221 : vector<1x32x32xbf16> to vector<32x32xbf16>
    %c1_115 = arith.constant 1 : index
    %c0_116 = arith.constant 0 : index
    %c0_117 = arith.constant 0 : index
    %223 = vector.load %arg11[%c1_115, %c0_116, %c0_117] : memref<2x1x32xf32, #tpu.memory_space<vmem>>, vector<1x1x32xf32>
    %224 = vector.shape_cast %223 : vector<1x1x32xf32> to vector<1x32xf32>
    %225 = vector.extract_strided_slice %204 {offsets = [0, 0, 0], sizes = [2, 8, 16], strides = [1, 1, 1]} : vector<2x8x32xf32> to vector<2x8x16xf32>
    %226 = arith.truncf %225 : vector<2x8x16xf32> to vector<2x8x16xbf16>
    %227 = vector.extract_strided_slice %212 {offsets = [0, 0, 0], sizes = [2, 8, 16], strides = [1, 1, 1]} : vector<2x8x32xf32> to vector<2x8x16xf32>
    %228 = arith.truncf %227 : vector<2x8x16xf32> to vector<2x8x16xbf16>
    %229 = vector.extract_strided_slice %220 {offsets = [0, 0, 0], sizes = [2, 8, 16], strides = [1, 1, 1]} : vector<2x8x32xf32> to vector<2x8x16xf32>
    %230 = arith.truncf %229 : vector<2x8x16xf32> to vector<2x8x16xbf16>
    "tpu.trace_start"() <{level = 10 : i32, message = "bqd,bkd->bqk"}> : () -> ()
    %cst_118 = arith.constant dense<0.000000e+00> : vector<2x8x8xf32>
    %231 = tpu.matmul %226, %228, %cst_118 {dimension_numbers = #tpu.dot_dimension_numbers<[2], [2], [1], [1], [0, 0, 0, 1, 1, 1], [0], [0]>} : vector<2x8x16xbf16>, vector<2x8x16xbf16>, vector<2x8x8xf32> -> vector<2x8x8xf32>
    "tpu.trace_stop"() : () -> ()
    %cst_119 = arith.constant 2.500000e-01 : f32
    %232 = vector.broadcast %cst_119 : f32 to vector<2x8x8xf32>
    %233 = arith.mulf %231, %232 : vector<2x8x8xf32>
    %234 = vector.broadcast %26 : vector<2x1x8xf32> to vector<2x8x8xf32>
    %235 = arith.addf %233, %234 : vector<2x8x8xf32>
    %cst_120 = arith.constant dense<0xFF800000> : vector<2x8xf32>
    %236 = vector.multi_reduction <maximumf>, %235, %cst_120 [2] : vector<2x8x8xf32> to vector<2x8xf32>
    %237 = vector.shape_cast %236 : vector<2x8xf32> to vector<2x8x1xf32>
    %238 = vector.broadcast %237 : vector<2x8x1xf32> to vector<2x8x8xf32>
    %239 = arith.subf %235, %238 : vector<2x8x8xf32>
    %240 = math.exp %239 : vector<2x8x8xf32>
    %cst_121 = arith.constant dense<0.000000e+00> : vector<2x8xf32>
    %241 = vector.multi_reduction <add>, %240, %cst_121 [2] : vector<2x8x8xf32> to vector<2x8xf32>
    %242 = vector.shape_cast %241 : vector<2x8xf32> to vector<2x8x1xf32>
    %243 = tpu.reciprocal %242 {approx = true} : vector<2x8x1xf32> -> vector<2x8x1xf32>
    %244 = vector.broadcast %243 : vector<2x8x1xf32> to vector<2x8x8xf32>
    %245 = arith.mulf %240, %244 : vector<2x8x8xf32>
    %246 = arith.truncf %245 : vector<2x8x8xf32> to vector<2x8x8xbf16>
    "tpu.trace_start"() <{level = 10 : i32, message = "bqk,bkd->bqd"}> : () -> ()
    %cst_122 = arith.constant dense<0.000000e+00> : vector<2x8x16xf32>
    %247 = tpu.matmul %246, %230, %cst_122 {dimension_numbers = #tpu.dot_dimension_numbers<[2], [1], [1], [2], [0, 0, 0, 1, 1, 2], [0], [0]>} : vector<2x8x8xbf16>, vector<2x8x16xbf16>, vector<2x8x16xf32> -> vector<2x8x16xf32>
    "tpu.trace_stop"() : () -> ()
    %248 = vector.shape_cast %247 : vector<2x8x16xf32> to vector<16x16xf32>
    %249 = arith.truncf %248 : vector<16x16xf32> to vector<16x16xbf16>
    %250 = vector.extract_strided_slice %222 {offsets = [0, 0], sizes = [16, 32], strides = [1, 1]} : vector<32x32xbf16> to vector<16x32xbf16>
    %cst_123 = arith.constant dense<0.000000e+00> : vector<16x32xf32>
    %251 = tpu.matmul %249, %250, %cst_123 {dimension_numbers = #tpu.dot_dimension_numbers<[1], [0], [0], [1], [0, 0, 1, 1], [], []>} : vector<16x16xbf16>, vector<16x32xbf16>, vector<16x32xf32> -> vector<16x32xf32>
    %252 = vector.broadcast %224 : vector<1x32xf32> to vector<16x32xf32>
    %253 = arith.addf %252, %251 : vector<16x32xf32>
    %254 = vector.extract_strided_slice %204 {offsets = [0, 0, 16], sizes = [2, 8, 16], strides = [1, 1, 1]} : vector<2x8x32xf32> to vector<2x8x16xf32>
    %255 = arith.truncf %254 : vector<2x8x16xf32> to vector<2x8x16xbf16>
    %256 = vector.extract_strided_slice %212 {offsets = [0, 0, 16], sizes = [2, 8, 16], strides = [1, 1, 1]} : vector<2x8x32xf32> to vector<2x8x16xf32>
    %257 = arith.truncf %256 : vector<2x8x16xf32> to vector<2x8x16xbf16>
    %258 = vector.extract_strided_slice %220 {offsets = [0, 0, 16], sizes = [2, 8, 16], strides = [1, 1, 1]} : vector<2x8x32xf32> to vector<2x8x16xf32>
    %259 = arith.truncf %258 : vector<2x8x16xf32> to vector<2x8x16xbf16>
    "tpu.trace_start"() <{level = 10 : i32, message = "bqd,bkd->bqk"}> : () -> ()
    %cst_124 = arith.constant dense<0.000000e+00> : vector<2x8x8xf32>
    %260 = tpu.matmul %255, %257, %cst_124 {dimension_numbers = #tpu.dot_dimension_numbers<[2], [2], [1], [1], [0, 0, 0, 1, 1, 1], [0], [0]>} : vector<2x8x16xbf16>, vector<2x8x16xbf16>, vector<2x8x8xf32> -> vector<2x8x8xf32>
    "tpu.trace_stop"() : () -> ()
    %cst_125 = arith.constant 2.500000e-01 : f32
    %261 = vector.broadcast %cst_125 : f32 to vector<2x8x8xf32>
    %262 = arith.mulf %260, %261 : vector<2x8x8xf32>
    %263 = vector.broadcast %26 : vector<2x1x8xf32> to vector<2x8x8xf32>
    %264 = arith.addf %262, %263 : vector<2x8x8xf32>
    %cst_126 = arith.constant dense<0xFF800000> : vector<2x8xf32>
    %265 = vector.multi_reduction <maximumf>, %264, %cst_126 [2] : vector<2x8x8xf32> to vector<2x8xf32>
    %266 = vector.shape_cast %265 : vector<2x8xf32> to vector<2x8x1xf32>
    %267 = vector.broadcast %266 : vector<2x8x1xf32> to vector<2x8x8xf32>
    %268 = arith.subf %264, %267 : vector<2x8x8xf32>
    %269 = math.exp %268 : vector<2x8x8xf32>
    %cst_127 = arith.constant dense<0.000000e+00> : vector<2x8xf32>
    %270 = vector.multi_reduction <add>, %269, %cst_127 [2] : vector<2x8x8xf32> to vector<2x8xf32>
    %271 = vector.shape_cast %270 : vector<2x8xf32> to vector<2x8x1xf32>
    %272 = tpu.reciprocal %271 {approx = true} : vector<2x8x1xf32> -> vector<2x8x1xf32>
    %273 = vector.broadcast %272 : vector<2x8x1xf32> to vector<2x8x8xf32>
    %274 = arith.mulf %269, %273 : vector<2x8x8xf32>
    %275 = arith.truncf %274 : vector<2x8x8xf32> to vector<2x8x8xbf16>
    "tpu.trace_start"() <{level = 10 : i32, message = "bqk,bkd->bqd"}> : () -> ()
    %cst_128 = arith.constant dense<0.000000e+00> : vector<2x8x16xf32>
    %276 = tpu.matmul %275, %259, %cst_128 {dimension_numbers = #tpu.dot_dimension_numbers<[2], [1], [1], [2], [0, 0, 0, 1, 1, 2], [0], [0]>} : vector<2x8x8xbf16>, vector<2x8x16xbf16>, vector<2x8x16xf32> -> vector<2x8x16xf32>
    "tpu.trace_stop"() : () -> ()
    %277 = vector.shape_cast %276 : vector<2x8x16xf32> to vector<16x16xf32>
    %278 = arith.truncf %277 : vector<16x16xf32> to vector<16x16xbf16>
    %279 = vector.extract_strided_slice %222 {offsets = [16, 0], sizes = [16, 32], strides = [1, 1]} : vector<32x32xbf16> to vector<16x32xbf16>
    %cst_129 = arith.constant dense<0.000000e+00> : vector<16x32xf32>
    %280 = tpu.matmul %278, %279, %cst_129 {dimension_numbers = #tpu.dot_dimension_numbers<[1], [0], [0], [1], [0, 0, 1, 1], [], []>} : vector<16x16xbf16>, vector<16x32xbf16>, vector<16x32xf32> -> vector<16x32xf32>
    %281 = arith.addf %253, %280 : vector<16x32xf32>
    %282 = arith.addf %195, %281 : vector<16x32xf32>
    %c1_130 = arith.constant 1 : index
    %c0_131 = arith.constant 0 : index
    %c0_132 = arith.constant 0 : index
    %283 = vector.load %arg12[%c1_130, %c0_131, %c0_132] : memref<2x1x32xf32, #tpu.memory_space<vmem>>, vector<1x1x32xf32>
    %284 = vector.shape_cast %283 : vector<1x1x32xf32> to vector<1x32xf32>
    %c1_133 = arith.constant 1 : index
    %c0_134 = arith.constant 0 : index
    %c0_135 = arith.constant 0 : index
    %285 = vector.load %arg13[%c1_133, %c0_134, %c0_135] : memref<2x1x32xf32, #tpu.memory_space<vmem>>, vector<1x1x32xf32>
    %286 = vector.shape_cast %285 : vector<1x1x32xf32> to vector<1x32xf32>
    %cst_136 = arith.constant dense<0.000000e+00> : vector<16xf32>
    %287 = vector.multi_reduction <add>, %282, %cst_136 [1] : vector<16x32xf32> to vector<16xf32>
    %288 = vector.shape_cast %287 : vector<16xf32> to vector<16x1xf32>
    %cst_137 = arith.constant 3.200000e+01 : f32
    %289 = vector.broadcast %cst_137 : f32 to vector<16x1xf32>
    %290 = arith.divf %288, %289 : vector<16x1xf32>
    %291 = vector.broadcast %290 : vector<16x1xf32> to vector<16x32xf32>
    %292 = arith.subf %282, %291 : vector<16x32xf32>
    %293 = arith.mulf %292, %292 : vector<16x32xf32>
    %cst_138 = arith.constant dense<0.000000e+00> : vector<16xf32>
    %294 = vector.multi_reduction <add>, %293, %cst_138 [1] : vector<16x32xf32> to vector<16xf32>
    %295 = vector.shape_cast %294 : vector<16xf32> to vector<16x1xf32>
    %cst_139 = arith.constant 3.200000e+01 : f32
    %296 = vector.broadcast %cst_139 : f32 to vector<16x1xf32>
    %297 = arith.divf %295, %296 : vector<16x1xf32>
    %298 = vector.broadcast %290 : vector<16x1xf32> to vector<16x32xf32>
    %299 = arith.subf %282, %298 : vector<16x32xf32>
    %cst_140 = arith.constant 9.99999974E-6 : f32
    %300 = vector.broadcast %cst_140 : f32 to vector<16x1xf32>
    %301 = arith.addf %297, %300 : vector<16x1xf32>
    %302 = math.rsqrt %301 : vector<16x1xf32>
    %303 = vector.broadcast %302 : vector<16x1xf32> to vector<16x32xf32>
    %304 = arith.mulf %299, %303 : vector<16x32xf32>
    %305 = vector.broadcast %284 : vector<1x32xf32> to vector<16x32xf32>
    %306 = arith.mulf %304, %305 : vector<16x32xf32>
    %307 = vector.broadcast %286 : vector<1x32xf32> to vector<16x32xf32>
    %308 = arith.addf %306, %307 : vector<16x32xf32>
    %309 = arith.truncf %308 : vector<16x32xf32> to vector<16x32xbf16>
    %c1_141 = arith.constant 1 : index
    %c0_142 = arith.constant 0 : index
    %c0_143 = arith.constant 0 : index
    %310 = vector.load %arg14[%c1_141, %c0_142, %c0_143] : memref<2x32x64xbf16, #tpu.memory_space<vmem>>, vector<1x32x64xbf16>
    %311 = vector.shape_cast %310 : vector<1x32x64xbf16> to vector<32x64xbf16>
    %cst_144 = arith.constant dense<0.000000e+00> : vector<16x64xf32>
    %312 = tpu.matmul %309, %311, %cst_144 {dimension_numbers = #tpu.dot_dimension_numbers<[1], [0], [0], [1], [0, 0, 1, 1], [], []>} : vector<16x32xbf16>, vector<32x64xbf16>, vector<16x64xf32> -> vector<16x64xf32>
    %c1_145 = arith.constant 1 : index
    %c0_146 = arith.constant 0 : index
    %c0_147 = arith.constant 0 : index
    %313 = vector.load %arg15[%c1_145, %c0_146, %c0_147] : memref<2x1x64xf32, #tpu.memory_space<vmem>>, vector<1x1x64xf32>
    %314 = vector.shape_cast %313 : vector<1x1x64xf32> to vector<1x64xf32>
    %315 = vector.broadcast %314 : vector<1x64xf32> to vector<16x64xf32>
    %316 = arith.addf %312, %315 : vector<16x64xf32>
    %cst_148 = arith.constant 5.000000e-01 : f32
    %317 = vector.broadcast %cst_148 : f32 to vector<16x64xf32>
    %318 = arith.mulf %317, %316 : vector<16x64xf32>
    %cst_149 = arith.constant 4.471500e-02 : f32
    %319 = vector.broadcast %cst_149 : f32 to vector<16x64xf32>
    %320 = arith.mulf %319, %316 : vector<16x64xf32>
    %321 = arith.mulf %320, %316 : vector<16x64xf32>
    %322 = arith.mulf %321, %316 : vector<16x64xf32>
    %323 = arith.addf %316, %322 : vector<16x64xf32>
    %cst_150 = arith.constant 0.797884583 : f32
    %324 = vector.broadcast %cst_150 : f32 to vector<16x64xf32>
    %325 = arith.mulf %324, %323 : vector<16x64xf32>
    %326 = math.tanh %325 : vector<16x64xf32>
    %cst_151 = arith.constant 1.000000e+00 : f32
    %327 = vector.broadcast %cst_151 : f32 to vector<16x64xf32>
    %328 = arith.addf %327, %326 : vector<16x64xf32>
    %329 = arith.mulf %318, %328 : vector<16x64xf32>
    %330 = arith.truncf %329 : vector<16x64xf32> to vector<16x64xbf16>
    %c1_152 = arith.constant 1 : index
    %c0_153 = arith.constant 0 : index
    %c0_154 = arith.constant 0 : index
    %331 = vector.load %arg16[%c1_152, %c0_153, %c0_154] : memref<2x64x32xbf16, #tpu.memory_space<vmem>>, vector<1x64x32xbf16>
    %332 = vector.shape_cast %331 : vector<1x64x32xbf16> to vector<64x32xbf16>
    %cst_155 = arith.constant dense<0.000000e+00> : vector<16x32xf32>
    %333 = tpu.matmul %330, %332, %cst_155 {dimension_numbers = #tpu.dot_dimension_numbers<[1], [0], [0], [1], [0, 0, 1, 1], [], []>} : vector<16x64xbf16>, vector<64x32xbf16>, vector<16x32xf32> -> vector<16x32xf32>
    %c1_156 = arith.constant 1 : index
    %c0_157 = arith.constant 0 : index
    %c0_158 = arith.constant 0 : index
    %334 = vector.load %arg17[%c1_156, %c0_157, %c0_158] : memref<2x1x32xf32, #tpu.memory_space<vmem>>, vector<1x1x32xf32>
    %335 = vector.shape_cast %334 : vector<1x1x32xf32> to vector<1x32xf32>
    %336 = vector.broadcast %335 : vector<1x32xf32> to vector<16x32xf32>
    %337 = arith.addf %333, %336 : vector<16x32xf32>
    %338 = arith.addf %308, %337 : vector<16x32xf32>
    %c1_159 = arith.constant 1 : index
    %c0_160 = arith.constant 0 : index
    %c0_161 = arith.constant 0 : index
    %339 = vector.load %arg18[%c1_159, %c0_160, %c0_161] : memref<2x1x32xf32, #tpu.memory_space<vmem>>, vector<1x1x32xf32>
    %340 = vector.shape_cast %339 : vector<1x1x32xf32> to vector<1x32xf32>
    %c1_162 = arith.constant 1 : index
    %c0_163 = arith.constant 0 : index
    %c0_164 = arith.constant 0 : index
    %341 = vector.load %arg19[%c1_162, %c0_163, %c0_164] : memref<2x1x32xf32, #tpu.memory_space<vmem>>, vector<1x1x32xf32>
    %342 = vector.shape_cast %341 : vector<1x1x32xf32> to vector<1x32xf32>
    %cst_165 = arith.constant dense<0.000000e+00> : vector<16xf32>
    %343 = vector.multi_reduction <add>, %338, %cst_165 [1] : vector<16x32xf32> to vector<16xf32>
    %344 = vector.shape_cast %343 : vector<16xf32> to vector<16x1xf32>
    %cst_166 = arith.constant 3.200000e+01 : f32
    %345 = vector.broadcast %cst_166 : f32 to vector<16x1xf32>
    %346 = arith.divf %344, %345 : vector<16x1xf32>
    %347 = vector.broadcast %346 : vector<16x1xf32> to vector<16x32xf32>
    %348 = arith.subf %338, %347 : vector<16x32xf32>
    %349 = arith.mulf %348, %348 : vector<16x32xf32>
    %cst_167 = arith.constant dense<0.000000e+00> : vector<16xf32>
    %350 = vector.multi_reduction <add>, %349, %cst_167 [1] : vector<16x32xf32> to vector<16xf32>
    %351 = vector.shape_cast %350 : vector<16xf32> to vector<16x1xf32>
    %cst_168 = arith.constant 3.200000e+01 : f32
    %352 = vector.broadcast %cst_168 : f32 to vector<16x1xf32>
    %353 = arith.divf %351, %352 : vector<16x1xf32>
    %354 = vector.broadcast %346 : vector<16x1xf32> to vector<16x32xf32>
    %355 = arith.subf %338, %354 : vector<16x32xf32>
    %cst_169 = arith.constant 9.99999974E-6 : f32
    %356 = vector.broadcast %cst_169 : f32 to vector<16x1xf32>
    %357 = arith.addf %353, %356 : vector<16x1xf32>
    %358 = math.rsqrt %357 : vector<16x1xf32>
    %359 = vector.broadcast %358 : vector<16x1xf32> to vector<16x32xf32>
    %360 = arith.mulf %355, %359 : vector<16x32xf32>
    %361 = vector.broadcast %340 : vector<1x32xf32> to vector<16x32xf32>
    %362 = arith.mulf %360, %361 : vector<16x32xf32>
    %363 = vector.broadcast %342 : vector<1x32xf32> to vector<16x32xf32>
    %364 = arith.addf %362, %363 : vector<16x32xf32>
    %365 = vector.shape_cast %364 : vector<16x32xf32> to vector<2x8x32xf32>
    %366 = vector.extract_strided_slice %365 {offsets = [0, 0, 0], sizes = [2, 1, 32], strides = [1, 1, 1]} : vector<2x8x32xf32> to vector<2x1x32xf32>
    %367 = vector.shape_cast %366 : vector<2x1x32xf32> to vector<2x32xf32>
    %368 = arith.truncf %367 : vector<2x32xf32> to vector<2x32xbf16>
    %c0_170 = arith.constant 0 : index
    %c0_171 = arith.constant 0 : index
    %369 = vector.load %arg25[%c0_170, %c0_171] : memref<32x32xbf16, #tpu.memory_space<vmem>>, vector<32x32xbf16>
    %cst_172 = arith.constant dense<0.000000e+00> : vector<2x32xf32>
    %370 = tpu.matmul %368, %369, %cst_172 {dimension_numbers = #tpu.dot_dimension_numbers<[1], [0], [0], [1], [0, 0, 1, 1], [], []>} : vector<2x32xbf16>, vector<32x32xbf16>, vector<2x32xf32> -> vector<2x32xf32>
    %c0_173 = arith.constant 0 : index
    %c0_174 = arith.constant 0 : index
    %371 = vector.load %arg26[%c0_173, %c0_174] : memref<1x32xf32, #tpu.memory_space<vmem>>, vector<1x32xf32>
    %372 = vector.broadcast %371 : vector<1x32xf32> to vector<2x32xf32>
    %373 = arith.addf %370, %372 : vector<2x32xf32>
    %374 = math.tanh %373 : vector<2x32xf32>
    %c0_175 = arith.constant 0 : index
    %c0_176 = arith.constant 0 : index
    %c0_177 = arith.constant 0 : index
    %375 = vector.load %arg20[%c0_175, %c0_176, %c0_177] : memref<2x8x16xf32, #tpu.memory_space<vmem>>, vector<2x8x16xf32>
    %376 = vector.shape_cast %375 : vector<2x8x16xf32> to vector<16x16xf32>
    %377 = arith.truncf %376 : vector<16x16xf32> to vector<16x16xbf16>
    %c0_178 = arith.constant 0 : index
    %c0_179 = arith.constant 0 : index
    %378 = vector.load %arg21[%c0_178, %c0_179] : memref<16x512xbf16, #tpu.memory_space<vmem>>, vector<16x512xbf16>
    %cst_180 = arith.constant dense<0.000000e+00> : vector<16x512xf32>
    %379 = tpu.matmul %377, %378, %cst_180 {dimension_numbers = #tpu.dot_dimension_numbers<[1], [0], [0], [1], [0, 0, 1, 1], [], []>} : vector<16x16xbf16>, vector<16x512xbf16>, vector<16x512xf32> -> vector<16x512xf32>
    %c0_181 = arith.constant 0 : index
    %c0_182 = arith.constant 0 : index
    %380 = vector.load %arg22[%c0_181, %c0_182] : memref<1x512xf32, #tpu.memory_space<vmem>>, vector<1x512xf32>
    %381 = vector.broadcast %380 : vector<1x512xf32> to vector<16x512xf32>
    %382 = arith.addf %379, %381 : vector<16x512xf32>
    %383 = vector.extract_strided_slice %382 {offsets = [0, 0], sizes = [16, 256], strides = [1, 1]} : vector<16x512xf32> to vector<16x256xf32>
    %384 = vector.shape_cast %383 : vector<16x256xf32> to vector<2x8x256xf32>
    %385 = vector.extract_strided_slice %382 {offsets = [0, 256], sizes = [16, 256], strides = [1, 1]} : vector<16x512xf32> to vector<16x256xf32>
    %386 = vector.shape_cast %385 : vector<16x256xf32> to vector<2x8x256xf32>
    %c0_183 = arith.constant 0 : index
    %c0_184 = arith.constant 0 : index
    %387 = vector.load %arg23[%c0_183, %c0_184] : memref<64x256xbf16, #tpu.memory_space<vmem>>, vector<64x256xbf16>
    %c0_185 = arith.constant 0 : index
    %c0_186 = arith.constant 0 : index
    %388 = vector.load %arg24[%c0_185, %c0_186] : memref<64x256xbf16, #tpu.memory_space<vmem>>, vector<64x256xbf16>
    %cst_187 = arith.constant 0.000000e+00 : f32
    %389 = vector.broadcast %cst_187 : f32 to vector<2x64xf32>
    %390 = vector.extract_strided_slice %384 {offsets = [0, 0, 0], sizes = [2, 1, 256], strides = [1, 1, 1]} : vector<2x8x256xf32> to vector<2x1x256xf32>
    %391 = vector.shape_cast %390 : vector<2x1x256xf32> to vector<2x256xf32>
    %392 = arith.truncf %389 : vector<2x64xf32> to vector<2x64xbf16>
    %cst_188 = arith.constant dense<0.000000e+00> : vector<2x256xf32>
    %393 = tpu.matmul %392, %387, %cst_188 {dimension_numbers = #tpu.dot_dimension_numbers<[1], [0], [0], [1], [0, 0, 1, 1], [], []>} : vector<2x64xbf16>, vector<64x256xbf16>, vector<2x256xf32> -> vector<2x256xf32>
    %394 = arith.addf %391, %393 : vector<2x256xf32>
    %395 = vector.extract_strided_slice %394 {offsets = [0, 0], sizes = [2, 64], strides = [1, 1]} : vector<2x256xf32> to vector<2x64xf32>
    %396 = arith.negf %395 : vector<2x64xf32>
    %397 = math.exp %396 : vector<2x64xf32>
    %cst_189 = arith.constant 1.000000e+00 : f32
    %398 = vector.broadcast %cst_189 : f32 to vector<2x64xf32>
    %399 = arith.addf %398, %397 : vector<2x64xf32>
    %400 = arith.divf %398, %399 : vector<2x64xf32>
    %401 = vector.extract_strided_slice %394 {offsets = [0, 64], sizes = [2, 64], strides = [1, 1]} : vector<2x256xf32> to vector<2x64xf32>
    %402 = arith.negf %401 : vector<2x64xf32>
    %403 = math.exp %402 : vector<2x64xf32>
    %cst_190 = arith.constant 1.000000e+00 : f32
    %404 = vector.broadcast %cst_190 : f32 to vector<2x64xf32>
    %405 = arith.addf %404, %403 : vector<2x64xf32>
    %406 = arith.divf %404, %405 : vector<2x64xf32>
    %407 = vector.extract_strided_slice %394 {offsets = [0, 128], sizes = [2, 64], strides = [1, 1]} : vector<2x256xf32> to vector<2x64xf32>
    %408 = math.tanh %407 : vector<2x64xf32>
    %409 = vector.extract_strided_slice %394 {offsets = [0, 192], sizes = [2, 64], strides = [1, 1]} : vector<2x256xf32> to vector<2x64xf32>
    %410 = arith.negf %409 : vector<2x64xf32>
    %411 = math.exp %410 : vector<2x64xf32>
    %cst_191 = arith.constant 1.000000e+00 : f32
    %412 = vector.broadcast %cst_191 : f32 to vector<2x64xf32>
    %413 = arith.addf %412, %411 : vector<2x64xf32>
    %414 = arith.divf %412, %413 : vector<2x64xf32>
    %415 = arith.mulf %406, %389 : vector<2x64xf32>
    %416 = arith.mulf %400, %408 : vector<2x64xf32>
    %417 = arith.addf %415, %416 : vector<2x64xf32>
    %418 = math.tanh %417 : vector<2x64xf32>
    %419 = arith.mulf %414, %418 : vector<2x64xf32>
    %420 = vector.extract_strided_slice %386 {offsets = [0, 7, 0], sizes = [2, 1, 256], strides = [1, 1, 1]} : vector<2x8x256xf32> to vector<2x1x256xf32>
    %421 = vector.shape_cast %420 : vector<2x1x256xf32> to vector<2x256xf32>
    %422 = arith.truncf %389 : vector<2x64xf32> to vector<2x64xbf16>
    %cst_192 = arith.constant dense<0.000000e+00> : vector<2x256xf32>
    %423 = tpu.matmul %422, %388, %cst_192 {dimension_numbers = #tpu.dot_dimension_numbers<[1], [0], [0], [1], [0, 0, 1, 1], [], []>} : vector<2x64xbf16>, vector<64x256xbf16>, vector<2x256xf32> -> vector<2x256xf32>
    %424 = arith.addf %421, %423 : vector<2x256xf32>
    %425 = vector.extract_strided_slice %424 {offsets = [0, 0], sizes = [2, 64], strides = [1, 1]} : vector<2x256xf32> to vector<2x64xf32>
    %426 = arith.negf %425 : vector<2x64xf32>
    %427 = math.exp %426 : vector<2x64xf32>
    %cst_193 = arith.constant 1.000000e+00 : f32
    %428 = vector.broadcast %cst_193 : f32 to vector<2x64xf32>
    %429 = arith.addf %428, %427 : vector<2x64xf32>
    %430 = arith.divf %428, %429 : vector<2x64xf32>
    %431 = vector.extract_strided_slice %424 {offsets = [0, 64], sizes = [2, 64], strides = [1, 1]} : vector<2x256xf32> to vector<2x64xf32>
    %432 = arith.negf %431 : vector<2x64xf32>
    %433 = math.exp %432 : vector<2x64xf32>
    %cst_194 = arith.constant 1.000000e+00 : f32
    %434 = vector.broadcast %cst_194 : f32 to vector<2x64xf32>
    %435 = arith.addf %434, %433 : vector<2x64xf32>
    %436 = arith.divf %434, %435 : vector<2x64xf32>
    %437 = vector.extract_strided_slice %424 {offsets = [0, 128], sizes = [2, 64], strides = [1, 1]} : vector<2x256xf32> to vector<2x64xf32>
    %438 = math.tanh %437 : vector<2x64xf32>
    %439 = vector.extract_strided_slice %424 {offsets = [0, 192], sizes = [2, 64], strides = [1, 1]} : vector<2x256xf32> to vector<2x64xf32>
    %440 = arith.negf %439 : vector<2x64xf32>
    %441 = math.exp %440 : vector<2x64xf32>
    %cst_195 = arith.constant 1.000000e+00 : f32
    %442 = vector.broadcast %cst_195 : f32 to vector<2x64xf32>
    %443 = arith.addf %442, %441 : vector<2x64xf32>
    %444 = arith.divf %442, %443 : vector<2x64xf32>
    %445 = arith.mulf %436, %389 : vector<2x64xf32>
    %446 = arith.mulf %430, %438 : vector<2x64xf32>
    %447 = arith.addf %445, %446 : vector<2x64xf32>
    %448 = math.tanh %447 : vector<2x64xf32>
    %449 = arith.mulf %444, %448 : vector<2x64xf32>
    %450 = vector.extract_strided_slice %384 {offsets = [0, 1, 0], sizes = [2, 1, 256], strides = [1, 1, 1]} : vector<2x8x256xf32> to vector<2x1x256xf32>
    %451 = vector.shape_cast %450 : vector<2x1x256xf32> to vector<2x256xf32>
    %452 = arith.truncf %419 : vector<2x64xf32> to vector<2x64xbf16>
    %cst_196 = arith.constant dense<0.000000e+00> : vector<2x256xf32>
    %453 = tpu.matmul %452, %387, %cst_196 {dimension_numbers = #tpu.dot_dimension_numbers<[1], [0], [0], [1], [0, 0, 1, 1], [], []>} : vector<2x64xbf16>, vector<64x256xbf16>, vector<2x256xf32> -> vector<2x256xf32>
    %454 = arith.addf %451, %453 : vector<2x256xf32>
    %455 = vector.extract_strided_slice %454 {offsets = [0, 0], sizes = [2, 64], strides = [1, 1]} : vector<2x256xf32> to vector<2x64xf32>
    %456 = arith.negf %455 : vector<2x64xf32>
    %457 = math.exp %456 : vector<2x64xf32>
    %cst_197 = arith.constant 1.000000e+00 : f32
    %458 = vector.broadcast %cst_197 : f32 to vector<2x64xf32>
    %459 = arith.addf %458, %457 : vector<2x64xf32>
    %460 = arith.divf %458, %459 : vector<2x64xf32>
    %461 = vector.extract_strided_slice %454 {offsets = [0, 64], sizes = [2, 64], strides = [1, 1]} : vector<2x256xf32> to vector<2x64xf32>
    %462 = arith.negf %461 : vector<2x64xf32>
    %463 = math.exp %462 : vector<2x64xf32>
    %cst_198 = arith.constant 1.000000e+00 : f32
    %464 = vector.broadcast %cst_198 : f32 to vector<2x64xf32>
    %465 = arith.addf %464, %463 : vector<2x64xf32>
    %466 = arith.divf %464, %465 : vector<2x64xf32>
    %467 = vector.extract_strided_slice %454 {offsets = [0, 128], sizes = [2, 64], strides = [1, 1]} : vector<2x256xf32> to vector<2x64xf32>
    %468 = math.tanh %467 : vector<2x64xf32>
    %469 = vector.extract_strided_slice %454 {offsets = [0, 192], sizes = [2, 64], strides = [1, 1]} : vector<2x256xf32> to vector<2x64xf32>
    %470 = arith.negf %469 : vector<2x64xf32>
    %471 = math.exp %470 : vector<2x64xf32>
    %cst_199 = arith.constant 1.000000e+00 : f32
    %472 = vector.broadcast %cst_199 : f32 to vector<2x64xf32>
    %473 = arith.addf %472, %471 : vector<2x64xf32>
    %474 = arith.divf %472, %473 : vector<2x64xf32>
    %475 = arith.mulf %466, %417 : vector<2x64xf32>
    %476 = arith.mulf %460, %468 : vector<2x64xf32>
    %477 = arith.addf %475, %476 : vector<2x64xf32>
    %478 = math.tanh %477 : vector<2x64xf32>
    %479 = arith.mulf %474, %478 : vector<2x64xf32>
    %480 = vector.extract_strided_slice %386 {offsets = [0, 6, 0], sizes = [2, 1, 256], strides = [1, 1, 1]} : vector<2x8x256xf32> to vector<2x1x256xf32>
    %481 = vector.shape_cast %480 : vector<2x1x256xf32> to vector<2x256xf32>
    %482 = arith.truncf %449 : vector<2x64xf32> to vector<2x64xbf16>
    %cst_200 = arith.constant dense<0.000000e+00> : vector<2x256xf32>
    %483 = tpu.matmul %482, %388, %cst_200 {dimension_numbers = #tpu.dot_dimension_numbers<[1], [0], [0], [1], [0, 0, 1, 1], [], []>} : vector<2x64xbf16>, vector<64x256xbf16>, vector<2x256xf32> -> vector<2x256xf32>
    %484 = arith.addf %481, %483 : vector<2x256xf32>
    %485 = vector.extract_strided_slice %484 {offsets = [0, 0], sizes = [2, 64], strides = [1, 1]} : vector<2x256xf32> to vector<2x64xf32>
    %486 = arith.negf %485 : vector<2x64xf32>
    %487 = math.exp %486 : vector<2x64xf32>
    %cst_201 = arith.constant 1.000000e+00 : f32
    %488 = vector.broadcast %cst_201 : f32 to vector<2x64xf32>
    %489 = arith.addf %488, %487 : vector<2x64xf32>
    %490 = arith.divf %488, %489 : vector<2x64xf32>
    %491 = vector.extract_strided_slice %484 {offsets = [0, 64], sizes = [2, 64], strides = [1, 1]} : vector<2x256xf32> to vector<2x64xf32>
    %492 = arith.negf %491 : vector<2x64xf32>
    %493 = math.exp %492 : vector<2x64xf32>
    %cst_202 = arith.constant 1.000000e+00 : f32
    %494 = vector.broadcast %cst_202 : f32 to vector<2x64xf32>
    %495 = arith.addf %494, %493 : vector<2x64xf32>
    %496 = arith.divf %494, %495 : vector<2x64xf32>
    %497 = vector.extract_strided_slice %484 {offsets = [0, 128], sizes = [2, 64], strides = [1, 1]} : vector<2x256xf32> to vector<2x64xf32>
    %498 = math.tanh %497 : vector<2x64xf32>
    %499 = vector.extract_strided_slice %484 {offsets = [0, 192], sizes = [2, 64], strides = [1, 1]} : vector<2x256xf32> to vector<2x64xf32>
    %500 = arith.negf %499 : vector<2x64xf32>
    %501 = math.exp %500 : vector<2x64xf32>
    %cst_203 = arith.constant 1.000000e+00 : f32
    %502 = vector.broadcast %cst_203 : f32 to vector<2x64xf32>
    %503 = arith.addf %502, %501 : vector<2x64xf32>
    %504 = arith.divf %502, %503 : vector<2x64xf32>
    %505 = arith.mulf %496, %447 : vector<2x64xf32>
    %506 = arith.mulf %490, %498 : vector<2x64xf32>
    %507 = arith.addf %505, %506 : vector<2x64xf32>
    %508 = math.tanh %507 : vector<2x64xf32>
    %509 = arith.mulf %504, %508 : vector<2x64xf32>
    %510 = vector.extract_strided_slice %384 {offsets = [0, 2, 0], sizes = [2, 1, 256], strides = [1, 1, 1]} : vector<2x8x256xf32> to vector<2x1x256xf32>
    %511 = vector.shape_cast %510 : vector<2x1x256xf32> to vector<2x256xf32>
    %512 = arith.truncf %479 : vector<2x64xf32> to vector<2x64xbf16>
    %cst_204 = arith.constant dense<0.000000e+00> : vector<2x256xf32>
    %513 = tpu.matmul %512, %387, %cst_204 {dimension_numbers = #tpu.dot_dimension_numbers<[1], [0], [0], [1], [0, 0, 1, 1], [], []>} : vector<2x64xbf16>, vector<64x256xbf16>, vector<2x256xf32> -> vector<2x256xf32>
    %514 = arith.addf %511, %513 : vector<2x256xf32>
    %515 = vector.extract_strided_slice %514 {offsets = [0, 0], sizes = [2, 64], strides = [1, 1]} : vector<2x256xf32> to vector<2x64xf32>
    %516 = arith.negf %515 : vector<2x64xf32>
    %517 = math.exp %516 : vector<2x64xf32>
    %cst_205 = arith.constant 1.000000e+00 : f32
    %518 = vector.broadcast %cst_205 : f32 to vector<2x64xf32>
    %519 = arith.addf %518, %517 : vector<2x64xf32>
    %520 = arith.divf %518, %519 : vector<2x64xf32>
    %521 = vector.extract_strided_slice %514 {offsets = [0, 64], sizes = [2, 64], strides = [1, 1]} : vector<2x256xf32> to vector<2x64xf32>
    %522 = arith.negf %521 : vector<2x64xf32>
    %523 = math.exp %522 : vector<2x64xf32>
    %cst_206 = arith.constant 1.000000e+00 : f32
    %524 = vector.broadcast %cst_206 : f32 to vector<2x64xf32>
    %525 = arith.addf %524, %523 : vector<2x64xf32>
    %526 = arith.divf %524, %525 : vector<2x64xf32>
    %527 = vector.extract_strided_slice %514 {offsets = [0, 128], sizes = [2, 64], strides = [1, 1]} : vector<2x256xf32> to vector<2x64xf32>
    %528 = math.tanh %527 : vector<2x64xf32>
    %529 = vector.extract_strided_slice %514 {offsets = [0, 192], sizes = [2, 64], strides = [1, 1]} : vector<2x256xf32> to vector<2x64xf32>
    %530 = arith.negf %529 : vector<2x64xf32>
    %531 = math.exp %530 : vector<2x64xf32>
    %cst_207 = arith.constant 1.000000e+00 : f32
    %532 = vector.broadcast %cst_207 : f32 to vector<2x64xf32>
    %533 = arith.addf %532, %531 : vector<2x64xf32>
    %534 = arith.divf %532, %533 : vector<2x64xf32>
    %535 = arith.mulf %526, %477 : vector<2x64xf32>
    %536 = arith.mulf %520, %528 : vector<2x64xf32>
    %537 = arith.addf %535, %536 : vector<2x64xf32>
    %538 = math.tanh %537 : vector<2x64xf32>
    %539 = arith.mulf %534, %538 : vector<2x64xf32>
    %540 = vector.extract_strided_slice %386 {offsets = [0, 5, 0], sizes = [2, 1, 256], strides = [1, 1, 1]} : vector<2x8x256xf32> to vector<2x1x256xf32>
    %541 = vector.shape_cast %540 : vector<2x1x256xf32> to vector<2x256xf32>
    %542 = arith.truncf %509 : vector<2x64xf32> to vector<2x64xbf16>
    %cst_208 = arith.constant dense<0.000000e+00> : vector<2x256xf32>
    %543 = tpu.matmul %542, %388, %cst_208 {dimension_numbers = #tpu.dot_dimension_numbers<[1], [0], [0], [1], [0, 0, 1, 1], [], []>} : vector<2x64xbf16>, vector<64x256xbf16>, vector<2x256xf32> -> vector<2x256xf32>
    %544 = arith.addf %541, %543 : vector<2x256xf32>
    %545 = vector.extract_strided_slice %544 {offsets = [0, 0], sizes = [2, 64], strides = [1, 1]} : vector<2x256xf32> to vector<2x64xf32>
    %546 = arith.negf %545 : vector<2x64xf32>
    %547 = math.exp %546 : vector<2x64xf32>
    %cst_209 = arith.constant 1.000000e+00 : f32
    %548 = vector.broadcast %cst_209 : f32 to vector<2x64xf32>
    %549 = arith.addf %548, %547 : vector<2x64xf32>
    %550 = arith.divf %548, %549 : vector<2x64xf32>
    %551 = vector.extract_strided_slice %544 {offsets = [0, 64], sizes = [2, 64], strides = [1, 1]} : vector<2x256xf32> to vector<2x64xf32>
    %552 = arith.negf %551 : vector<2x64xf32>
    %553 = math.exp %552 : vector<2x64xf32>
    %cst_210 = arith.constant 1.000000e+00 : f32
    %554 = vector.broadcast %cst_210 : f32 to vector<2x64xf32>
    %555 = arith.addf %554, %553 : vector<2x64xf32>
    %556 = arith.divf %554, %555 : vector<2x64xf32>
    %557 = vector.extract_strided_slice %544 {offsets = [0, 128], sizes = [2, 64], strides = [1, 1]} : vector<2x256xf32> to vector<2x64xf32>
    %558 = math.tanh %557 : vector<2x64xf32>
    %559 = vector.extract_strided_slice %544 {offsets = [0, 192], sizes = [2, 64], strides = [1, 1]} : vector<2x256xf32> to vector<2x64xf32>
    %560 = arith.negf %559 : vector<2x64xf32>
    %561 = math.exp %560 : vector<2x64xf32>
    %cst_211 = arith.constant 1.000000e+00 : f32
    %562 = vector.broadcast %cst_211 : f32 to vector<2x64xf32>
    %563 = arith.addf %562, %561 : vector<2x64xf32>
    %564 = arith.divf %562, %563 : vector<2x64xf32>
    %565 = arith.mulf %556, %507 : vector<2x64xf32>
    %566 = arith.mulf %550, %558 : vector<2x64xf32>
    %567 = arith.addf %565, %566 : vector<2x64xf32>
    %568 = math.tanh %567 : vector<2x64xf32>
    %569 = arith.mulf %564, %568 : vector<2x64xf32>
    %570 = vector.extract_strided_slice %384 {offsets = [0, 3, 0], sizes = [2, 1, 256], strides = [1, 1, 1]} : vector<2x8x256xf32> to vector<2x1x256xf32>
    %571 = vector.shape_cast %570 : vector<2x1x256xf32> to vector<2x256xf32>
    %572 = arith.truncf %539 : vector<2x64xf32> to vector<2x64xbf16>
    %cst_212 = arith.constant dense<0.000000e+00> : vector<2x256xf32>
    %573 = tpu.matmul %572, %387, %cst_212 {dimension_numbers = #tpu.dot_dimension_numbers<[1], [0], [0], [1], [0, 0, 1, 1], [], []>} : vector<2x64xbf16>, vector<64x256xbf16>, vector<2x256xf32> -> vector<2x256xf32>
    %574 = arith.addf %571, %573 : vector<2x256xf32>
    %575 = vector.extract_strided_slice %574 {offsets = [0, 0], sizes = [2, 64], strides = [1, 1]} : vector<2x256xf32> to vector<2x64xf32>
    %576 = arith.negf %575 : vector<2x64xf32>
    %577 = math.exp %576 : vector<2x64xf32>
    %cst_213 = arith.constant 1.000000e+00 : f32
    %578 = vector.broadcast %cst_213 : f32 to vector<2x64xf32>
    %579 = arith.addf %578, %577 : vector<2x64xf32>
    %580 = arith.divf %578, %579 : vector<2x64xf32>
    %581 = vector.extract_strided_slice %574 {offsets = [0, 64], sizes = [2, 64], strides = [1, 1]} : vector<2x256xf32> to vector<2x64xf32>
    %582 = arith.negf %581 : vector<2x64xf32>
    %583 = math.exp %582 : vector<2x64xf32>
    %cst_214 = arith.constant 1.000000e+00 : f32
    %584 = vector.broadcast %cst_214 : f32 to vector<2x64xf32>
    %585 = arith.addf %584, %583 : vector<2x64xf32>
    %586 = arith.divf %584, %585 : vector<2x64xf32>
    %587 = vector.extract_strided_slice %574 {offsets = [0, 128], sizes = [2, 64], strides = [1, 1]} : vector<2x256xf32> to vector<2x64xf32>
    %588 = math.tanh %587 : vector<2x64xf32>
    %589 = vector.extract_strided_slice %574 {offsets = [0, 192], sizes = [2, 64], strides = [1, 1]} : vector<2x256xf32> to vector<2x64xf32>
    %590 = arith.negf %589 : vector<2x64xf32>
    %591 = math.exp %590 : vector<2x64xf32>
    %cst_215 = arith.constant 1.000000e+00 : f32
    %592 = vector.broadcast %cst_215 : f32 to vector<2x64xf32>
    %593 = arith.addf %592, %591 : vector<2x64xf32>
    %594 = arith.divf %592, %593 : vector<2x64xf32>
    %595 = arith.mulf %586, %537 : vector<2x64xf32>
    %596 = arith.mulf %580, %588 : vector<2x64xf32>
    %597 = arith.addf %595, %596 : vector<2x64xf32>
    %598 = math.tanh %597 : vector<2x64xf32>
    %599 = arith.mulf %594, %598 : vector<2x64xf32>
    %600 = vector.extract_strided_slice %386 {offsets = [0, 4, 0], sizes = [2, 1, 256], strides = [1, 1, 1]} : vector<2x8x256xf32> to vector<2x1x256xf32>
    %601 = vector.shape_cast %600 : vector<2x1x256xf32> to vector<2x256xf32>
    %602 = arith.truncf %569 : vector<2x64xf32> to vector<2x64xbf16>
    %cst_216 = arith.constant dense<0.000000e+00> : vector<2x256xf32>
    %603 = tpu.matmul %602, %388, %cst_216 {dimension_numbers = #tpu.dot_dimension_numbers<[1], [0], [0], [1], [0, 0, 1, 1], [], []>} : vector<2x64xbf16>, vector<64x256xbf16>, vector<2x256xf32> -> vector<2x256xf32>
    %604 = arith.addf %601, %603 : vector<2x256xf32>
    %605 = vector.extract_strided_slice %604 {offsets = [0, 0], sizes = [2, 64], strides = [1, 1]} : vector<2x256xf32> to vector<2x64xf32>
    %606 = arith.negf %605 : vector<2x64xf32>
    %607 = math.exp %606 : vector<2x64xf32>
    %cst_217 = arith.constant 1.000000e+00 : f32
    %608 = vector.broadcast %cst_217 : f32 to vector<2x64xf32>
    %609 = arith.addf %608, %607 : vector<2x64xf32>
    %610 = arith.divf %608, %609 : vector<2x64xf32>
    %611 = vector.extract_strided_slice %604 {offsets = [0, 64], sizes = [2, 64], strides = [1, 1]} : vector<2x256xf32> to vector<2x64xf32>
    %612 = arith.negf %611 : vector<2x64xf32>
    %613 = math.exp %612 : vector<2x64xf32>
    %cst_218 = arith.constant 1.000000e+00 : f32
    %614 = vector.broadcast %cst_218 : f32 to vector<2x64xf32>
    %615 = arith.addf %614, %613 : vector<2x64xf32>
    %616 = arith.divf %614, %615 : vector<2x64xf32>
    %617 = vector.extract_strided_slice %604 {offsets = [0, 128], sizes = [2, 64], strides = [1, 1]} : vector<2x256xf32> to vector<2x64xf32>
    %618 = math.tanh %617 : vector<2x64xf32>
    %619 = vector.extract_strided_slice %604 {offsets = [0, 192], sizes = [2, 64], strides = [1, 1]} : vector<2x256xf32> to vector<2x64xf32>
    %620 = arith.negf %619 : vector<2x64xf32>
    %621 = math.exp %620 : vector<2x64xf32>
    %cst_219 = arith.constant 1.000000e+00 : f32
    %622 = vector.broadcast %cst_219 : f32 to vector<2x64xf32>
    %623 = arith.addf %622, %621 : vector<2x64xf32>
    %624 = arith.divf %622, %623 : vector<2x64xf32>
    %625 = arith.mulf %616, %567 : vector<2x64xf32>
    %626 = arith.mulf %610, %618 : vector<2x64xf32>
    %627 = arith.addf %625, %626 : vector<2x64xf32>
    %628 = math.tanh %627 : vector<2x64xf32>
    %629 = arith.mulf %624, %628 : vector<2x64xf32>
    %630 = vector.extract_strided_slice %384 {offsets = [0, 4, 0], sizes = [2, 1, 256], strides = [1, 1, 1]} : vector<2x8x256xf32> to vector<2x1x256xf32>
    %631 = vector.shape_cast %630 : vector<2x1x256xf32> to vector<2x256xf32>
    %632 = arith.truncf %599 : vector<2x64xf32> to vector<2x64xbf16>
    %cst_220 = arith.constant dense<0.000000e+00> : vector<2x256xf32>
    %633 = tpu.matmul %632, %387, %cst_220 {dimension_numbers = #tpu.dot_dimension_numbers<[1], [0], [0], [1], [0, 0, 1, 1], [], []>} : vector<2x64xbf16>, vector<64x256xbf16>, vector<2x256xf32> -> vector<2x256xf32>
    %634 = arith.addf %631, %633 : vector<2x256xf32>
    %635 = vector.extract_strided_slice %634 {offsets = [0, 0], sizes = [2, 64], strides = [1, 1]} : vector<2x256xf32> to vector<2x64xf32>
    %636 = arith.negf %635 : vector<2x64xf32>
    %637 = math.exp %636 : vector<2x64xf32>
    %cst_221 = arith.constant 1.000000e+00 : f32
    %638 = vector.broadcast %cst_221 : f32 to vector<2x64xf32>
    %639 = arith.addf %638, %637 : vector<2x64xf32>
    %640 = arith.divf %638, %639 : vector<2x64xf32>
    %641 = vector.extract_strided_slice %634 {offsets = [0, 64], sizes = [2, 64], strides = [1, 1]} : vector<2x256xf32> to vector<2x64xf32>
    %642 = arith.negf %641 : vector<2x64xf32>
    %643 = math.exp %642 : vector<2x64xf32>
    %cst_222 = arith.constant 1.000000e+00 : f32
    %644 = vector.broadcast %cst_222 : f32 to vector<2x64xf32>
    %645 = arith.addf %644, %643 : vector<2x64xf32>
    %646 = arith.divf %644, %645 : vector<2x64xf32>
    %647 = vector.extract_strided_slice %634 {offsets = [0, 128], sizes = [2, 64], strides = [1, 1]} : vector<2x256xf32> to vector<2x64xf32>
    %648 = math.tanh %647 : vector<2x64xf32>
    %649 = vector.extract_strided_slice %634 {offsets = [0, 192], sizes = [2, 64], strides = [1, 1]} : vector<2x256xf32> to vector<2x64xf32>
    %650 = arith.negf %649 : vector<2x64xf32>
    %651 = math.exp %650 : vector<2x64xf32>
    %cst_223 = arith.constant 1.000000e+00 : f32
    %652 = vector.broadcast %cst_223 : f32 to vector<2x64xf32>
    %653 = arith.addf %652, %651 : vector<2x64xf32>
    %654 = arith.divf %652, %653 : vector<2x64xf32>
    %655 = arith.mulf %646, %597 : vector<2x64xf32>
    %656 = arith.mulf %640, %648 : vector<2x64xf32>
    %657 = arith.addf %655, %656 : vector<2x64xf32>
    %658 = math.tanh %657 : vector<2x64xf32>
    %659 = arith.mulf %654, %658 : vector<2x64xf32>
    %660 = vector.extract_strided_slice %386 {offsets = [0, 3, 0], sizes = [2, 1, 256], strides = [1, 1, 1]} : vector<2x8x256xf32> to vector<2x1x256xf32>
    %661 = vector.shape_cast %660 : vector<2x1x256xf32> to vector<2x256xf32>
    %662 = arith.truncf %629 : vector<2x64xf32> to vector<2x64xbf16>
    %cst_224 = arith.constant dense<0.000000e+00> : vector<2x256xf32>
    %663 = tpu.matmul %662, %388, %cst_224 {dimension_numbers = #tpu.dot_dimension_numbers<[1], [0], [0], [1], [0, 0, 1, 1], [], []>} : vector<2x64xbf16>, vector<64x256xbf16>, vector<2x256xf32> -> vector<2x256xf32>
    %664 = arith.addf %661, %663 : vector<2x256xf32>
    %665 = vector.extract_strided_slice %664 {offsets = [0, 0], sizes = [2, 64], strides = [1, 1]} : vector<2x256xf32> to vector<2x64xf32>
    %666 = arith.negf %665 : vector<2x64xf32>
    %667 = math.exp %666 : vector<2x64xf32>
    %cst_225 = arith.constant 1.000000e+00 : f32
    %668 = vector.broadcast %cst_225 : f32 to vector<2x64xf32>
    %669 = arith.addf %668, %667 : vector<2x64xf32>
    %670 = arith.divf %668, %669 : vector<2x64xf32>
    %671 = vector.extract_strided_slice %664 {offsets = [0, 64], sizes = [2, 64], strides = [1, 1]} : vector<2x256xf32> to vector<2x64xf32>
    %672 = arith.negf %671 : vector<2x64xf32>
    %673 = math.exp %672 : vector<2x64xf32>
    %cst_226 = arith.constant 1.000000e+00 : f32
    %674 = vector.broadcast %cst_226 : f32 to vector<2x64xf32>
    %675 = arith.addf %674, %673 : vector<2x64xf32>
    %676 = arith.divf %674, %675 : vector<2x64xf32>
    %677 = vector.extract_strided_slice %664 {offsets = [0, 128], sizes = [2, 64], strides = [1, 1]} : vector<2x256xf32> to vector<2x64xf32>
    %678 = math.tanh %677 : vector<2x64xf32>
    %679 = vector.extract_strided_slice %664 {offsets = [0, 192], sizes = [2, 64], strides = [1, 1]} : vector<2x256xf32> to vector<2x64xf32>
    %680 = arith.negf %679 : vector<2x64xf32>
    %681 = math.exp %680 : vector<2x64xf32>
    %cst_227 = arith.constant 1.000000e+00 : f32
    %682 = vector.broadcast %cst_227 : f32 to vector<2x64xf32>
    %683 = arith.addf %682, %681 : vector<2x64xf32>
    %684 = arith.divf %682, %683 : vector<2x64xf32>
    %685 = arith.mulf %676, %627 : vector<2x64xf32>
    %686 = arith.mulf %670, %678 : vector<2x64xf32>
    %687 = arith.addf %685, %686 : vector<2x64xf32>
    %688 = math.tanh %687 : vector<2x64xf32>
    %689 = arith.mulf %684, %688 : vector<2x64xf32>
    %690 = vector.extract_strided_slice %384 {offsets = [0, 5, 0], sizes = [2, 1, 256], strides = [1, 1, 1]} : vector<2x8x256xf32> to vector<2x1x256xf32>
    %691 = vector.shape_cast %690 : vector<2x1x256xf32> to vector<2x256xf32>
    %692 = arith.truncf %659 : vector<2x64xf32> to vector<2x64xbf16>
    %cst_228 = arith.constant dense<0.000000e+00> : vector<2x256xf32>
    %693 = tpu.matmul %692, %387, %cst_228 {dimension_numbers = #tpu.dot_dimension_numbers<[1], [0], [0], [1], [0, 0, 1, 1], [], []>} : vector<2x64xbf16>, vector<64x256xbf16>, vector<2x256xf32> -> vector<2x256xf32>
    %694 = arith.addf %691, %693 : vector<2x256xf32>
    %695 = vector.extract_strided_slice %694 {offsets = [0, 0], sizes = [2, 64], strides = [1, 1]} : vector<2x256xf32> to vector<2x64xf32>
    %696 = arith.negf %695 : vector<2x64xf32>
    %697 = math.exp %696 : vector<2x64xf32>
    %cst_229 = arith.constant 1.000000e+00 : f32
    %698 = vector.broadcast %cst_229 : f32 to vector<2x64xf32>
    %699 = arith.addf %698, %697 : vector<2x64xf32>
    %700 = arith.divf %698, %699 : vector<2x64xf32>
    %701 = vector.extract_strided_slice %694 {offsets = [0, 64], sizes = [2, 64], strides = [1, 1]} : vector<2x256xf32> to vector<2x64xf32>
    %702 = arith.negf %701 : vector<2x64xf32>
    %703 = math.exp %702 : vector<2x64xf32>
    %cst_230 = arith.constant 1.000000e+00 : f32
    %704 = vector.broadcast %cst_230 : f32 to vector<2x64xf32>
    %705 = arith.addf %704, %703 : vector<2x64xf32>
    %706 = arith.divf %704, %705 : vector<2x64xf32>
    %707 = vector.extract_strided_slice %694 {offsets = [0, 128], sizes = [2, 64], strides = [1, 1]} : vector<2x256xf32> to vector<2x64xf32>
    %708 = math.tanh %707 : vector<2x64xf32>
    %709 = vector.extract_strided_slice %694 {offsets = [0, 192], sizes = [2, 64], strides = [1, 1]} : vector<2x256xf32> to vector<2x64xf32>
    %710 = arith.negf %709 : vector<2x64xf32>
    %711 = math.exp %710 : vector<2x64xf32>
    %cst_231 = arith.constant 1.000000e+00 : f32
    %712 = vector.broadcast %cst_231 : f32 to vector<2x64xf32>
    %713 = arith.addf %712, %711 : vector<2x64xf32>
    %714 = arith.divf %712, %713 : vector<2x64xf32>
    %715 = arith.mulf %706, %657 : vector<2x64xf32>
    %716 = arith.mulf %700, %708 : vector<2x64xf32>
    %717 = arith.addf %715, %716 : vector<2x64xf32>
    %718 = math.tanh %717 : vector<2x64xf32>
    %719 = arith.mulf %714, %718 : vector<2x64xf32>
    %720 = vector.extract_strided_slice %386 {offsets = [0, 2, 0], sizes = [2, 1, 256], strides = [1, 1, 1]} : vector<2x8x256xf32> to vector<2x1x256xf32>
    %721 = vector.shape_cast %720 : vector<2x1x256xf32> to vector<2x256xf32>
    %722 = arith.truncf %689 : vector<2x64xf32> to vector<2x64xbf16>
    %cst_232 = arith.constant dense<0.000000e+00> : vector<2x256xf32>
    %723 = tpu.matmul %722, %388, %cst_232 {dimension_numbers = #tpu.dot_dimension_numbers<[1], [0], [0], [1], [0, 0, 1, 1], [], []>} : vector<2x64xbf16>, vector<64x256xbf16>, vector<2x256xf32> -> vector<2x256xf32>
    %724 = arith.addf %721, %723 : vector<2x256xf32>
    %725 = vector.extract_strided_slice %724 {offsets = [0, 0], sizes = [2, 64], strides = [1, 1]} : vector<2x256xf32> to vector<2x64xf32>
    %726 = arith.negf %725 : vector<2x64xf32>
    %727 = math.exp %726 : vector<2x64xf32>
    %cst_233 = arith.constant 1.000000e+00 : f32
    %728 = vector.broadcast %cst_233 : f32 to vector<2x64xf32>
    %729 = arith.addf %728, %727 : vector<2x64xf32>
    %730 = arith.divf %728, %729 : vector<2x64xf32>
    %731 = vector.extract_strided_slice %724 {offsets = [0, 64], sizes = [2, 64], strides = [1, 1]} : vector<2x256xf32> to vector<2x64xf32>
    %732 = arith.negf %731 : vector<2x64xf32>
    %733 = math.exp %732 : vector<2x64xf32>
    %cst_234 = arith.constant 1.000000e+00 : f32
    %734 = vector.broadcast %cst_234 : f32 to vector<2x64xf32>
    %735 = arith.addf %734, %733 : vector<2x64xf32>
    %736 = arith.divf %734, %735 : vector<2x64xf32>
    %737 = vector.extract_strided_slice %724 {offsets = [0, 128], sizes = [2, 64], strides = [1, 1]} : vector<2x256xf32> to vector<2x64xf32>
    %738 = math.tanh %737 : vector<2x64xf32>
    %739 = vector.extract_strided_slice %724 {offsets = [0, 192], sizes = [2, 64], strides = [1, 1]} : vector<2x256xf32> to vector<2x64xf32>
    %740 = arith.negf %739 : vector<2x64xf32>
    %741 = math.exp %740 : vector<2x64xf32>
    %cst_235 = arith.constant 1.000000e+00 : f32
    %742 = vector.broadcast %cst_235 : f32 to vector<2x64xf32>
    %743 = arith.addf %742, %741 : vector<2x64xf32>
    %744 = arith.divf %742, %743 : vector<2x64xf32>
    %745 = arith.mulf %736, %687 : vector<2x64xf32>
    %746 = arith.mulf %730, %738 : vector<2x64xf32>
    %747 = arith.addf %745, %746 : vector<2x64xf32>
    %748 = math.tanh %747 : vector<2x64xf32>
    %749 = arith.mulf %744, %748 : vector<2x64xf32>
    %750 = vector.extract_strided_slice %384 {offsets = [0, 6, 0], sizes = [2, 1, 256], strides = [1, 1, 1]} : vector<2x8x256xf32> to vector<2x1x256xf32>
    %751 = vector.shape_cast %750 : vector<2x1x256xf32> to vector<2x256xf32>
    %752 = arith.truncf %719 : vector<2x64xf32> to vector<2x64xbf16>
    %cst_236 = arith.constant dense<0.000000e+00> : vector<2x256xf32>
    %753 = tpu.matmul %752, %387, %cst_236 {dimension_numbers = #tpu.dot_dimension_numbers<[1], [0], [0], [1], [0, 0, 1, 1], [], []>} : vector<2x64xbf16>, vector<64x256xbf16>, vector<2x256xf32> -> vector<2x256xf32>
    %754 = arith.addf %751, %753 : vector<2x256xf32>
    %755 = vector.extract_strided_slice %754 {offsets = [0, 0], sizes = [2, 64], strides = [1, 1]} : vector<2x256xf32> to vector<2x64xf32>
    %756 = arith.negf %755 : vector<2x64xf32>
    %757 = math.exp %756 : vector<2x64xf32>
    %cst_237 = arith.constant 1.000000e+00 : f32
    %758 = vector.broadcast %cst_237 : f32 to vector<2x64xf32>
    %759 = arith.addf %758, %757 : vector<2x64xf32>
    %760 = arith.divf %758, %759 : vector<2x64xf32>
    %761 = vector.extract_strided_slice %754 {offsets = [0, 64], sizes = [2, 64], strides = [1, 1]} : vector<2x256xf32> to vector<2x64xf32>
    %762 = arith.negf %761 : vector<2x64xf32>
    %763 = math.exp %762 : vector<2x64xf32>
    %cst_238 = arith.constant 1.000000e+00 : f32
    %764 = vector.broadcast %cst_238 : f32 to vector<2x64xf32>
    %765 = arith.addf %764, %763 : vector<2x64xf32>
    %766 = arith.divf %764, %765 : vector<2x64xf32>
    %767 = vector.extract_strided_slice %754 {offsets = [0, 128], sizes = [2, 64], strides = [1, 1]} : vector<2x256xf32> to vector<2x64xf32>
    %768 = math.tanh %767 : vector<2x64xf32>
    %769 = vector.extract_strided_slice %754 {offsets = [0, 192], sizes = [2, 64], strides = [1, 1]} : vector<2x256xf32> to vector<2x64xf32>
    %770 = arith.negf %769 : vector<2x64xf32>
    %771 = math.exp %770 : vector<2x64xf32>
    %cst_239 = arith.constant 1.000000e+00 : f32
    %772 = vector.broadcast %cst_239 : f32 to vector<2x64xf32>
    %773 = arith.addf %772, %771 : vector<2x64xf32>
    %774 = arith.divf %772, %773 : vector<2x64xf32>
    %775 = arith.mulf %766, %717 : vector<2x64xf32>
    %776 = arith.mulf %760, %768 : vector<2x64xf32>
    %777 = arith.addf %775, %776 : vector<2x64xf32>
    %778 = math.tanh %777 : vector<2x64xf32>
    %779 = arith.mulf %774, %778 : vector<2x64xf32>
    %780 = vector.extract_strided_slice %386 {offsets = [0, 1, 0], sizes = [2, 1, 256], strides = [1, 1, 1]} : vector<2x8x256xf32> to vector<2x1x256xf32>
    %781 = vector.shape_cast %780 : vector<2x1x256xf32> to vector<2x256xf32>
    %782 = arith.truncf %749 : vector<2x64xf32> to vector<2x64xbf16>
    %cst_240 = arith.constant dense<0.000000e+00> : vector<2x256xf32>
    %783 = tpu.matmul %782, %388, %cst_240 {dimension_numbers = #tpu.dot_dimension_numbers<[1], [0], [0], [1], [0, 0, 1, 1], [], []>} : vector<2x64xbf16>, vector<64x256xbf16>, vector<2x256xf32> -> vector<2x256xf32>
    %784 = arith.addf %781, %783 : vector<2x256xf32>
    %785 = vector.extract_strided_slice %784 {offsets = [0, 0], sizes = [2, 64], strides = [1, 1]} : vector<2x256xf32> to vector<2x64xf32>
    %786 = arith.negf %785 : vector<2x64xf32>
    %787 = math.exp %786 : vector<2x64xf32>
    %cst_241 = arith.constant 1.000000e+00 : f32
    %788 = vector.broadcast %cst_241 : f32 to vector<2x64xf32>
    %789 = arith.addf %788, %787 : vector<2x64xf32>
    %790 = arith.divf %788, %789 : vector<2x64xf32>
    %791 = vector.extract_strided_slice %784 {offsets = [0, 64], sizes = [2, 64], strides = [1, 1]} : vector<2x256xf32> to vector<2x64xf32>
    %792 = arith.negf %791 : vector<2x64xf32>
    %793 = math.exp %792 : vector<2x64xf32>
    %cst_242 = arith.constant 1.000000e+00 : f32
    %794 = vector.broadcast %cst_242 : f32 to vector<2x64xf32>
    %795 = arith.addf %794, %793 : vector<2x64xf32>
    %796 = arith.divf %794, %795 : vector<2x64xf32>
    %797 = vector.extract_strided_slice %784 {offsets = [0, 128], sizes = [2, 64], strides = [1, 1]} : vector<2x256xf32> to vector<2x64xf32>
    %798 = math.tanh %797 : vector<2x64xf32>
    %799 = vector.extract_strided_slice %784 {offsets = [0, 192], sizes = [2, 64], strides = [1, 1]} : vector<2x256xf32> to vector<2x64xf32>
    %800 = arith.negf %799 : vector<2x64xf32>
    %801 = math.exp %800 : vector<2x64xf32>
    %cst_243 = arith.constant 1.000000e+00 : f32
    %802 = vector.broadcast %cst_243 : f32 to vector<2x64xf32>
    %803 = arith.addf %802, %801 : vector<2x64xf32>
    %804 = arith.divf %802, %803 : vector<2x64xf32>
    %805 = arith.mulf %796, %747 : vector<2x64xf32>
    %806 = arith.mulf %790, %798 : vector<2x64xf32>
    %807 = arith.addf %805, %806 : vector<2x64xf32>
    %808 = math.tanh %807 : vector<2x64xf32>
    %809 = arith.mulf %804, %808 : vector<2x64xf32>
    %810 = vector.extract_strided_slice %384 {offsets = [0, 7, 0], sizes = [2, 1, 256], strides = [1, 1, 1]} : vector<2x8x256xf32> to vector<2x1x256xf32>
    %811 = vector.shape_cast %810 : vector<2x1x256xf32> to vector<2x256xf32>
    %812 = arith.truncf %779 : vector<2x64xf32> to vector<2x64xbf16>
    %cst_244 = arith.constant dense<0.000000e+00> : vector<2x256xf32>
    %813 = tpu.matmul %812, %387, %cst_244 {dimension_numbers = #tpu.dot_dimension_numbers<[1], [0], [0], [1], [0, 0, 1, 1], [], []>} : vector<2x64xbf16>, vector<64x256xbf16>, vector<2x256xf32> -> vector<2x256xf32>
    %814 = arith.addf %811, %813 : vector<2x256xf32>
    %815 = vector.extract_strided_slice %814 {offsets = [0, 0], sizes = [2, 64], strides = [1, 1]} : vector<2x256xf32> to vector<2x64xf32>
    %816 = arith.negf %815 : vector<2x64xf32>
    %817 = math.exp %816 : vector<2x64xf32>
    %cst_245 = arith.constant 1.000000e+00 : f32
    %818 = vector.broadcast %cst_245 : f32 to vector<2x64xf32>
    %819 = arith.addf %818, %817 : vector<2x64xf32>
    %820 = arith.divf %818, %819 : vector<2x64xf32>
    %821 = vector.extract_strided_slice %814 {offsets = [0, 64], sizes = [2, 64], strides = [1, 1]} : vector<2x256xf32> to vector<2x64xf32>
    %822 = arith.negf %821 : vector<2x64xf32>
    %823 = math.exp %822 : vector<2x64xf32>
    %cst_246 = arith.constant 1.000000e+00 : f32
    %824 = vector.broadcast %cst_246 : f32 to vector<2x64xf32>
    %825 = arith.addf %824, %823 : vector<2x64xf32>
    %826 = arith.divf %824, %825 : vector<2x64xf32>
    %827 = vector.extract_strided_slice %814 {offsets = [0, 128], sizes = [2, 64], strides = [1, 1]} : vector<2x256xf32> to vector<2x64xf32>
    %828 = math.tanh %827 : vector<2x64xf32>
    %829 = vector.extract_strided_slice %814 {offsets = [0, 192], sizes = [2, 64], strides = [1, 1]} : vector<2x256xf32> to vector<2x64xf32>
    %830 = arith.negf %829 : vector<2x64xf32>
    %831 = math.exp %830 : vector<2x64xf32>
    %cst_247 = arith.constant 1.000000e+00 : f32
    %832 = vector.broadcast %cst_247 : f32 to vector<2x64xf32>
    %833 = arith.addf %832, %831 : vector<2x64xf32>
    %834 = arith.divf %832, %833 : vector<2x64xf32>
    %835 = arith.mulf %826, %777 : vector<2x64xf32>
    %836 = arith.mulf %820, %828 : vector<2x64xf32>
    %837 = arith.addf %835, %836 : vector<2x64xf32>
    %838 = math.tanh %837 : vector<2x64xf32>
    %839 = arith.mulf %834, %838 : vector<2x64xf32>
    %840 = vector.extract_strided_slice %386 {offsets = [0, 0, 0], sizes = [2, 1, 256], strides = [1, 1, 1]} : vector<2x8x256xf32> to vector<2x1x256xf32>
    %841 = vector.shape_cast %840 : vector<2x1x256xf32> to vector<2x256xf32>
    %842 = arith.truncf %809 : vector<2x64xf32> to vector<2x64xbf16>
    %cst_248 = arith.constant dense<0.000000e+00> : vector<2x256xf32>
    %843 = tpu.matmul %842, %388, %cst_248 {dimension_numbers = #tpu.dot_dimension_numbers<[1], [0], [0], [1], [0, 0, 1, 1], [], []>} : vector<2x64xbf16>, vector<64x256xbf16>, vector<2x256xf32> -> vector<2x256xf32>
    %844 = arith.addf %841, %843 : vector<2x256xf32>
    %845 = vector.extract_strided_slice %844 {offsets = [0, 0], sizes = [2, 64], strides = [1, 1]} : vector<2x256xf32> to vector<2x64xf32>
    %846 = arith.negf %845 : vector<2x64xf32>
    %847 = math.exp %846 : vector<2x64xf32>
    %cst_249 = arith.constant 1.000000e+00 : f32
    %848 = vector.broadcast %cst_249 : f32 to vector<2x64xf32>
    %849 = arith.addf %848, %847 : vector<2x64xf32>
    %850 = arith.divf %848, %849 : vector<2x64xf32>
    %851 = vector.extract_strided_slice %844 {offsets = [0, 64], sizes = [2, 64], strides = [1, 1]} : vector<2x256xf32> to vector<2x64xf32>
    %852 = arith.negf %851 : vector<2x64xf32>
    %853 = math.exp %852 : vector<2x64xf32>
    %cst_250 = arith.constant 1.000000e+00 : f32
    %854 = vector.broadcast %cst_250 : f32 to vector<2x64xf32>
    %855 = arith.addf %854, %853 : vector<2x64xf32>
    %856 = arith.divf %854, %855 : vector<2x64xf32>
    %857 = vector.extract_strided_slice %844 {offsets = [0, 128], sizes = [2, 64], strides = [1, 1]} : vector<2x256xf32> to vector<2x64xf32>
    %858 = math.tanh %857 : vector<2x64xf32>
    %859 = vector.extract_strided_slice %844 {offsets = [0, 192], sizes = [2, 64], strides = [1, 1]} : vector<2x256xf32> to vector<2x64xf32>
    %860 = arith.negf %859 : vector<2x64xf32>
    %861 = math.exp %860 : vector<2x64xf32>
    %cst_251 = arith.constant 1.000000e+00 : f32
    %862 = vector.broadcast %cst_251 : f32 to vector<2x64xf32>
    %863 = arith.addf %862, %861 : vector<2x64xf32>
    %864 = arith.divf %862, %863 : vector<2x64xf32>
    %865 = arith.mulf %856, %807 : vector<2x64xf32>
    %866 = arith.mulf %850, %858 : vector<2x64xf32>
    %867 = arith.addf %865, %866 : vector<2x64xf32>
    %868 = math.tanh %867 : vector<2x64xf32>
    %869 = arith.mulf %864, %868 : vector<2x64xf32>
    %870 = arith.truncf %839 : vector<2x64xf32> to vector<2x64xbf16>
    %c0_252 = arith.constant 0 : index
    %c0_253 = arith.constant 0 : index
    %871 = vector.load %arg27[%c0_252, %c0_253] : memref<64x2xbf16, #tpu.memory_space<vmem>>, vector<64x2xbf16>
    %cst_254 = arith.constant dense<0.000000e+00> : vector<2x2xf32>
    %872 = tpu.matmul %870, %871, %cst_254 {dimension_numbers = #tpu.dot_dimension_numbers<[1], [0], [0], [1], [0, 0, 1, 1], [], []>} : vector<2x64xbf16>, vector<64x2xbf16>, vector<2x2xf32> -> vector<2x2xf32>
    %873 = arith.truncf %869 : vector<2x64xf32> to vector<2x64xbf16>
    %c0_255 = arith.constant 0 : index
    %c0_256 = arith.constant 0 : index
    %874 = vector.load %arg28[%c0_255, %c0_256] : memref<64x2xbf16, #tpu.memory_space<vmem>>, vector<64x2xbf16>
    %cst_257 = arith.constant dense<0.000000e+00> : vector<2x2xf32>
    %875 = tpu.matmul %873, %874, %cst_257 {dimension_numbers = #tpu.dot_dimension_numbers<[1], [0], [0], [1], [0, 0, 1, 1], [], []>} : vector<2x64xbf16>, vector<64x2xbf16>, vector<2x2xf32> -> vector<2x2xf32>
    %876 = arith.addf %872, %875 : vector<2x2xf32>
    %877 = arith.truncf %374 : vector<2x32xf32> to vector<2x32xbf16>
    %c0_258 = arith.constant 0 : index
    %c0_259 = arith.constant 0 : index
    %878 = vector.load %arg29[%c0_258, %c0_259] : memref<32x2xbf16, #tpu.memory_space<vmem>>, vector<32x2xbf16>
    %cst_260 = arith.constant dense<0.000000e+00> : vector<2x2xf32>
    %879 = tpu.matmul %877, %878, %cst_260 {dimension_numbers = #tpu.dot_dimension_numbers<[1], [0], [0], [1], [0, 0, 1, 1], [], []>} : vector<2x32xbf16>, vector<32x2xbf16>, vector<2x2xf32> -> vector<2x2xf32>
    %880 = arith.addf %876, %879 : vector<2x2xf32>
    %c0_261 = arith.constant 0 : index
    %c0_262 = arith.constant 0 : index
    %881 = vector.load %arg30[%c0_261, %c0_262] : memref<1x2xf32, #tpu.memory_space<vmem>>, vector<1x2xf32>
    %882 = vector.broadcast %881 : vector<1x2xf32> to vector<2x2xf32>
    %883 = arith.addf %880, %882 : vector<2x2xf32>
    %cst_263 = arith.constant dense<0xFF800000> : vector<2xf32>
    %884 = vector.multi_reduction <maximumf>, %883, %cst_263 [1] : vector<2x2xf32> to vector<2xf32>
    %885 = vector.shape_cast %884 : vector<2xf32> to vector<2x1xf32>
    %886 = vector.broadcast %885 : vector<2x1xf32> to vector<2x2xf32>
    %887 = arith.subf %883, %886 : vector<2x2xf32>
    %888 = math.exp %887 : vector<2x2xf32>
    %cst_264 = arith.constant dense<0.000000e+00> : vector<2xf32>
    %889 = vector.multi_reduction <add>, %888, %cst_264 [1] : vector<2x2xf32> to vector<2xf32>
    %890 = vector.shape_cast %889 : vector<2xf32> to vector<2x1xf32>
    %891 = math.log %890 : vector<2x1xf32>
    %892 = arith.addf %885, %891 : vector<2x1xf32>
    %893 = vector.broadcast %892 : vector<2x1xf32> to vector<2x2xf32>
    %894 = arith.subf %883, %893 : vector<2x2xf32>
    %c0_265 = arith.constant 0 : index
    %c0_266 = arith.constant 0 : index
    %895 = vector.load %arg31[%c0_265, %c0_266] : memref<2x2xf32, #tpu.memory_space<vmem>>, vector<2x2xf32>
    tpu.vector_store %arg31[%c0_265, %c0_266], %894 {strides = array<i32>} : memref<2x2xf32, #tpu.memory_space<vmem>>, vector<2x2xf32>,
    return
  }
}

</mosaic_0001>

<bundles_post_ra>
// kernel: forward.1
= control target key start
LH: loop header
LB: loop body
LE: loop exit
PB: predicated region body
PF: predicated region fallthrough
CT: control target
= control target key end

     0   :  { %s5914_s6 = smov 1   ;;  %s5915_s10 = smov 2   ;;  %s7014_s0 = inlined_call_operand.smem [shape: u32[32], index: -1, kind: input, shape index: {}] }
   0x1   :  { %s5959_s5 = sld [smem:[%s7014_s0]]   ;;  %s5916_s14 = smov 3  }
   0x2   :  { %s5964_s9 = sld [smem:[%s7014_s0 + %s5914_s6]]   ;;  %s5917_s18 = smov 4  }
   0x3   :  { %s5969_s13 = sld [smem:[%s7014_s0 + %s5915_s10]]   ;;  %s5918_s22 = smov 5  }
   0x4   :  { %s5974_s17 = sld [smem:[%s7014_s0 + %s5916_s14]]   ;;  %s5919_s26 = smov 6  }
   0x5   :  { %s5979_s21 = sld [smem:[%s7014_s0 + %s5917_s18]]   ;;  %s5920_s30 = smov 7  }
   0x6   :  { %s5984_s25 = sld [smem:[%s7014_s0 + %s5918_s22]]   ;;  %s5921_s4 = smov 8  }
   0x7   :  { %s5989_s29 = sld [smem:[%s7014_s0 + %s5919_s26]]   ;;  %s5922_s10 = smov 9  }
   0x8   :  { %s5994_s3 = sld [smem:[%s7014_s0 + %s5920_s30]]   ;;  %s5923_s15 = smov 10  }
   0x9   :  { %s5999_s8 = sld [smem:[%s7014_s0 + %s5921_s4]]   ;;  %s5924_s20 = smov 11  }
   0xa   :  { %s6004_s14 = sld [smem:[%s7014_s0 + %s5922_s10]]   ;;  %s5925_s26 = smov 12  }
   0xb   :  { %s6009_s19 = sld [smem:[%s7014_s0 + %s5923_s15]]   ;;  %s5926_s1 = smov 13  }
   0xc   :  { %s6014_s24 = sld [smem:[%s7014_s0 + %s5924_s20]]   ;;  %s5927_s7 = smov 14  }
   0xd   :  { %s6019_s30 = sld [smem:[%s7014_s0 + %s5925_s26]]   ;;  %s5928_s15 = smov 15  }
   0xe   :  { %s6024_s6 = sld [smem:[%s7014_s0 + %s5926_s1]]   ;;  %s5929_s22 = smov 16  }
   0xf   :  { %s6029_s12 = sld [smem:[%s7014_s0 + %s5927_s7]]   ;;  %s5930_s28 = smov 17  }
  0x10   :  { %s6034_s20 = sld [smem:[%s7014_s0 + %s5928_s15]]   ;;  %s5931_s7 = smov 18  }
  0x11   :  { %s6039_s27 = sld [smem:[%s7014_s0 + %s5929_s22]]   ;;  %s5932_s15 = smov 19  }
  0x12   :  { %s6044_s4 = sld [smem:[%s7014_s0 + %s5930_s28]]   ;;  %s5933_s22 = smov 20  }
  0x13   :  { %s5934_s28 = smov 21  }
  0x14   :  { %7027 = sst [smem:[#allocation5_spill]] %s6024_s6 }
  0x15   :  { %s6049_s6 = sld [smem:[%s7014_s0 + %s5931_s7]]   ;;  %s5935_s7 = smov 22  }
  0x16   :  { %7028 = sst [smem:[#allocation6_spill]] %s6034_s20 }
  0x17   :  { %7029 = sst [smem:[#allocation7_spill]] %s6039_s27 }
  0x18   :  { %7030 = sst [smem:[#allocation8_spill]] %s6044_s4 }
  0x19   :  { %s6054_s20 = sld [smem:[%s7014_s0 + %s5932_s15]]   ;;  %s5936_s15 = smov 23  }
  0x1a   :  { %s6059_s27 = sld [smem:[%s7014_s0 + %s5933_s22]]   ;;  %s5937_s22 = smov 24  }
  0x1b   :  { %7031 = sst [smem:[#allocation9_spill]] %s6049_s6 }
  0x1c   :  { %s6064_s4 = sld [smem:[%s7014_s0 + %s5934_s28]]   ;;  %s5938_s28 = smov 25  }
  0x1d   :  { %s6069_s6 = sld [smem:[%s7014_s0 + %s5935_s7]]   ;;  %s5939_s7 = smov 26  }
  0x1f   :  { %7032 = sst [smem:[#allocation10_spill]] %s6054_s20 }
  0x20   :  { %7033 = sst [smem:[#allocation11_spill]] %s6059_s27 }
  0x21   :  { %s6074_s20 = sld [smem:[%s7014_s0 + %s5936_s15]]   ;;  %s5940_s15 = smov 27  }
  0x22   :  { %7034 = sst [smem:[#allocation12_spill]] %s6064_s4 }
  0x23   :  { %7035 = sst [smem:[#allocation13_spill]] %s6069_s6 }
  0x24   :  { %s6079_s27 = sld [smem:[%s7014_s0 + %s5937_s22]]   ;;  %s5941_s22 = smov 28  }
  0x25   :  { %s6084_s4 = sld [smem:[%s7014_s0 + %s5938_s28]]   ;;  %s5942_s28 = smov 29  }
  0x26   :  { %s6089_s6 = sld [smem:[%s7014_s0 + %s5939_s7]]   ;;  %s5943_s7 = smov 30  }
  0x27   :  { %7036 = sst [smem:[#allocation14_spill]] %s6074_s20 }
  0x28   :  { %s6094_s20 = sld [smem:[%s7014_s0 + %s5940_s15]]   ;;  %s5944_s15 = smov 31  }
  0x2a   :  { %7037 = sst [smem:[#allocation15_spill]] %s6079_s27 }
  0x2b   :  { %7038 = sst [smem:[#allocation16_spill]] %s6084_s4 }
  0x2c   :  { %7039 = sst [smem:[#allocation17_spill]] %s6089_s6 }
  0x2d   :  { %s6099_s27 = sld [smem:[%s7014_s0 + %s5941_s22]]  }
  0x2e   :  { %7040 = sst [smem:[#allocation18_spill]] %s6094_s20 }
  0x2f   :  { %s6104_s4 = sld [smem:[%s7014_s0 + %s5942_s28]]  }
  0x30   :  { %s6109_s6 = sld [smem:[%s7014_s0 + %s5943_s7]]  }
  0x31   :  { %s6114_s20 = sld [smem:[%s7014_s0 + %s5944_s15]]  }
  0x32   :  { %v132_v0 = vld [vmem:[%s5959_s5] sm:$0xff]  ;;  %vm136_vm0 = vcmask 261120   ;;  %v133_v1 = vld [vmem:[%s5959_s5 + $0x8] sm:$0xff] }
  0x33   :  { %v137_v2 = vsel %vm136_vm0, %v132_v0, 0.0  ;;  %v140_v3 = vsel %vm136_vm0, %v133_v1, 0.0 }
  0x34   :  { %138 = vadd.xlane.f32.xlu0 %v137_v2 }
  0x38   :  { %141 = vadd.xlane.f32.xlu0 %v140_v3 }
  0x39   :  { %68 = vsyncpa [#allocation3], 0  ;;  %v5356_v14 = vld [vmem:[%s5979_s21 + $0x8] sm:$0xff]   ;;  %v5945_v16 = vmov 0.0   ;;  %v5358_v17 = vld [vmem:[%s5979_s21] sm:$0xff]   ;;  %vm5946_vm1 = vmmov 0  }
  0x3a   :  { %v5357_v15 = vld [vmem:[%s5989_s29 + $0x8] sm:$0xff]   ;;  %5071 = vmatprep.subr.bf16.mxu0 %v5945_v16  ;;  %5079 = vmatprep.subr.bf16.mxu1 %v5945_v16  ;;  %v5359_v18 = vld [vmem:[%s5989_s29] sm:$0xff]   ;;  %vm389_vm2 = vcmask 130048   ;;  %vm526_vm3 = vcmask 1043456   ;;  %vm498_vm4 = vcmask 64512   ;;  %s5947_s0 = smov 112  }
  0x3b   :  { %5072 = vmatpush3.bf16.msra.mxu0 %v5356_v14  ;;  %5080 = vmatpush3.bf16.msra.mxu1 %v5357_v15  ;;  %v4743_v27 = vld [vmem:[%s5969_s13] ss:$0 sm:$0xff]  ;;  %v5360_v35 = vld [vmem:[%s5999_s8 + $0x8] sm:$0xff]   ;;  %s7041_s5 = sld [smem:[#allocation5_spill]]  ;;  %vm1130_vm5 = vcmask 523264   ;;  %vm2278_vm6 = vcmask 1041409  }
  0x3c   :  { %5073 = vmatprep.subr.bf16.mxu0 %v5945_v16  ;;  %5081 = vmatprep.subr.bf16.mxu1 %v5945_v16  ;;  %v4744_v31 = vld [vmem:[%s5974_s17] ss:$0 sm:$0xff]  ;;  %s7043_s13 = sld [smem:[#allocation6_spill]]  ;;  %vm4683_vm7 = vcmask 9216  }
  0x3d   :  { %5075 = vmatprep.mubr.msk.bf16.mxu0 %vm5946_vm1, %v5945_v16  ;;  %5083 = vmatprep.mubr.msk.bf16.mxu1 %vm5946_vm1, %v5945_v16  ;;  %v5361_v37 = vld [vmem:[%s5999_s8] sm:$0xff]   ;;  %s7044_s17 = sld [smem:[#allocation8_spill]] }
  0x3e   :  { %v4749_v38 = vld [vmem:[%s5994_s3] ss:$0 sm:$0xff]  ;;  %s7045_s22 = sld [smem:[#allocation9_spill]] }
  0x3f   :  { %5074 = vmatpush3.bf16.msra.mxu0 %v5358_v17  ;;  %5082 = vmatpush3.bf16.msra.mxu1 %v5359_v18  ;;  %v4745_v45 = vld [vmem:[%s5984_s25] ss:$0 sm:$0xff]  ;;  %s7046_s23 = sld [smem:[#allocation10_spill]] }
  0x40   :  { %5087 = vmatprep.subr.bf16.mxu0 %v5945_v16  ;;  %5095 = vmatprep.subr.bf16.mxu1 %v5945_v16  ;;  %v4753_v52 = vld [vmem:[%s6004_s14] ss:$0 sm:$0xff] }
  0xbd   :  { %v139_v4 = vpop.xlane.xlu0 %138 }
  0xbe   :  { %v144_v5 = vmul.f32 0.03125, %v139_v4 }
  0xc0   :  { %v146_v6 = vsub.f32 %v132_v0, %v144_v5 }
  0xc1   :  { %v142_v7 = vpop.xlane.xlu0 %141 }
  0xc2   :  { %v145_v8 = vmul.f32 0.03125, %v142_v7  ;;  %v148_v9 = vmul.f32 %v146_v6, %v146_v6 }
  0xc4   :  { %v147_v10 = vsub.f32 %v133_v1, %v145_v8  ;;  %v150_v11 = vsel %vm136_vm0, %v148_v9, 0.0 }
  0xc5   :  { %151 = vadd.xlane.f32.xlu1 %v150_v11 }
  0xc6   :  { %v149_v12 = vmul.f32 %v147_v10, %v147_v10 }
  0xc8   :  { %v153_v13 = vsel %vm136_vm0, %v149_v12, 0.0  ;;  %v6188_v12 = vld [vmem:[%s5964_s9 + $0x1] ss:$0 sm:$0xff] }
  0xc9   :  { %154 = vadd.xlane.f32.xlu1 %v153_v13 }
 0x14e   :  { %v152_v19 = vpop.xlane.xlu1 %151 }
 0x14f   :  { %v156_v20 = vmul.f32 0.03125, %v152_v19 }
 0x151   :  { %v158_v21 = vadd.f32 1e-05, %v156_v20 }
 0x152   :  { %v155_v22 = vpop.xlane.xlu1 %154 }
 0x153   :  { %5426 = vrsqrt.f32 %v158_v21  ;;  %v157_v23 = vmul.f32 0.03125, %v155_v22 }
 0x155   :  { %v159_v24 = vadd.f32 1e-05, %v157_v23 }
 0x157   :  { %5428 = vrsqrt.f32 %v159_v24 }
 0x160   :  { %v5427_v25 = vpop.eup %5426 }
 0x161   :  { %v162_v26 = vmul.f32 %v5427_v25, %v146_v6  ;;  %v6184_v6 = vld [vmem:[%s5964_s9] ss:$0 sm:$0xff]  ;;  %s7042_s9 = sld [smem:[#allocation7_spill]] }
 0x163   :  { %v170_v30 = vmul.f32 %v4743_v27, %v162_v26 }
 0x164   :  { %v5429_v28 = vpop.eup %5428 }
 0x165   :  { %v163_v29 = vmul.f32 %v5429_v28, %v147_v10  ;;  %v6138_v33 = vadd.f32 %v4744_v31, %v170_v30 }
 0x167   :  { %v171_v32 = vmul.f32 %v4743_v27, %v163_v29 }
 0x169   :  { %v6140_v34 = vadd.f32 %v4744_v31, %v171_v32 }
 0x16b   :  { %v182_v36 = vpack.c.bf16 %v6140_v34, %v6138_v33 }
 0x16d   :  { %5076 = vmatmul.mubr.msk.bf16.vlgmr.msra.gmra.mxu0 %vm136_vm0, %v182_v36  ;;  %5084 = vmatmul.mubr.msk.bf16.vlgmr.msra.gmra.mxu1 %vm136_vm0, %v182_v36 }
 0x16e   :  { %5088 = vmatpush3.bf16.msra.mxu0 %v5360_v35  ;;  %5091 = vmatprep.mubr.msk.bf16.mxu0 %vm5946_vm1, %v5945_v16 }
 0x16f   :  { %5089 = vmatprep.subr.bf16.mxu0 %v5945_v16  ;;  %5097 = vmatprep.mubr.msk.bf16.mxu1 %vm5946_vm1, %v5945_v16 }
 0x172   :  { %5090 = vmatpush3.bf16.msra.mxu0 %v5361_v37 }
 0x173   :  { %5101 = vmatprep.subr.bf16.mxu0 %v5945_v16 }
 0x175   :  { %5092 = vmatmul.mubr.msk.bf16.vlgmr.msra.gmra.mxu0 %vm136_vm0, %v182_v36 }
 0x176   :  { %5103 = vmatprep.mubr.msk.bf16.mxu0 %vm5946_vm1, %v5945_v16 }
 0x22d   :  { %v243_v39 = vpop.f32.mrf.mxu0  ;;  %v307_v40 = vpop.f32.mrf.mxu1 }
 0x22e   :  { %v308_v41 = vadd.f32 %v4749_v38, %v307_v40  ;;  %v244_v53 = vadd.f32 %v4745_v45, %v243_v39 }
 0x22f   :  { %v5077_v42 = vpop.f32.mrf.mxu0  ;;  %v5085_v43 = vpop.f32.mrf.mxu1 }
 0x230   :  { %v6158_v44 = vpack.c.bf16 %v308_v41, %v308_v41  ;;  %v383_v59 = vpack.c.bf16 %v244_v53, %v244_v53 }
 0x231   :  { %v246_v46 = vpop.f32.mrf.mxu0  ;;  %v310_v47 = vpop.f32.mrf.mxu1 }
 0x232   :  { %v394_v48 = vsel %vm389_vm2, %v6158_v44, 0  ;;  %v311_v49 = vadd.f32 %v4749_v38, %v310_v47  ;;  %v247_v60 = vadd.f32 %v4745_v45, %v246_v46  ;;  %v5362_v46 = vld [vmem:[%s6009_s19] sm:$0xff]  }
 0x233   :  { %v5078_v50 = vpop.f32.mrf.mxu0  ;;  %v5086_v51 = vpop.f32.mrf.mxu1  ;;  %5096 = vmatpush3.bf16.xpose.msra.mxu1 %v394_v48 }
 0x234   :  { %v386_v54 = vpack.c.bf16 %v311_v49, %v311_v49  ;;  %5107 = vmatprep.subr.bf16.mxu1 %v5945_v16  ;;  %v384_v2 = vpack.c.bf16 %v247_v60, %v247_v60 }
 0x235   :  { %v371_v55 = vpop.f32.mrf.mxu0 }
 0x236   :  { %v440_v56 = vsel %vm389_vm2, %v386_v54, 0  ;;  %v372_v57 = vadd.f32 %v4753_v52, %v371_v55 }
 0x237   :  { %v5093_v58 = vpop.f32.mrf.mxu0  ;;  %5102 = vmatpush3.bf16.xpose.msra.mxu0 %v440_v56 }
 0x238   :  { %v6166_v61 = vpack.c.bf16 %v372_v57, %v372_v57  ;;  %5113 = vmatprep.subr.bf16.mxu0 %v5945_v16 }
 0x239   :  { %v374_v62 = vpop.f32.mrf.mxu0 }
 0x23a   :  { %v528_v63 = vsel %vm526_vm3, %v6166_v61, 0  ;;  %v375_v0 = vadd.f32 %v4753_v52, %v374_v62  ;;  %5098 = vmatmul.mubr.msk.bf16.vlgmr.msra.gmra.mxu1 %vm389_vm2, %v383_v59 }
 0x23b   :  { %v5094_v1 = vpop.f32.mrf.mxu0  ;;  %5108 = vmatpush3.bf16.msra.mxu1 %v528_v63  ;;  %5109 = vmatprep.mubr.msk.bf16.mxu1 %vm5946_vm1, %v5945_v16 }
 0x23c   :  { %v6174_v3 = vpack.c.bf16 %v375_v0, %v375_v0  ;;  %5119 = vmatprep.subr.bf16.mxu1 %v5945_v16 }
 0x23e   :  { %v574_v4 = vsel %vm526_vm3, %v6174_v3, 0  ;;  %5104 = vmatmul.mubr.msk.bf16.vlgmr.msra.gmra.mxu0 %vm389_vm2, %v384_v2 }
 0x23f   :  { %5114 = vmatpush3.bf16.msra.mxu0 %v574_v4  ;;  %5115 = vmatprep.mubr.msk.bf16.mxu0 %vm5946_vm1, %v5945_v16 }
 0x240   :  { %5125 = vmatprep.subr.bf16.mxu0 %v5945_v16 }
 0x2fa   :  { %v430_v5 = vpop.f32.mrf.mxu1 }
 0x2fb   :  { %v482_v7 = vmul.f32 0.25, %v430_v5 }
 0x2fc   :  { %v5099_v8 = vpop.f32.mrf.mxu1 }
 0x2fd   :  { %v496_v9 = vadd.f32 %v6184_v6, %v482_v7 }
 0x2fe   :  { %v433_v10 = vpop.f32.mrf.mxu1  ;;  %v476_v11 = vpop.f32.mrf.mxu0 }
 0x2ff   :  { %v483_v13 = vmul.f32 0.25, %v476_v11  ;;  %v499_v14 = vsel %vm498_vm4, %v496_v9, -inf }
 0x300   :  { %500 = vmax.xlane.f32.xlu0 %v499_v14  ;;  %v5100_v15 = vpop.f32.mrf.mxu1  ;;  %v5105_v17 = vpop.f32.mrf.mxu0 }
 0x301   :  { %v497_v18 = vadd.f32 %v6188_v12, %v483_v13 }
 0x302   :  { %v479_v19 = vpop.f32.mrf.mxu0 }
 0x303   :  { %v502_v20 = vsel %vm498_vm4, %v497_v18, -inf }
 0x304   :  { %503 = vmax.xlane.f32.xlu1 %v502_v20  ;;  %v5106_v21 = vpop.f32.mrf.mxu0 }
 0x389   :  { %v501_v22 = vpop.xlane.xlu0 %500 }
 0x38a   :  { %v505_v23 = vsub.f32 %v496_v9, %v501_v22 }
 0x38c   :  { %v507_v24 = vmul.f32 1.442695, %v505_v23 }
 0x38d   :  { %v504_v25 = vpop.xlane.xlu1 %503 }
 0x38e   :  { %5430 = vpow2.f32 %v507_v24  ;;  %v506_v26 = vsub.f32 %v497_v18, %v504_v25 }
 0x390   :  { %v509_v27 = vmul.f32 1.442695, %v506_v26 }
 0x392   :  { %5432 = vpow2.f32 %v509_v27 }
 0x39b   :  { %v5431_v28 = vpop.eup %5430 }
 0x39c   :  { %v511_v29 = vsel %vm498_vm4, %v5431_v28, 0.0 }
 0x39d   :  { %512 = vadd.xlane.f32.xlu0 %v511_v29 }
 0x39f   :  { %v5433_v30 = vpop.eup %5432 }
 0x3a0   :  { %v514_v31 = vsel %vm498_vm4, %v5433_v30, 0.0 }
 0x3a1   :  { %515 = vadd.xlane.f32.xlu1 %v514_v31 }
 0x3b2   :  { %731 = vrot.lane.b32.xlu1 %v386_v54, %s5947_s0 }
 0x3b3   :  { %679 = vrot.lane.b32.xlu0 %v6158_v44, %s5947_s0 }
 0x3b6   :  { %676 = vrot.lane.b32.xlu1 %v383_v59, %s5947_s0 }
 0x3ba   :  { %728 = vrot.lane.b32.xlu1 %v384_v2, %s5947_s0 }
 0x426   :  { %v513_v32 = vpop.xlane.xlu0 %512 }
 0x427   :  { %5434 = vrcp.f32 %v513_v32 }
 0x42a   :  { %v516_v35 = vpop.xlane.xlu1 %515  ;;  %v680_v41 = vpop.permute.xlu0 %679 }
 0x42b   :  { %5436 = vrcp.f32 %v516_v35  ;;  %v685_v43 = vsel %vm389_vm2, %v680_v41, 0 }
 0x42e   :  { %v732_v44 = vpop.permute.xlu1 %731 }
 0x42f   :  { %v737_v54 = vsel %vm389_vm2, %v732_v44, 0 }
 0x432   :  { %v677_v45 = vpop.permute.xlu1 %676 }
 0x434   :  { %v5435_v36 = vpop.eup %5434 }
 0x435   :  { %v519_v37 = vmul.f32 %v5435_v36, %v5431_v28 }
 0x436   :  { %v729_v59 = vpop.permute.xlu1 %728 }
 0x437   :  { %v521_v38 = vpack.c.bf16 %v519_v37, %v519_v37 }
 0x438   :  { %v5437_v39 = vpop.eup %5436 }
 0x439   :  { %5110 = vmatmul.mubr.msk.bf16.vlgmr.msra.gmra.mxu1 %vm498_vm4, %v521_v38  ;;  %v520_v40 = vmul.f32 %v5437_v39, %v5433_v30  ;;  %v5363_v39 = vld [vmem:[%s6009_s19 + $0x8] sm:$0xff]  }
 0x43a   :  { %5121 = vmatprep.mubr.msk.bf16.mxu1 %vm5946_vm1, %v5945_v16  ;;  %5120 = vmatpush3.bf16.msra.mxu1 %v5362_v46 }
 0x43b   :  { %v522_v42 = vpack.c.bf16 %v520_v40, %v520_v40  ;;  %5131 = vmatprep.subr.bf16.mxu1 %v5945_v16 }
 0x43d   :  { %5116 = vmatmul.mubr.msk.bf16.vlgmr.msra.gmra.mxu0 %vm498_vm4, %v522_v42 }
 0x43e   :  { %5126 = vmatpush3.bf16.xpose.msra.mxu0 %v685_v43  ;;  %5127 = vmatprep.mubr.msk.bf16.mxu0 %vm5946_vm1, %v5945_v16 }
 0x43f   :  { %5137 = vmatprep.subr.bf16.mxu0 %v5945_v16 }
 0x445   :  { %5128 = vmatmul.mubr.msk.bf16.vlgmr.msra.gmra.mxu0 %vm389_vm2, %v677_v45 }
 0x446   :  { %5139 = vmatprep.mubr.msk.bf16.mxu0 %vm5946_vm1, %v5945_v16 }
 0x4f9   :  { %v564_v47 = vpop.f32.mrf.mxu1 }
 0x4fb   :  { %v5111_v48 = vpop.f32.mrf.mxu1 }
 0x4fd   :  { %v567_v49 = vpop.f32.mrf.mxu1  ;;  %v610_v50 = vpop.f32.mrf.mxu0 }
 0x4fe   :  { %v616_v51 = vpack.c.bf16 %v610_v50, %v564_v47  ;;  %v4765_v49 = vld [vmem:[%s6014_s24] ss:$0 sm:$0xff] }
 0x4ff   :  { %v5112_v52 = vpop.f32.mrf.mxu1  ;;  %v5117_v53 = vpop.f32.mrf.mxu0 }
 0x500   :  { %5122 = vmatmul.mubr.msk.bf16.vlgmr.msra.gmra.mxu1 %vm389_vm2, %v616_v51 }
 0x501   :  { %5132 = vmatpush3.bf16.xpose.msra.mxu1 %v737_v54  ;;  %v613_v55 = vpop.f32.mrf.mxu0  ;;  %5133 = vmatprep.mubr.msk.bf16.mxu1 %vm5946_vm1, %v5945_v16 }
 0x502   :  { %5143 = vmatprep.subr.bf16.mxu1 %v5945_v16 }
 0x503   :  { %v5118_v56 = vpop.f32.mrf.mxu0 }
 0x505   :  { %v721_v57 = vpop.f32.mrf.mxu0 }
 0x506   :  { %v779_v58 = vmul.f32 0.25, %v721_v57 }
 0x507   :  { %v5129_v60 = vpop.f32.mrf.mxu0 }
 0x508   :  { %5134 = vmatmul.mubr.msk.bf16.vlgmr.msra.gmra.mxu1 %vm389_vm2, %v729_v59  ;;  %v781_v62 = vadd.f32 %v6184_v6, %v779_v58 }
 0x509   :  { %v724_v63 = vpop.f32.mrf.mxu0  ;;  %5145 = vmatprep.mubr.msk.bf16.mxu1 %vm5946_vm1, %v5945_v16 }
 0x50a   :  { %v783_v0 = vsel %vm498_vm4, %v781_v62, -inf }
 0x50b   :  { %784 = vmax.xlane.f32.xlu0 %v783_v0  ;;  %v5130_v1 = vpop.f32.mrf.mxu0 }
 0x594   :  { %v785_v2 = vpop.xlane.xlu0 %784 }
 0x595   :  { %v789_v4 = vsub.f32 %v781_v62, %v785_v2 }
 0x597   :  { %v791_v5 = vmul.f32 1.442695, %v789_v4 }
 0x599   :  { %5438 = vpow2.f32 %v791_v5 }
 0x5a6   :  { %v5439_v7 = vpop.eup %5438 }
 0x5a7   :  { %v795_v8 = vsel %vm498_vm4, %v5439_v7, 0.0 }
 0x5a8   :  { %796 = vadd.xlane.f32.xlu0 %v795_v8 }
 0x5c0   :  { %v660_v9 = vpop.f32.mrf.mxu1 }
 0x5c1   :  { %v673_v50 = vadd.f32 %v4765_v49, %v660_v9 }
 0x5c2   :  { %v5123_v10 = vpop.f32.mrf.mxu1 }
 0x5c3   :  { %v5364_v10 = vld [vmem:[%s6029_s12 + $0x8] sm:$0xff]  }
 0x5c4   :  { %v663_v11 = vpop.f32.mrf.mxu1 }
 0x5c5   :  { %v674_v54 = vadd.f32 %v4765_v49, %v663_v11 }
 0x5c6   :  { %v5124_v13 = vpop.f32.mrf.mxu1 }
 0x5c8   :  { %v773_v14 = vpop.f32.mrf.mxu1 }
 0x5c9   :  { %v780_v15 = vmul.f32 0.25, %v773_v14 }
 0x5ca   :  { %v5135_v17 = vpop.f32.mrf.mxu1 }
 0x5cb   :  { %v782_v18 = vadd.f32 %v6188_v12, %v780_v15 }
 0x5cc   :  { %v776_v19 = vpop.f32.mrf.mxu1 }
 0x5cd   :  { %v786_v20 = vsel %vm498_vm4, %v782_v18, -inf }
 0x5ce   :  { %787 = vmax.xlane.f32.xlu1 %v786_v20  ;;  %v5136_v21 = vpop.f32.mrf.mxu1 }
 0x5cf   :  { %v4772_v21 = vld [vmem:[%s6019_s30] ss:$0 sm:$0xff] }
 0x5df   :  { %857 = vrot.lane.b32.xlu1 %v6174_v3, %s5947_s0 }
 0x631   :  { %v797_v29 = vpop.xlane.xlu0 %796 }
 0x657   :  { %v788_v22 = vpop.xlane.xlu1 %787 }
 0x658   :  { %v790_v23 = vsub.f32 %v782_v18, %v788_v22 }
 0x65a   :  { %v793_v24 = vmul.f32 1.442695, %v790_v23 }
 0x65b   :  { %v858_v25 = vpop.permute.xlu1 %857 }
 0x65c   :  { %5440 = vpow2.f32 %v793_v24  ;;  %v863_v26 = vsel %vm526_vm3, %v858_v25, 0  ;;  %v4773_v25 = vld [vmem:[%s7041_s5] ss:$0 sm:$0xff] }
 0x65d   :  { %5144 = vmatpush3.bf16.msra.mxu1 %v863_v26  ;;  %5442 = vrcp.f32 %v797_v29 }
 0x65e   :  { %5155 = vmatprep.subr.bf16.mxu1 %v5945_v16 }
 0x669   :  { %v5441_v27 = vpop.eup %5440 }
 0x66a   :  { %v798_v28 = vsel %vm498_vm4, %v5441_v27, 0.0  ;;  %v5443_v3 = vpop.eup %5442 }
 0x66b   :  { %799 = vadd.xlane.f32.xlu0 %v798_v28  ;;  %v803_v31 = vmul.f32 %v5443_v3, %v5439_v7  ;;  %v5366_v3 = vld [vmem:[%s7042_s9 + $0x18] sm:$0xff]  }
 0x66d   :  { %v805_v36 = vpack.c.bf16 %v803_v31, %v803_v31  ;;  %v5368_v31 = vld [vmem:[%s7042_s9 + $0x8] sm:$0xff]  }
 0x681   :  { %808 = vrot.lane.b32.xlu0 %v6166_v61, %s5947_s0 }
 0x6f4   :  { %v800_v30 = vpop.xlane.xlu0 %799 }
 0x6f5   :  { %5444 = vrcp.f32 %v800_v30  ;;  %v5367_v30 = vld [vmem:[%s7042_s9 + $0x10] sm:$0xff]  }
 0x6f8   :  { %v809_v32 = vpop.permute.xlu0 %808 }
 0x6f9   :  { %v814_v35 = vsel %vm526_vm3, %v809_v32, 0  ;;  %v5369_v32 = vld [vmem:[%s7042_s9] sm:$0xff]  }
 0x6fa   :  { %5138 = vmatpush3.bf16.msra.mxu0 %v814_v35  ;;  %v4774_v35 = vld [vmem:[%s7043_s13] ss:$0 sm:$0xff] }
 0x6fb   :  { %5149 = vmatprep.subr.bf16.mxu0 %v5945_v16 }
 0x6fd   :  { %5140 = vmatmul.mubr.msk.bf16.vlgmr.msra.gmra.mxu0 %vm498_vm4, %v805_v36 }
 0x6fe   :  { %5151 = vmatprep.mubr.msk.bf16.mxu0 %vm5946_vm1, %v5945_v16  ;;  %5150 = vmatpush3.bf16.msra.mxu0 %v5363_v39 }
 0x6ff   :  { %5163 = vmatprep.subr.bf16.mxu0 %v5945_v16 }
 0x702   :  { %v5445_v61 = vpop.eup %5444 }
 0x703   :  { %v804_v37 = vmul.f32 %v5445_v61, %v5441_v27 }
 0x705   :  { %v806_v38 = vpack.c.bf16 %v804_v37, %v804_v37 }
 0x707   :  { %5146 = vmatmul.mubr.msk.bf16.vlgmr.msra.gmra.mxu1 %vm498_vm4, %v806_v38 }
 0x708   :  { %5159 = vmatprep.mubr.msk.bf16.mxu1 %vm5946_vm1, %v5945_v16  ;;  %5156 = vmatpush3.bf16.msra.mxu1 %v5364_v10 }
 0x709   :  { %5157 = vmatprep.subr.bf16.mxu1 %v5945_v16 }
 0x7bd   :  { %v850_v40 = vpop.f32.mrf.mxu0 }
 0x7bf   :  { %v5141_v41 = vpop.f32.mrf.mxu0 }
 0x7c1   :  { %v853_v42 = vpop.f32.mrf.mxu0 }
 0x7c3   :  { %v5142_v43 = vpop.f32.mrf.mxu0 }
 0x7c7   :  { %v899_v44 = vpop.f32.mrf.mxu1 }
 0x7c8   :  { %v905_v45 = vpack.c.bf16 %v899_v44, %v850_v40 }
 0x7c9   :  { %v5147_v46 = vpop.f32.mrf.mxu1 }
 0x7ca   :  { %5152 = vmatmul.mubr.msk.bf16.vlgmr.msra.gmra.mxu0 %vm389_vm2, %v905_v45 }
 0x7cb   :  { %v902_v47 = vpop.f32.mrf.mxu1  ;;  %5171 = vmatprep.mubr.msk.bf16.mxu0 %vm5946_vm1, %v5945_v16  ;;  %5164 = vmatpush3.bf16.msra.mxu0 %v5366_v3 }
 0x7cc   :  { %5165 = vmatprep.subr.bf16.mxu0 %v5945_v16 }
 0x7cd   :  { %v5148_v48 = vpop.f32.mrf.mxu1 }
 0x7cf   :  { %5166 = vmatpush3.bf16.msra.mxu0 %v5367_v30 }
 0x7d0   :  { %5167 = vmatprep.subr.bf16.mxu0 %v5945_v16 }
 0x7d3   :  { %5168 = vmatpush3.bf16.msra.mxu0 %v5368_v31  ;;  %v4784_v31 = vld [vmem:[%s7045_s22] ss:$0 sm:$0xff] }
 0x7d4   :  { %5169 = vmatprep.subr.bf16.mxu0 %v5945_v16 }
 0x7d7   :  { %5170 = vmatpush3.bf16.msra.mxu0 %v5369_v32 }
 0x7d8   :  { %5191 = vmatprep.subr.bf16.mxu0 %v5945_v16 }
 0x88a   :  { %v949_v51 = vpop.f32.mrf.mxu0 }
 0x88b   :  { %v956_v52 = vadd.f32 %v949_v51, %v673_v50 }
 0x88c   :  { %v5153_v53 = vpop.f32.mrf.mxu0 }
 0x88d   :  { %v958_v55 = vadd.f32 %v956_v52, %v6138_v33 }
 0x88e   :  { %v952_v56 = vpop.f32.mrf.mxu0 }
 0x88f   :  { %v957_v57 = vadd.f32 %v952_v56, %v674_v54  ;;  %v962_v58 = vsel %vm136_vm0, %v958_v55, 0.0 }
 0x890   :  { %963 = vadd.xlane.f32.xlu1 %v962_v58  ;;  %v5154_v59 = vpop.f32.mrf.mxu0 }
 0x891   :  { %v959_v60 = vadd.f32 %v957_v57, %v6140_v34  ;;  %v5365_v34 = vld [vmem:[%s6029_s12] sm:$0xff]  }
 0x892   :  { %5158 = vmatpush3.bf16.msra.mxu1 %v5365_v34 }
 0x893   :  { %v965_v62 = vsel %vm136_vm0, %v959_v60, 0.0  ;;  %5175 = vmatprep.subr.bf16.mxu1 %v5945_v16 }
 0x894   :  { %966 = vadd.xlane.f32.xlu0 %v965_v62 }
 0x919   :  { %v964_v63 = vpop.xlane.xlu1 %963 }
 0x91a   :  { %v968_v0 = vmul.f32 0.03125, %v964_v63 }
 0x91c   :  { %v970_v1 = vsub.f32 %v958_v55, %v968_v0 }
 0x91d   :  { %v967_v2 = vpop.xlane.xlu0 %966 }
 0x91e   :  { %v969_v4 = vmul.f32 0.03125, %v967_v2  ;;  %v972_v5 = vmul.f32 %v970_v1, %v970_v1 }
 0x920   :  { %v971_v33 = vsub.f32 %v959_v60, %v969_v4  ;;  %v974_v7 = vsel %vm136_vm0, %v972_v5, 0.0  ;;  %v4778_v60 = vld [vmem:[%s7044_s17] ss:$0 sm:$0xff] }
 0x921   :  { %975 = vadd.xlane.f32.xlu0 %v974_v7 }
 0x922   :  { %v973_v8 = vmul.f32 %v971_v33, %v971_v33 }
 0x924   :  { %v977_v9 = vsel %vm136_vm0, %v973_v8, 0.0 }
 0x925   :  { %978 = vadd.xlane.f32.xlu1 %v977_v9 }
 0x9aa   :  { %v976_v11 = vpop.xlane.xlu0 %975 }
 0x9ab   :  { %v980_v13 = vmul.f32 0.03125, %v976_v11 }
 0x9ad   :  { %v982_v14 = vadd.f32 1e-05, %v980_v13 }
 0x9ae   :  { %v979_v15 = vpop.xlane.xlu1 %978 }
 0x9af   :  { %5446 = vrsqrt.f32 %v982_v14  ;;  %v981_v17 = vmul.f32 0.03125, %v979_v15 }
 0x9b1   :  { %v983_v18 = vadd.f32 1e-05, %v981_v17 }
 0x9b3   :  { %5448 = vrsqrt.f32 %v983_v18 }
 0x9bc   :  { %v5447_v19 = vpop.eup %5446 }
 0x9bd   :  { %v986_v20 = vmul.f32 %v5447_v19, %v970_v1 }
 0x9bf   :  { %v994_v24 = vmul.f32 %v4772_v21, %v986_v20  ;;  %v5370_v20 = vld [vmem:[%s5979_s21 + $0x18] sm:$0xff]  }
 0x9c0   :  { %v5449_v22 = vpop.eup %5448 }
 0x9c1   :  { %v987_v23 = vmul.f32 %v5449_v22, %v971_v33  ;;  %v1002_v27 = vadd.f32 %v4773_v25, %v994_v24  ;;  %v5372_v22 = vld [vmem:[%s5979_s21 + $0x10] sm:$0xff]   ;;  %s7047_s21 = sld [smem:[#allocation12_spill]] }
 0x9c3   :  { %v995_v26 = vmul.f32 %v4772_v21, %v987_v23  ;;  %v5371_v21 = vld [vmem:[%s5999_s8 + $0x18] sm:$0xff]   ;;  %v5373_v23 = vld [vmem:[%s5999_s8 + $0x10] sm:$0xff]   ;;  %s7051_s8 = sld [smem:[#allocation16_spill]] }
 0x9c5   :  { %v1003_v28 = vadd.f32 %v4773_v25, %v995_v26 }
 0x9c7   :  { %v1004_v29 = vpack.c.bf16 %v1003_v28, %v1002_v27 }
 0x9c9   :  { %5160 = vmatmul.mubr.msk.bf16.vlgmr.msra.gmra.mxu1 %vm136_vm0, %v1004_v29 }
 0x9ca   :  { %5179 = vmatprep.mubr.msk.bf16.mxu1 %vm5946_vm1, %v5945_v16  ;;  %5176 = vmatpush3.bf16.msra.mxu1 %v5370_v20 }
 0x9cb   :  { %5177 = vmatprep.subr.bf16.mxu1 %v5945_v16 }
 0x9ce   :  { %5178 = vmatpush3.bf16.msra.mxu1 %v5372_v22 }
 0x9cf   :  { %5183 = vmatprep.subr.bf16.mxu1 %v5945_v16 }
 0xa89   :  { %v1065_v36 = vpop.f32.mrf.mxu1 }
 0xa8a   :  { %v1066_v61 = vadd.f32 %v4774_v35, %v1065_v36 }
 0xa8b   :  { %v5161_v37 = vpop.f32.mrf.mxu1 }
 0xa8c   :  { %v1074_v38 = vmul.f32 0.044715, %v1066_v61  ;;  %v1072_v54 = vmul.f32 0.5, %v1066_v61 }
 0xa8d   :  { %v1068_v39 = vpop.f32.mrf.mxu1 }
 0xa8e   :  { %v1076_v40 = vmul.f32 %v1074_v38, %v1066_v61  ;;  %v1069_v41 = vadd.f32 %v4774_v35, %v1068_v39 }
 0xa8f   :  { %v5162_v42 = vpop.f32.mrf.mxu1 }
 0xa90   :  { %v1078_v43 = vmul.f32 %v1076_v40, %v1066_v61  ;;  %v1075_v44 = vmul.f32 0.044715, %v1069_v41  ;;  %v1073_v55 = vmul.f32 0.5, %v1069_v41  ;;  %v5374_v40 = vld [vmem:[%s5989_s29 + $0x18] sm:$0xff]   ;;  %v5375_v42 = vld [vmem:[%s5989_s29 + $0x10] sm:$0xff]   ;;  %s7049_s29 = sld [smem:[#allocation11_spill]] }
 0xa92   :  { %v1080_v45 = vadd.f32 %v1078_v43, %v1066_v61  ;;  %v1077_v46 = vmul.f32 %v1075_v44, %v1069_v41  ;;  %v4785_v61 = vld [vmem:[%s7046_s23] ss:$0 sm:$0xff] }
 0xa94   :  { %v1082_v47 = vmul.f32 0.7978846, %v1080_v45  ;;  %v1079_v48 = vmul.f32 %v1077_v46, %v1069_v41 }
 0xa96   :  { %5450 = vtanh.f32 %v1082_v47  ;;  %v1081_v49 = vadd.f32 %v1079_v48, %v1069_v41 }
 0xa98   :  { %v1083_v50 = vmul.f32 0.7978846, %v1081_v49 }
 0xa9a   :  { %5452 = vtanh.f32 %v1083_v50 }
 0xaa3   :  { %v5451_v51 = vpop.eup %5450 }
 0xaa4   :  { %v1086_v52 = vadd.f32 1.0, %v5451_v51  ;;  %v4800_v51 = vld [vmem:[%s5994_s3 + $0x1] ss:$0 sm:$0xff]  ;;  %s7050_s3 = sld [smem:[#allocation13_spill]] }
 0xaa6   :  { %v1088_v57 = vmul.f32 %v1086_v52, %v1072_v54  ;;  %v4809_v54 = vld [vmem:[%s6004_s14 + $0x1] ss:$0 sm:$0xff]  ;;  %s5949_s14 = smov 64  }
 0xaa7   :  { %v5453_v53 = vpop.eup %5452 }
 0xaa8   :  { %v1087_v56 = vadd.f32 1.0, %v5453_v53 }
 0xaaa   :  { %v1089_v58 = vmul.f32 %v1087_v56, %v1073_v55 }
 0xaac   :  { %v1090_v59 = vpack.c.bf16 %v1089_v58, %v1088_v57  ;;  %v4791_v57 = vld [vmem:[%s5984_s25 + $0x1] ss:$0 sm:$0xff]  ;;  %s7048_s25 = sld [smem:[#allocation15_spill]] }
 0xaae   :  { %5172 = vmatmul.mubr.msk.bf16.vlgmr.msra.gmra.mxu0 %vm1130_vm5, %v1090_v59 }
 0xaaf   :  { %5195 = vmatprep.mubr.msk.bf16.mxu0 %vm5946_vm1, %v5945_v16  ;;  %5192 = vmatpush3.bf16.msra.mxu0 %v5371_v21 }
 0xab0   :  { %5193 = vmatprep.subr.bf16.mxu0 %v5945_v16 }
 0xab3   :  { %5194 = vmatpush3.bf16.msra.mxu0 %v5373_v23 }
 0xab4   :  { %5205 = vmatprep.subr.bf16.mxu0 %v5945_v16 }
 0xb6e   :  { %v1168_v62 = vpop.f32.mrf.mxu0 }
 0xb6f   :  { %v1169_v63 = vadd.f32 %v4778_v60, %v1168_v62 }
 0xb70   :  { %v5173_v0 = vpop.f32.mrf.mxu0 }
 0xb71   :  { %v1175_v1 = vadd.f32 %v1169_v63, %v1002_v27 }
 0xb72   :  { %v1171_v2 = vpop.f32.mrf.mxu0 }
 0xb73   :  { %v1172_v4 = vadd.f32 %v4778_v60, %v1171_v2  ;;  %v1179_v5 = vsel %vm136_vm0, %v1175_v1, 0.0 }
 0xb74   :  { %1180 = vadd.xlane.f32.xlu0 %v1179_v5  ;;  %v5174_v33 = vpop.f32.mrf.mxu0 }
 0xb75   :  { %v1176_v7 = vadd.f32 %v1172_v4, %v1003_v28 }
 0xb77   :  { %v1182_v8 = vsel %vm136_vm0, %v1176_v7, 0.0 }
 0xb78   :  { %1183 = vadd.xlane.f32.xlu1 %v1182_v8 }
 0xbfd   :  { %v1181_v9 = vpop.xlane.xlu0 %1180 }
 0xbfe   :  { %v1185_v10 = vmul.f32 0.03125, %v1181_v9 }
 0xc00   :  { %v1187_v34 = vsub.f32 %v1175_v1, %v1185_v10 }
 0xc01   :  { %v1184_v11 = vpop.xlane.xlu1 %1183 }
 0xc02   :  { %v1186_v13 = vmul.f32 0.03125, %v1184_v11  ;;  %v1189_v14 = vmul.f32 %v1187_v34, %v1187_v34 }
 0xc04   :  { %v1188_v15 = vsub.f32 %v1176_v7, %v1186_v13  ;;  %v1191_v17 = vsel %vm136_vm0, %v1189_v14, 0.0 }
 0xc05   :  { %1192 = vadd.xlane.f32.xlu0 %v1191_v17 }
 0xc06   :  { %v1190_v18 = vmul.f32 %v1188_v15, %v1188_v15 }
 0xc08   :  { %v1194_v19 = vsel %vm136_vm0, %v1190_v18, 0.0 }
 0xc09   :  { %1195 = vadd.xlane.f32.xlu1 %v1194_v19 }
 0xc8e   :  { %v1193_v24 = vpop.xlane.xlu0 %1192 }
 0xc8f   :  { %v1197_v25 = vmul.f32 0.03125, %v1193_v24 }
 0xc91   :  { %v1199_v26 = vadd.f32 1e-05, %v1197_v25 }
 0xc92   :  { %v1196_v27 = vpop.xlane.xlu1 %1195 }
 0xc93   :  { %5454 = vrsqrt.f32 %v1199_v26  ;;  %v1198_v28 = vmul.f32 0.03125, %v1196_v27 }
 0xc95   :  { %v1200_v29 = vadd.f32 1e-05, %v1198_v28 }
 0xc97   :  { %5456 = vrsqrt.f32 %v1200_v29 }
 0xca0   :  { %v5455_v3 = vpop.eup %5454 }
 0xca1   :  { %v1203_v30 = vmul.f32 %v5455_v3, %v1187_v34 }
 0xca3   :  { %v1211_v36 = vmul.f32 %v4784_v31, %v1203_v30 }
 0xca4   :  { %v5457_v32 = vpop.eup %5456 }
 0xca5   :  { %v1204_v35 = vmul.f32 %v5457_v32, %v1188_v15  ;;  %v6289_v38 = vadd.f32 %v4785_v61, %v1211_v36 }
 0xca7   :  { %v1212_v37 = vmul.f32 %v4784_v31, %v1204_v35 }
 0xca9   :  { %v6291_v39 = vadd.f32 %v4785_v61, %v1212_v37 }
 0xcab   :  { %v1221_v41 = vpack.c.bf16 %v6291_v39, %v6289_v38 }
 0xcad   :  { %5180 = vmatmul.mubr.msk.bf16.vlgmr.msra.gmra.mxu1 %vm136_vm0, %v1221_v41  ;;  %5196 = vmatmul.mubr.msk.bf16.vlgmr.msra.gmra.mxu0 %vm136_vm0, %v1221_v41 }
 0xcae   :  { %5184 = vmatpush3.bf16.msra.mxu1 %v5374_v40  ;;  %5187 = vmatprep.mubr.msk.bf16.mxu1 %vm5946_vm1, %v5945_v16 }
 0xcaf   :  { %5185 = vmatprep.subr.bf16.mxu1 %v5945_v16  ;;  %5207 = vmatprep.mubr.msk.bf16.mxu0 %vm5946_vm1, %v5945_v16 }
 0xcb2   :  { %5186 = vmatpush3.bf16.msra.mxu1 %v5375_v42 }
 0xcb3   :  { %5199 = vmatprep.subr.bf16.mxu1 %v5945_v16 }
 0xcb5   :  { %5188 = vmatmul.mubr.msk.bf16.vlgmr.msra.gmra.mxu1 %vm136_vm0, %v1221_v41 }
 0xcb6   :  { %5201 = vmatprep.mubr.msk.bf16.mxu1 %vm5946_vm1, %v5945_v16 }
 0xd6d   :  { %v1284_v43 = vpop.f32.mrf.mxu1  ;;  %v1416_v44 = vpop.f32.mrf.mxu0 }
 0xd6e   :  { %v1417_v59 = vadd.f32 %v4809_v54, %v1416_v44  ;;  %v1285_v0 = vadd.f32 %v4791_v57, %v1284_v43 }
 0xd6f   :  { %v5181_v45 = vpop.f32.mrf.mxu1  ;;  %v5197_v46 = vpop.f32.mrf.mxu0 }
 0xd70   :  { %v6313_v2 = vpack.c.bf16 %v1417_v59, %v1417_v59  ;;  %v1430_v33 = vpack.c.bf16 %v1285_v0, %v1285_v0 }
 0xd71   :  { %v1287_v47 = vpop.f32.mrf.mxu1  ;;  %v1419_v48 = vpop.f32.mrf.mxu0 }
 0xd72   :  { %v1420_v4 = vadd.f32 %v4809_v54, %v1419_v48  ;;  %v1288_v7 = vadd.f32 %v4791_v57, %v1287_v47  ;;  %v1560_v8 = vsel %vm526_vm3, %v6313_v2, 0 }
 0xd73   :  { %v5182_v49 = vpop.f32.mrf.mxu1  ;;  %v5198_v50 = vpop.f32.mrf.mxu0 }
 0xd74   :  { %v6319_v9 = vpack.c.bf16 %v1420_v4, %v1420_v4  ;;  %v1431_v10 = vpack.c.bf16 %v1288_v7, %v1288_v7 }
 0xd75   :  { %v1350_v52 = vpop.f32.mrf.mxu1 }
 0xd76   :  { %v1351_v53 = vadd.f32 %v4800_v51, %v1350_v52  ;;  %v1606_v34 = vsel %vm526_vm3, %v6319_v9, 0 }
 0xd77   :  { %v5189_v55 = vpop.f32.mrf.mxu1 }
 0xd78   :  { %v1432_v56 = vpack.c.bf16 %v1351_v53, %v1351_v53 }
 0xd79   :  { %v1353_v58 = vpop.f32.mrf.mxu1 }
 0xd7a   :  { %v1440_v60 = vsel %vm389_vm2, %v1432_v56, 0  ;;  %v1354_v62 = vadd.f32 %v4800_v51, %v1353_v58  ;;  %v5376_v51 = vld [vmem:[%s6009_s19 + $0x10] sm:$0xff]  }
 0xd7b   :  { %v5190_v63 = vpop.f32.mrf.mxu1  ;;  %5200 = vmatpush3.bf16.xpose.msra.mxu1 %v1440_v60 }
 0xd7c   :  { %v1433_v1 = vpack.c.bf16 %v1354_v62, %v1354_v62  ;;  %5211 = vmatprep.subr.bf16.mxu1 %v5945_v16 }
 0xd7e   :  { %v1486_v5 = vsel %vm389_vm2, %v1433_v1, 0 }
 0xd7f   :  { %5206 = vmatpush3.bf16.xpose.msra.mxu0 %v1486_v5 }
 0xd80   :  { %5217 = vmatprep.subr.bf16.mxu0 %v5945_v16 }
 0xd82   :  { %5202 = vmatmul.mubr.msk.bf16.vlgmr.msra.gmra.mxu1 %vm389_vm2, %v1430_v33 }
 0xd83   :  { %5212 = vmatpush3.bf16.msra.mxu1 %v1560_v8  ;;  %5213 = vmatprep.mubr.msk.bf16.mxu1 %vm5946_vm1, %v5945_v16 }
 0xd84   :  { %5223 = vmatprep.subr.bf16.mxu1 %v5945_v16 }
 0xd86   :  { %5208 = vmatmul.mubr.msk.bf16.vlgmr.msra.gmra.mxu0 %vm389_vm2, %v1431_v10 }
 0xd87   :  { %5218 = vmatpush3.bf16.msra.mxu0 %v1606_v34  ;;  %5219 = vmatprep.mubr.msk.bf16.mxu0 %vm5946_vm1, %v5945_v16 }
 0xd88   :  { %5229 = vmatprep.subr.bf16.mxu0 %v5945_v16 }
 0xe42   :  { %v1476_v11 = vpop.f32.mrf.mxu1 }
 0xe43   :  { %v1528_v13 = vmul.f32 0.25, %v1476_v11 }
 0xe44   :  { %v5203_v14 = vpop.f32.mrf.mxu1 }
 0xe45   :  { %v1530_v15 = vadd.f32 %v6184_v6, %v1528_v13 }
 0xe46   :  { %v1479_v17 = vpop.f32.mrf.mxu1  ;;  %v1522_v18 = vpop.f32.mrf.mxu0 }
 0xe47   :  { %v1529_v19 = vmul.f32 0.25, %v1522_v18  ;;  %v1532_v20 = vsel %vm498_vm4, %v1530_v15, -inf }
 0xe48   :  { %1533 = vmax.xlane.f32.xlu0 %v1532_v20  ;;  %v5204_v21 = vpop.f32.mrf.mxu1  ;;  %v5209_v22 = vpop.f32.mrf.mxu0 }
 0xe49   :  { %v1531_v23 = vadd.f32 %v6188_v12, %v1529_v19 }
 0xe4a   :  { %v1525_v24 = vpop.f32.mrf.mxu0 }
 0xe4b   :  { %v1535_v25 = vsel %vm498_vm4, %v1531_v23, -inf }
 0xe4c   :  { %1536 = vmax.xlane.f32.xlu1 %v1535_v25  ;;  %v5210_v26 = vpop.f32.mrf.mxu0 }
 0xed1   :  { %v1534_v27 = vpop.xlane.xlu0 %1533 }
 0xed2   :  { %v1538_v28 = vsub.f32 %v1530_v15, %v1534_v27 }
 0xed4   :  { %v1540_v29 = vmul.f32 1.442695, %v1538_v28 }
 0xed5   :  { %v1537_v3 = vpop.xlane.xlu1 %1536 }
 0xed6   :  { %5458 = vpow2.f32 %v1540_v29  ;;  %v1539_v30 = vsub.f32 %v1531_v23, %v1537_v3 }
 0xed8   :  { %v1542_v31 = vmul.f32 1.442695, %v1539_v30 }
 0xeda   :  { %5460 = vpow2.f32 %v1542_v31 }
 0xee3   :  { %v5459_v32 = vpop.eup %5458 }
 0xee4   :  { %v1544_v35 = vsel %vm498_vm4, %v5459_v32, 0.0 }
 0xee5   :  { %1545 = vadd.xlane.f32.xlu0 %v1544_v35 }
 0xee7   :  { %v5461_v36 = vpop.eup %5460 }
 0xee8   :  { %v1547_v61 = vsel %vm498_vm4, %v5461_v36, 0.0 }
 0xee9   :  { %1548 = vadd.xlane.f32.xlu1 %v1547_v61 }
 0xefa   :  { %1763 = vrot.lane.b32.xlu1 %v1433_v1, %s5947_s0 }
 0xefb   :  { %1711 = vrot.lane.b32.xlu0 %v1432_v56, %s5947_s0 }
 0xefe   :  { %1708 = vrot.lane.b32.xlu1 %v1430_v33, %s5947_s0 }
 0xf02   :  { %1760 = vrot.lane.b32.xlu1 %v1431_v10, %s5947_s0 }
 0xf6e   :  { %v1546_v37 = vpop.xlane.xlu0 %1545 }
 0xf6f   :  { %5462 = vrcp.f32 %v1546_v37 }
 0xf72   :  { %v1549_v40 = vpop.xlane.xlu1 %1548  ;;  %v1712_v46 = vpop.permute.xlu0 %1711 }
 0xf73   :  { %5464 = vrcp.f32 %v1549_v40  ;;  %v1717_v48 = vsel %vm389_vm2, %v1712_v46, 0 }
 0xf76   :  { %v1764_v49 = vpop.permute.xlu1 %1763 }
 0xf77   :  { %v1769_v59 = vsel %vm389_vm2, %v1764_v49, 0 }
 0xf7a   :  { %v1709_v50 = vpop.permute.xlu1 %1708 }
 0xf7c   :  { %v5463_v41 = vpop.eup %5462 }
 0xf7d   :  { %v1552_v42 = vmul.f32 %v5463_v41, %v5459_v32 }
 0xf7e   :  { %v1761_v1 = vpop.permute.xlu1 %1760 }
 0xf7f   :  { %v1554_v43 = vpack.c.bf16 %v1552_v42, %v1552_v42  ;;  %v5377_v42 = vld [vmem:[%s6009_s19 + $0x18] sm:$0xff]   ;;  %s7052_s19 = sld [smem:[#allocation14_spill]] }
 0xf80   :  { %v5465_v44 = vpop.eup %5464 }
 0xf81   :  { %5214 = vmatmul.mubr.msk.bf16.vlgmr.msra.gmra.mxu1 %vm498_vm4, %v1554_v43  ;;  %v1553_v45 = vmul.f32 %v5465_v44, %v5461_v36 }
 0xf82   :  { %5225 = vmatprep.mubr.msk.bf16.mxu1 %vm5946_vm1, %v5945_v16  ;;  %5224 = vmatpush3.bf16.msra.mxu1 %v5376_v51 }
 0xf83   :  { %v1555_v47 = vpack.c.bf16 %v1553_v45, %v1553_v45  ;;  %5235 = vmatprep.subr.bf16.mxu1 %v5945_v16 }
 0xf85   :  { %5220 = vmatmul.mubr.msk.bf16.vlgmr.msra.gmra.mxu0 %vm498_vm4, %v1555_v47 }
 0xf86   :  { %5230 = vmatpush3.bf16.xpose.msra.mxu0 %v1717_v48  ;;  %5231 = vmatprep.mubr.msk.bf16.mxu0 %vm5946_vm1, %v5945_v16 }
 0xf87   :  { %5241 = vmatprep.subr.bf16.mxu0 %v5945_v16 }
 0xf8d   :  { %5232 = vmatmul.mubr.msk.bf16.vlgmr.msra.gmra.mxu0 %vm389_vm2, %v1709_v50 }
 0xf8e   :  { %5243 = vmatprep.mubr.msk.bf16.mxu0 %vm5946_vm1, %v5945_v16 }
0x1041   :  { %v1596_v52 = vpop.f32.mrf.mxu1 }
0x1043   :  { %v5215_v53 = vpop.f32.mrf.mxu1 }
0x1045   :  { %v1599_v54 = vpop.f32.mrf.mxu1  ;;  %v1642_v55 = vpop.f32.mrf.mxu0 }
0x1046   :  { %v1648_v56 = vpack.c.bf16 %v1642_v55, %v1596_v52  ;;  %v4824_v52 = vld [vmem:[%s6014_s24 + $0x1] ss:$0 sm:$0xff]  ;;  %s7053_s24 = sld [smem:[#allocation18_spill]] }
0x1047   :  { %v5216_v57 = vpop.f32.mrf.mxu1  ;;  %v5221_v58 = vpop.f32.mrf.mxu0 }
0x1048   :  { %5226 = vmatmul.mubr.msk.bf16.vlgmr.msra.gmra.mxu1 %vm389_vm2, %v1648_v56 }
0x1049   :  { %5236 = vmatpush3.bf16.xpose.msra.mxu1 %v1769_v59  ;;  %v1645_v60 = vpop.f32.mrf.mxu0  ;;  %5237 = vmatprep.mubr.msk.bf16.mxu1 %vm5946_vm1, %v5945_v16 }
0x104a   :  { %5247 = vmatprep.subr.bf16.mxu1 %v5945_v16 }
0x104b   :  { %v5222_v62 = vpop.f32.mrf.mxu0 }
0x104d   :  { %v1753_v63 = vpop.f32.mrf.mxu0 }
0x104e   :  { %v1811_v0 = vmul.f32 0.25, %v1753_v63 }
0x104f   :  { %v5233_v4 = vpop.f32.mrf.mxu0 }
0x1050   :  { %5238 = vmatmul.mubr.msk.bf16.vlgmr.msra.gmra.mxu1 %vm389_vm2, %v1761_v1  ;;  %v1813_v5 = vadd.f32 %v6184_v6, %v1811_v0 }
0x1051   :  { %v1756_v33 = vpop.f32.mrf.mxu0  ;;  %5249 = vmatprep.mubr.msk.bf16.mxu1 %vm5946_vm1, %v5945_v16 }
0x1052   :  { %v1815_v7 = vsel %vm498_vm4, %v1813_v5, -inf }
0x1053   :  { %1816 = vmax.xlane.f32.xlu0 %v1815_v7  ;;  %v5234_v8 = vpop.f32.mrf.mxu0 }
0x10dc   :  { %v1817_v10 = vpop.xlane.xlu0 %1816 }
0x10dd   :  { %v1821_v34 = vsub.f32 %v1813_v5, %v1817_v10 }
0x10df   :  { %v1823_v11 = vmul.f32 1.442695, %v1821_v34 }
0x10e1   :  { %5466 = vpow2.f32 %v1823_v11 }
0x10ee   :  { %v5467_v13 = vpop.eup %5466 }
0x10ef   :  { %v1827_v14 = vsel %vm498_vm4, %v5467_v13, 0.0 }
0x10f0   :  { %1828 = vadd.xlane.f32.xlu0 %v1827_v14  ;;  %v5378_v14 = vld [vmem:[%s6029_s12 + $0x18] sm:$0xff]  }
0x1108   :  { %v1692_v15 = vpop.f32.mrf.mxu1 }
0x1109   :  { %v1705_v53 = vadd.f32 %v4824_v52, %v1692_v15 }
0x110a   :  { %v5227_v17 = vpop.f32.mrf.mxu1 }
0x110c   :  { %v1695_v18 = vpop.f32.mrf.mxu1 }
0x110d   :  { %v1706_v57 = vadd.f32 %v4824_v52, %v1695_v18 }
0x110e   :  { %v5228_v6 = vpop.f32.mrf.mxu1 }
0x1110   :  { %v1805_v19 = vpop.f32.mrf.mxu1 }
0x1111   :  { %v1812_v20 = vmul.f32 0.25, %v1805_v19 }
0x1112   :  { %v5239_v21 = vpop.f32.mrf.mxu1 }
0x1113   :  { %v1814_v22 = vadd.f32 %v6188_v12, %v1812_v20 }
0x1114   :  { %v1808_v23 = vpop.f32.mrf.mxu1 }
0x1115   :  { %v1818_v24 = vsel %vm498_vm4, %v1814_v22, -inf  ;;  %v4833_v23 = vld [vmem:[%s6019_s30 + $0x1] ss:$0 sm:$0xff]  ;;  %s7054_s30 = sld [smem:[#allocation17_spill]] }
0x1116   :  { %1819 = vmax.xlane.f32.xlu1 %v1818_v24  ;;  %v5240_v25 = vpop.f32.mrf.mxu1 }
0x1127   :  { %1889 = vrot.lane.b32.xlu1 %v6319_v9, %s5947_s0 }
0x1179   :  { %v1829_v31 = vpop.xlane.xlu0 %1828 }
0x119f   :  { %v1820_v26 = vpop.xlane.xlu1 %1819 }
0x11a0   :  { %v1822_v27 = vsub.f32 %v1814_v22, %v1820_v26 }
0x11a2   :  { %v1825_v28 = vmul.f32 1.442695, %v1822_v27  ;;  %v4834_v27 = vld [vmem:[%s7041_s5 + $0x1] ss:$0 sm:$0xff] }
0x11a3   :  { %v1890_v29 = vpop.permute.xlu1 %1889 }
0x11a4   :  { %5468 = vpow2.f32 %v1825_v28  ;;  %v1895_v3 = vsel %vm526_vm3, %v1890_v29, 0 }
0x11a5   :  { %5248 = vmatpush3.bf16.msra.mxu1 %v1895_v3  ;;  %5470 = vrcp.f32 %v1829_v31  ;;  %v5381_v31 = vld [vmem:[%s7042_s9 + $0x30] sm:$0xff]  }
0x11a6   :  { %5259 = vmatprep.subr.bf16.mxu1 %v5945_v16 }
0x11b1   :  { %v5469_v30 = vpop.eup %5468 }
0x11b2   :  { %v1830_v12 = vsel %vm498_vm4, %v5469_v30, 0.0  ;;  %v5471_v9 = vpop.eup %5470 }
0x11b3   :  { %1831 = vadd.xlane.f32.xlu0 %v1830_v12  ;;  %v1835_v35 = vmul.f32 %v5471_v9, %v5467_v13  ;;  %v5380_v12 = vld [vmem:[%s7042_s9 + $0x38] sm:$0xff]   ;;  %v5382_v9 = vld [vmem:[%s7042_s9 + $0x28] sm:$0xff]  }
0x11b5   :  { %v1837_v37 = vpack.c.bf16 %v1835_v35, %v1835_v35  ;;  %v5386_v35 = vld [vmem:[%s7047_s21 + $0xc] ss:$16 sps:$4 sm:$0xff]  }
0x11c9   :  { %1840 = vrot.lane.b32.xlu0 %v6313_v2, %s5947_s0 }
0x123c   :  { %v1832_v32 = vpop.xlane.xlu0 %1831 }
0x123d   :  { %5472 = vrcp.f32 %v1832_v32  ;;  %v5383_v32 = vld [vmem:[%s7042_s9 + $0x20] sm:$0xff]  }
0x1240   :  { %v1841_v36 = vpop.permute.xlu0 %1840 }
0x1241   :  { %v1846_v61 = vsel %vm526_vm3, %v1841_v36, 0  ;;  %v4840_v36 = vld [vmem:[%s7043_s13 + $0x1] ss:$0 sm:$0xff] }
0x1242   :  { %5242 = vmatpush3.bf16.msra.mxu0 %v1846_v61 }
0x1243   :  { %5253 = vmatprep.subr.bf16.mxu0 %v5945_v16 }
0x1245   :  { %5244 = vmatmul.mubr.msk.bf16.vlgmr.msra.gmra.mxu0 %vm498_vm4, %v1837_v37 }
0x1246   :  { %5255 = vmatprep.mubr.msk.bf16.mxu0 %vm5946_vm1, %v5945_v16  ;;  %5254 = vmatpush3.bf16.msra.mxu0 %v5377_v42 }
0x1247   :  { %5267 = vmatprep.subr.bf16.mxu0 %v5945_v16 }
0x124a   :  { %v5473_v2 = vpop.eup %5472 }
0x124b   :  { %v1836_v40 = vmul.f32 %v5473_v2, %v5469_v30 }
0x124d   :  { %v1838_v41 = vpack.c.bf16 %v1836_v40, %v1836_v40 }
0x124f   :  { %5250 = vmatmul.mubr.msk.bf16.vlgmr.msra.gmra.mxu1 %vm498_vm4, %v1838_v41 }
0x1250   :  { %5263 = vmatprep.mubr.msk.bf16.mxu1 %vm5946_vm1, %v5945_v16  ;;  %5260 = vmatpush3.bf16.msra.mxu1 %v5378_v14  ;;  %v4853_v14 = vld [vmem:[%s7044_s17 + $0x1] ss:$0 sm:$0xff] }
0x1251   :  { %5261 = vmatprep.subr.bf16.mxu1 %v5945_v16 }
0x1305   :  { %v1882_v43 = vpop.f32.mrf.mxu0 }
0x1307   :  { %v5245_v44 = vpop.f32.mrf.mxu0 }
0x1309   :  { %v1885_v45 = vpop.f32.mrf.mxu0 }
0x130b   :  { %v5246_v46 = vpop.f32.mrf.mxu0 }
0x130f   :  { %v1931_v47 = vpop.f32.mrf.mxu1 }
0x1310   :  { %v1937_v48 = vpack.c.bf16 %v1931_v47, %v1882_v43 }
0x1311   :  { %v5251_v49 = vpop.f32.mrf.mxu1 }
0x1312   :  { %5256 = vmatmul.mubr.msk.bf16.vlgmr.msra.gmra.mxu0 %vm389_vm2, %v1937_v48 }
0x1313   :  { %v1934_v50 = vpop.f32.mrf.mxu1  ;;  %5275 = vmatprep.mubr.msk.bf16.mxu0 %vm5946_vm1, %v5945_v16  ;;  %5268 = vmatpush3.bf16.msra.mxu0 %v5380_v12 }
0x1314   :  { %5269 = vmatprep.subr.bf16.mxu0 %v5945_v16 }
0x1315   :  { %v5252_v51 = vpop.f32.mrf.mxu1 }
0x1317   :  { %5270 = vmatpush3.bf16.msra.mxu0 %v5381_v31  ;;  %v2346_v31 = vlaneseq }
0x1318   :  { %5271 = vmatprep.subr.bf16.mxu0 %v5945_v16 }
0x131b   :  { %5272 = vmatpush3.bf16.msra.mxu0 %v5382_v9  ;;  %v6476_v9 = vshrl.u32 %v2346_v31, 7 }
0x131c   :  { %5273 = vmatprep.subr.bf16.mxu0 %v5945_v16 }
0x131f   :  { %5274 = vmatpush3.bf16.msra.mxu0 %v5383_v32  ;;  %v2356_v32 = vsub.s32 2, %v6476_v9 }
0x1320   :  { %2446 = vmatprep.subr.bf16.mxu0 %v5386_v35  ;;  %v6480_v35 = vld [vmem:[%s7050_s3] sm:$0xf] }
0x13d2   :  { %v1981_v54 = vpop.f32.mrf.mxu0 }
0x13d3   :  { %v1988_v55 = vadd.f32 %v1981_v54, %v1705_v53 }
0x13d4   :  { %v5257_v56 = vpop.f32.mrf.mxu0 }
0x13d5   :  { %v1990_v58 = vadd.f32 %v1988_v55, %v6289_v38 }
0x13d6   :  { %v1984_v59 = vpop.f32.mrf.mxu0 }
0x13d7   :  { %v1989_v60 = vadd.f32 %v1984_v59, %v1706_v57  ;;  %v1996_v62 = vsel %vm136_vm0, %v1990_v58, 0.0 }
0x13d8   :  { %1997 = vadd.xlane.f32.xlu1 %v1996_v62  ;;  %v5258_v63 = vpop.f32.mrf.mxu0  ;;  %v5384_v62 = vld [vmem:[%s7047_s21 + $0x8] ss:$16 sps:$4 sm:$0xff]  }
0x13d9   :  { %v1991_v0 = vadd.f32 %v1989_v60, %v6291_v39  ;;  %v5379_v39 = vld [vmem:[%s6029_s12 + $0x10] sm:$0xff]  }
0x13da   :  { %5262 = vmatpush3.bf16.msra.mxu1 %v5379_v39 }
0x13db   :  { %v1999_v1 = vsel %vm136_vm0, %v1991_v0, 0.0  ;;  %5279 = vmatprep.subr.bf16.mxu1 %v5945_v16 }
0x13dc   :  { %2000 = vadd.xlane.f32.xlu0 %v1999_v1  ;;  %v5948_v1 = vmov 0  }
0x1461   :  { %v1998_v4 = vpop.xlane.xlu1 %1997 }
0x1462   :  { %v2002_v5 = vmul.f32 0.03125, %v1998_v4  ;;  %v2337_v4 = vld [vmem:[%s7049_s29] sm:$0xff] }
0x1464   :  { %v2004_v33 = vsub.f32 %v1990_v58, %v2002_v5  ;;  %v2338_v5 = vld [vmem:[%s7049_s29 + $0x8] sm:$0xff] }
0x1465   :  { %v2001_v7 = vpop.xlane.xlu0 %2000 }
0x1466   :  { %v2003_v8 = vmul.f32 0.03125, %v2001_v7  ;;  %v2006_v10 = vmul.f32 %v2004_v33, %v2004_v33  ;;  %v6430_v7 = vld [vmem:[%s7048_s25 + $0x30] ss:$8 sps:$4 sm:$0xff]  }
0x1468   :  { %v2005_v38 = vsub.f32 %v1991_v0, %v2003_v8  ;;  %v2008_v34 = vsel %vm136_vm0, %v2006_v10, 0.0  ;;  %v6420_v0 = vld [vmem:[%s7048_s25 + $0x34] ss:$8 sps:$4 sm:$0xff]   ;;  %v6433_v8 = vld [vmem:[%s7048_s25 + $0x24] ss:$8 sps:$4 sm:$0xff]  }
0x1469   :  { %2009 = vadd.xlane.f32.xlu0 %v2008_v34  ;;  %v6439_v10 = vld [vmem:[%s7048_s25 + $0x20] ss:$8 sps:$4 sm:$0xff]   ;;  %v6448_v34 = vld [vmem:[%s7048_s25 + $0x10] ss:$8 sps:$4 sm:$0xff]  }
0x146a   :  { %v2007_v11 = vmul.f32 %v2005_v38, %v2005_v38 }
0x146c   :  { %v2011_v13 = vsel %vm136_vm0, %v2007_v11, 0.0  ;;  %v6452_v11 = vld [vmem:[%s7048_s25 + $0x4] ss:$8 sps:$4 sm:$0xff]  }
0x146d   :  { %2012 = vadd.xlane.f32.xlu1 %v2011_v13  ;;  %v6456_v13 = vld [vmem:[%s7048_s25] ss:$8 sps:$4 sm:$0xff]  }
0x14f2   :  { %v2010_v15 = vpop.xlane.xlu0 %2009 }
0x14f3   :  { %v2014_v17 = vmul.f32 0.03125, %v2010_v15 }
0x14f5   :  { %v2016_v18 = vadd.f32 1e-05, %v2014_v17 }
0x14f6   :  { %v2013_v6 = vpop.xlane.xlu1 %2012 }
0x14f7   :  { %5474 = vrsqrt.f32 %v2016_v18  ;;  %v2015_v19 = vmul.f32 0.03125, %v2013_v6 }
0x14f9   :  { %v2017_v20 = vadd.f32 1e-05, %v2015_v19 }
0x14fb   :  { %5476 = vrsqrt.f32 %v2017_v20 }
0x1504   :  { %v5475_v21 = vpop.eup %5474 }
0x1505   :  { %v2020_v22 = vmul.f32 %v5475_v21, %v2004_v33  ;;  %v6427_v33 = vpack.c.bf16 %v2338_v5, %v2337_v4 }
0x1507   :  { %v2028_v26 = vmul.f32 %v4833_v23, %v2020_v22 }
0x1508   :  { %v5477_v24 = vpop.eup %5476 }
0x1509   :  { %v2021_v25 = vmul.f32 %v5477_v24, %v2005_v38  ;;  %v6400_v29 = vadd.f32 %v4834_v27, %v2028_v26  ;;  %v6444_v38 = vld [vmem:[%s7048_s25 + $0x14] ss:$8 sps:$4 sm:$0xff]  }
0x150b   :  { %v2029_v28 = vmul.f32 %v4833_v23, %v2021_v25 }
0x150d   :  { %v6402_v3 = vadd.f32 %v4834_v27, %v2029_v28 }
0x150f   :  { %v2038_v30 = vpack.c.bf16 %v6402_v3, %v6400_v29 }
0x1511   :  { %5264 = vmatmul.mubr.msk.bf16.vlgmr.msra.gmra.mxu1 %vm136_vm0, %v2038_v30 }
0x1512   :  { %5283 = vmatprep.mubr.msk.bf16.mxu1 %vm5946_vm1, %v5945_v16 }
0x15d1   :  { %v2101_v61 = vpop.f32.mrf.mxu1 }
0x15d2   :  { %v2102_v37 = vadd.f32 %v4840_v36, %v2101_v61 }
0x15d3   :  { %v5265_v2 = vpop.f32.mrf.mxu1 }
0x15d4   :  { %v2110_v40 = vmul.f32 0.044715, %v2102_v37  ;;  %v2108_v56 = vmul.f32 0.5, %v2102_v37 }
0x15d5   :  { %v2104_v41 = vpop.f32.mrf.mxu1 }
0x15d6   :  { %v2112_v42 = vmul.f32 %v2110_v40, %v2102_v37  ;;  %v2105_v43 = vadd.f32 %v4840_v36, %v2104_v41 }
0x15d7   :  { %v5266_v44 = vpop.f32.mrf.mxu1 }
0x15d8   :  { %v2114_v45 = vmul.f32 %v2112_v42, %v2102_v37  ;;  %v2111_v46 = vmul.f32 0.044715, %v2105_v43  ;;  %v2109_v57 = vmul.f32 0.5, %v2105_v43 }
0x15da   :  { %v2116_v47 = vadd.f32 %v2114_v45, %v2102_v37  ;;  %v2113_v48 = vmul.f32 %v2111_v46, %v2105_v43 }
0x15dc   :  { %v2118_v49 = vmul.f32 0.7978846, %v2116_v47  ;;  %v2115_v50 = vmul.f32 %v2113_v48, %v2105_v43 }
0x15de   :  { %5478 = vtanh.f32 %v2118_v49  ;;  %v2117_v51 = vadd.f32 %v2115_v50, %v2105_v43  ;;  %v2360_v43 = vsub.s32 3, %v6476_v9 }
0x15e0   :  { %v2119_v52 = vmul.f32 0.7978846, %v2117_v51  ;;  %v2361_v45 = vrot.slane %v6480_v35, %v2360_v43 }
0x15e2   :  { %5480 = vtanh.f32 %v2119_v52 }
0x15eb   :  { %v5479_v53 = vpop.eup %5478 }
0x15ec   :  { %v2122_v54 = vadd.f32 1.0, %v5479_v53 }
0x15ee   :  { %v2124_v59 = vmul.f32 %v2122_v54, %v2108_v56 }
0x15ef   :  { %v5481_v55 = vpop.eup %5480 }
0x15f0   :  { %v2123_v58 = vadd.f32 1.0, %v5481_v55 }
0x15f2   :  { %v2125_v60 = vmul.f32 %v2123_v58, %v2109_v57 }
0x15f4   :  { %v2126_v63 = vpack.c.bf16 %v2125_v60, %v2124_v59 }
0x15f6   :  { %5276 = vmatmul.mubr.msk.bf16.vlgmr.msra.gmra.mxu0 %vm1130_vm5, %v2126_v63 }
0x15f7   :  { %2447 = vmatpush1.bf16.msra.mxu0 %v5384_v62  ;;  %2464 = vmatprep.mubr.bf16.mxu0 %v5948_v1 }
0x15f8   :  { %2679 = vmatprep.subr.bf16.mxu0 %v6420_v0 }
0x15fe   :  { %4872 = vmatmul.mubr.msk.bf16.vlgmr.msra.gmra.mxu0 %vm389_vm2, %v6427_v33 }
0x15ff   :  { %2680 = vmatpush1.bf16.msra.mxu0 %v6430_v7  ;;  %2703 = vmatprep.mubr.bf16.mxu0 %v5948_v1 }
0x1600   :  { %2681 = vmatprep.subr.bf16.mxu0 %v6433_v8 }
0x1603   :  { %2682 = vmatpush1.bf16.msra.mxu0 %v6439_v10 }
0x1604   :  { %2683 = vmatprep.subr.bf16.mxu0 %v6444_v38 }
0x1607   :  { %2684 = vmatpush1.bf16.msra.mxu0 %v6448_v34 }
0x1608   :  { %2685 = vmatprep.subr.bf16.mxu0 %v6452_v11 }
0x160b   :  { %2686 = vmatpush1.bf16.msra.mxu0 %v6456_v13 }
0x160c   :  { %2910 = vmatprep.subr.bf16.mxu0 %v6420_v0 }
0x160e   :  { %2704 = vmatmul.mubr.bf16.vlgmr.msra.gmra.mxu0 %v5948_v1 }
0x160f   :  { %2911 = vmatpush1.bf16.msra.mxu0 %v6430_v7  ;;  %2934 = vmatprep.mubr.bf16.mxu0 %v5948_v1 }
0x1610   :  { %2912 = vmatprep.subr.bf16.mxu0 %v6433_v8 }
0x1613   :  { %2913 = vmatpush1.bf16.msra.mxu0 %v6439_v10 }
0x1614   :  { %2914 = vmatprep.subr.bf16.mxu0 %v6444_v38 }
0x1617   :  { %2915 = vmatpush1.bf16.msra.mxu0 %v6448_v34 }
0x1618   :  { %2916 = vmatprep.subr.bf16.mxu0 %v6452_v11 }
0x161b   :  { %2917 = vmatpush1.bf16.msra.mxu0 %v6456_v13 }
0x161c   :  { %3149 = vmatprep.subr.bf16.mxu0 %v6420_v0 }
0x16b6   :  { %v2205_v39 = vpop.f32.mrf.mxu0 }
0x16b7   :  { %v2206_v15 = vadd.f32 %v4853_v14, %v2205_v39 }
0x16b8   :  { %v5277_v17 = vpop.f32.mrf.mxu0 }
0x16b9   :  { %v2212_v18 = vadd.f32 %v2206_v15, %v6400_v29 }
0x16ba   :  { %v2208_v6 = vpop.f32.mrf.mxu0 }
0x16bb   :  { %v2209_v19 = vadd.f32 %v4853_v14, %v2208_v6  ;;  %v2218_v20 = vsel %vm136_vm0, %v2212_v18, 0.0 }
0x16bc   :  { %2219 = vadd.xlane.f32.xlu1 %v2218_v20  ;;  %v5278_v21 = vpop.f32.mrf.mxu0  ;;  %v5399_v20 = vld [vmem:[%s7051_s8 + $0x8] sm:$0xff]  }
0x16bd   :  { %v2213_v22 = vadd.f32 %v2209_v19, %v6402_v3  ;;  %v2357_v3 = vrot.slane %v6480_v35, %v2356_v32  ;;  %5280 = vmatpush3.bf16.msra.mxu1 %v5399_v20  ;;  %v5400_v21 = vld [vmem:[%s7051_s8] sm:$0xff]  }
0x16be   :  { %v2466_v24 = vpop.f32.mrf.mxu0  ;;  %5281 = vmatprep.subr.bf16.mxu1 %v5945_v16 }
0x16bf   :  { %v2221_v23 = vsel %vm136_vm0, %v2213_v22, 0.0  ;;  %v6486_v40 = vadd.f32 %v2466_v24, %v2357_v3 }
0x16c0   :  { %2222 = vadd.xlane.f32.xlu0 %v2221_v23  ;;  %v2468_v25 = vpop.f32.mrf.mxu0 }
0x16c1   :  { %v6496_v54 = vadd.f32 %v2468_v25, %v2361_v45  ;;  %5282 = vmatpush3.bf16.msra.mxu1 %v5400_v21 }
0x16c2   :  { %v2470_v26 = vpop.f32.mrf.mxu0 }
0x16c3   :  { %v6483_v36 = vadd.f32 %v2470_v26, %v2357_v3 }
0x16c4   :  { %v2472_v27 = vpop.f32.mrf.mxu0 }
0x16c5   :  { %v6491_v46 = vadd.f32 %v2472_v27, %v2361_v45 }
0x16ce   :  { %v2705_v28 = vpop.f32.mrf.mxu0 }
0x16cf   :  { %v2716_v61 = vrot.slane %v2705_v28, 2  ;;  %v2714_v41 = vrot.slane %v2705_v28, 1 }
0x16d0   :  { %v2707_v30 = vpop.f32.mrf.mxu0 }
0x16d1   :  { %v2724_v37 = vadd.f32 %v2716_v61, %v6483_v36  ;;  %v2722_v42 = vadd.f32 %v2714_v41, %v6486_v40  ;;  %v2717_v47 = vrot.slane %v2707_v30, 2  ;;  %v2715_v58 = vrot.slane %v2707_v30, 1 }
0x16d2   :  { %v2709_v12 = vpop.f32.mrf.mxu0 }
0x16d3   :  { %v4894_v2 = vmul.f32 -1.442695, %v2724_v37  ;;  %v4893_v44 = vmul.f32 -1.442695, %v2722_v42  ;;  %v2725_v50 = vadd.f32 %v2717_v47, %v6491_v46  ;;  %v2723_v4 = vadd.f32 %v2715_v58, %v6496_v54  ;;  %v4861_v47 = vld [vmem:[%s7045_s22 + $0x1] ss:$0 sm:$0xff] }
0x16d4   :  { %v2710_v29 = vpop.f32.mrf.mxu0 }
0x16d5   :  { %5482 = vpow2.f32 %v4894_v2  ;;  %v4896_v23 = vmul.f32 -1.442695, %v2725_v50  ;;  %v4895_v24 = vmul.f32 -1.442695, %v2723_v4 }
0x16d6   :  { %5484 = vpow2.f32 %v4893_v44 }
0x16d7   :  { %5486 = vtanh.f32 %v2725_v50 }
0x16e2   :  { %v5483_v48 = vpop.eup %5482 }
0x16e3   :  { %v2733_v52 = vadd.f32 1.0, %v5483_v48  ;;  %v5485_v59 = vpop.eup %5484 }
0x16e4   :  { %v2732_v5 = vadd.f32 1.0, %v5485_v59  ;;  %v5487_v39 = vpop.eup %5486 }
0x16e5   :  { %5488 = vrcp.f32 %v2733_v52 }
0x16e6   :  { %5490 = vtanh.f32 %v2723_v4 }
0x16e7   :  { %5492 = vrcp.f32 %v2732_v5 }
0x16e8   :  { %5494 = vpow2.f32 %v4896_v23 }
0x16e9   :  { %5496 = vpow2.f32 %v4895_v24  ;;  %v5401_v24 = vld [vmem:[%s7047_s21] ss:$16 sps:$4 sm:$0xff]  }
0x16f2   :  { %v5489_v15 = vpop.eup %5488 }
0x16f3   :  { %v2755_v17 = vmul.f32 %v5489_v15, %v5487_v39  ;;  %v2753_v12 = vmul.f32 0.0, %v5489_v15 }
0x1745   :  { %v2220_v49 = vpop.xlane.xlu1 %2219 }
0x1746   :  { %v2224_v51 = vmul.f32 0.03125, %v2220_v49 }
0x1748   :  { %v6494_v53 = vsub.f32 %v2212_v18, %v2224_v51  ;;  %v5491_v18 = vpop.eup %5490 }
0x1749   :  { %v2223_v55 = vpop.xlane.xlu0 %2222  ;;  %v5493_v6 = vpop.eup %5492 }
0x174a   :  { %v2225_v56 = vmul.f32 0.03125, %v2223_v55  ;;  %v2228_v57 = vmul.f32 %v6494_v53, %v6494_v53  ;;  %v2754_v19 = vmul.f32 %v5493_v6, %v5491_v18  ;;  %v5495_v25 = vpop.eup %5494  ;;  %v2752_v2 = vmul.f32 0.0, %v5493_v6 }
0x174b   :  { %v2747_v26 = vadd.f32 1.0, %v5495_v25  ;;  %v5497_v28 = vpop.eup %5496 }
0x174c   :  { %v2227_v60 = vsub.f32 %v2213_v22, %v2225_v56  ;;  %v2230_v62 = vsel %vm136_vm0, %v2228_v57, 0.0  ;;  %v5403_v22 = vld [vmem:[%s7047_s21 + $0x4] ss:$16 sps:$4 sm:$0xff]   ;;  %v2746_v31 = vadd.f32 1.0, %v5497_v28  ;;  %v4862_v56 = vld [vmem:[%s7046_s23 + $0x1] ss:$0 sm:$0xff] }
0x174d   :  { %2231 = vadd.xlane.f32.xlu1 %v2230_v62  ;;  %2403 = vmatprep.subr.bf16.mxu1 %v5403_v22  ;;  %5498 = vrcp.f32 %v2747_v26  ;;  %v6523_v26 = vld [vmem:[%s7052_s19 + $0x34] ss:$8 sps:$4 sm:$0xff]   ;;  %v6532_v28 = vld [vmem:[%s7052_s19 + $0x24] ss:$8 sps:$4 sm:$0xff]  }
0x174e   :  { %v2229_v63 = vmul.f32 %v2227_v60, %v2227_v60 }
0x1750   :  { %v2233_v14 = vsel %vm136_vm0, %v2229_v63, 0.0 }
0x1751   :  { %2234 = vadd.xlane.f32.xlu0 %v2233_v14 }
0x175a   :  { %v5499_v44 = vpop.eup %5498 }
0x175e   :  { %2760 = vrot.lane.b32.xlu1 %v2755_v17, %s5949_s14 }
0x1767   :  { %2758 = vrot.lane.b32.xlu0 %v2754_v19, %s5949_s14 }
0x17d6   :  { %v2232_v27 = vpop.xlane.xlu1 %2231 }
0x17d7   :  { %v2236_v30 = vmul.f32 0.03125, %v2232_v27  ;;  %v6529_v27 = vld [vmem:[%s7052_s19 + $0x30] ss:$8 sps:$4 sm:$0xff]  }
0x17d9   :  { %v2238_v29 = vadd.f32 1e-05, %v2236_v30  ;;  %v6538_v30 = vld [vmem:[%s7052_s19 + $0x20] ss:$8 sps:$4 sm:$0xff]  }
0x17da   :  { %v2235_v32 = vpop.xlane.xlu0 %2234  ;;  %v2761_v3 = vpop.permute.xlu1 %2760 }
0x17db   :  { %5500 = vrsqrt.f32 %v2238_v29  ;;  %v2237_v61 = vmul.f32 0.03125, %v2235_v32  ;;  %v6509_v37 = vadd.f32 %v2761_v3, %v2753_v12  ;;  %v6543_v12 = vld [vmem:[%s7052_s19 + $0x14] ss:$8 sps:$4 sm:$0xff]   ;;  %v6547_v29 = vld [vmem:[%s7052_s19 + $0x10] ss:$8 sps:$4 sm:$0xff]  }
0x17dd   :  { %v2239_v41 = vadd.f32 1e-05, %v2237_v61  ;;  %5502 = vtanh.f32 %v6509_v37 }
0x17de   :  { %5504 = vrcp.f32 %v2746_v31  ;;  %v2759_v42 = vpop.permute.xlu0 %2758  ;;  %v6551_v31 = vld [vmem:[%s7052_s19 + $0x4] ss:$8 sps:$4 sm:$0xff]  }
0x17df   :  { %5506 = vrsqrt.f32 %v2239_v41  ;;  %v6512_v43 = vadd.f32 %v2759_v42, %v2752_v2 }
0x17e1   :  { %5508 = vtanh.f32 %v6512_v43 }
0x17e8   :  { %v5501_v45 = vpop.eup %5500 }
0x17e9   :  { %v2242_v48 = vmul.f32 %v5501_v45, %v6494_v53  ;;  %v2348_v45 = vsub.s32 0, %v6476_v9 }
0x17ea   :  { %v5503_v49 = vpop.eup %5502 }
0x17eb   :  { %v5505_v50 = vpop.eup %5504  ;;  %v2250_v51 = vmul.f32 %v4861_v47, %v2242_v48  ;;  %v2769_v52 = vmul.f32 %v5503_v49, %v5499_v44  ;;  %v2349_v48 = vrot.slane %v6480_v35, %v2348_v45 }
0x17ec   :  { %v5507_v55 = vpop.eup %5506 }
0x17ed   :  { %v2243_v57 = vmul.f32 %v5507_v55, %v2227_v60  ;;  %v2888_v58 = vpack.c.bf16 %v2769_v52, %v2769_v52  ;;  %v2258_v5 = vadd.f32 %v4862_v56, %v2250_v51 }
0x17ee   :  { %v5509_v59 = vpop.eup %5508 }
0x17ef   :  { %v2251_v62 = vmul.f32 %v4861_v47, %v2243_v57  ;;  %v2768_v63 = vmul.f32 %v5509_v59, %v5505_v50  ;;  %v2892_v4 = vunpack.c.l.b16 %v2888_v58  ;;  %v2260_v53 = vpack.c.bf16 %v2258_v5, %v2258_v5 }
0x17f0   :  { %v2352_v5 = vsub.s32 1, %v6476_v9 }
0x17f1   :  { %v2887_v14 = vpack.c.bf16 %v2768_v63, %v2768_v63  ;;  %v2259_v39 = vadd.f32 %v4862_v56, %v2251_v62  ;;  %v2894_v17 = vrot.slane %v2892_v4, 6  ;;  %v2275_v20 = vunpack.c.l.b16 %v2260_v53 }
0x17f3   :  { %v2891_v15 = vunpack.c.l.b16 %v2887_v14  ;;  %v2261_v18 = vpack.c.bf16 %v2259_v39, %v2259_v39  ;;  %v2353_v14 = vrot.slane %v6480_v35, %v2352_v5 }
0x17f5   :  { %v2893_v6 = vrot.slane %v2891_v15, 7  ;;  %v2276_v19 = vunpack.c.l.b16 %v2261_v18 }
0x17f7   :  { %v2895_v60 = vsel %vm2278_vm6, %v2894_v17, %v2893_v6  ;;  %v2277_v21 = vrot.slane %v2276_v19, 7 }
0x17f8   :  { %v2896_v22 = vpack.c.b16 %v2895_v60, %v2895_v60 }
0x17f9   :  { %v2279_v23 = vsel %vm2278_vm6, %v2277_v21, %v2275_v20 }
0x17fa   :  { %2897 = vrot.lane.b32.xlu0 %v2896_v22, %s5949_s14  ;;  %v2280_v25 = vpack.c.b16 %v2279_v23, %v2279_v23 }
0x17fc   :  { %5284 = vmatmul.mubr.msk.bf16.vlgmr.msra.gmra.mxu1 %vm136_vm0, %v2280_v25 }
0x17fd   :  { %2404 = vmatpush1.bf16.msra.mxu1 %v5401_v24  ;;  %2421 = vmatprep.mubr.bf16.mxu1 %v5948_v1 }
0x17fe   :  { %2542 = vmatprep.subr.bf16.mxu1 %v6523_v26 }
0x1804   :  { %4871 = vmatmul.mubr.msk.bf16.vlgmr.msra.gmra.mxu1 %vm389_vm2, %v6427_v33  ;;  %v6555_v33 = vld [vmem:[%s7052_s19] ss:$8 sps:$4 sm:$0xff]  }
0x1805   :  { %2543 = vmatpush1.bf16.msra.mxu1 %v6529_v27  ;;  %2566 = vmatprep.mubr.bf16.mxu1 %v5948_v1 }
0x1806   :  { %2544 = vmatprep.subr.bf16.mxu1 %v6532_v28 }
0x1809   :  { %2545 = vmatpush1.bf16.msra.mxu1 %v6538_v30 }
0x180a   :  { %2546 = vmatprep.subr.bf16.mxu1 %v6543_v12 }
0x180d   :  { %2547 = vmatpush1.bf16.msra.mxu1 %v6547_v29 }
0x180e   :  { %2548 = vmatprep.subr.bf16.mxu1 %v6551_v31 }
0x1811   :  { %2549 = vmatpush1.bf16.msra.mxu1 %v6555_v33 }
0x1812   :  { %2792 = vmatprep.subr.bf16.mxu1 %v6523_v26 }
0x1814   :  { %2567 = vmatmul.mubr.bf16.vlgmr.msra.gmra.mxu1 %v5948_v1 }
0x1815   :  { %2793 = vmatpush1.bf16.msra.mxu1 %v6529_v27  ;;  %2816 = vmatprep.mubr.bf16.mxu1 %v5948_v1 }
0x1816   :  { %2794 = vmatprep.subr.bf16.mxu1 %v6532_v28 }
0x1819   :  { %2795 = vmatpush1.bf16.msra.mxu1 %v6538_v30 }
0x181a   :  { %2796 = vmatprep.subr.bf16.mxu1 %v6543_v12 }
0x181d   :  { %2797 = vmatpush1.bf16.msra.mxu1 %v6547_v29 }
0x181e   :  { %2798 = vmatprep.subr.bf16.mxu1 %v6551_v31 }
0x1821   :  { %2799 = vmatpush1.bf16.msra.mxu1 %v6555_v33 }
0x1822   :  { %3029 = vmatprep.subr.bf16.mxu1 %v6523_v26 }
0x186c   :  { %v2898_v32 = vpop.permute.xlu0 %2897 }
0x186d   :  { %4902 = vmatmul.mubr.msk.bf16.vlgmr.msra.gmra.mxu0 %vm1130_vm5, %v2898_v32 }
0x186e   :  { %3150 = vmatpush1.bf16.msra.mxu0 %v6430_v7  ;;  %3173 = vmatprep.mubr.bf16.mxu0 %v5948_v1 }
0x186f   :  { %3151 = vmatprep.subr.bf16.mxu0 %v6433_v8 }
0x1872   :  { %3152 = vmatpush1.bf16.msra.mxu0 %v6439_v10 }
0x1873   :  { %3153 = vmatprep.subr.bf16.mxu0 %v6444_v38 }
0x1876   :  { %3154 = vmatpush1.bf16.msra.mxu0 %v6448_v34 }
0x1877   :  { %3155 = vmatprep.subr.bf16.mxu0 %v6452_v11 }
0x187a   :  { %3156 = vmatpush1.bf16.msra.mxu0 %v6456_v13 }
0x187b   :  { %3389 = vmatprep.subr.bf16.mxu0 %v6420_v0 }
0x18bc   :  { %v6580_v3 = vpop.f32.mrf.mxu1 }
0x18be   :  { %v5285_v61 = vpop.f32.mrf.mxu1 }
0x18c0   :  { %v2333_v2 = vpop.f32.mrf.mxu1 }
0x18c2   :  { %v5286_v41 = vpop.f32.mrf.mxu1 }
0x18c4   :  { %v2423_v42 = vpop.f32.mrf.mxu1 }
0x18c5   :  { %v6584_v50 = vadd.f32 %v2423_v42, %v2349_v48 }
0x18c6   :  { %v2425_v44 = vpop.f32.mrf.mxu1 }
0x18c7   :  { %v6595_v6 = vadd.f32 %v2425_v44, %v2353_v14 }
0x18c8   :  { %v2427_v47 = vpop.f32.mrf.mxu1 }
0x18c9   :  { %v6586_v52 = vadd.f32 %v2427_v47, %v2349_v48 }
0x18ca   :  { %v2429_v49 = vpop.f32.mrf.mxu1 }
0x18cb   :  { %v6592_v15 = vadd.f32 %v2429_v49, %v2353_v14 }
0x18d4   :  { %v2568_v51 = vpop.f32.mrf.mxu1 }
0x18d5   :  { %v2577_v55 = vrot.slane %v2568_v51, 1  ;;  %v2583_v56 = vadd.f32 %v2568_v51, %v6584_v50 }
0x18d6   :  { %v2570_v57 = vpop.f32.mrf.mxu1 }
0x18d7   :  { %v2585_v58 = vadd.f32 %v2577_v55, %v6586_v52  ;;  %v4881_v59 = vmul.f32 -1.442695, %v2583_v56  ;;  %v2578_v39 = vrot.slane %v2570_v57, 1  ;;  %v2584_v20 = vadd.f32 %v2570_v57, %v6595_v6 }
0x18d8   :  { %v2572_v62 = vpop.f32.mrf.mxu1 }
0x18d9   :  { %5510 = vpow2.f32 %v4881_v59  ;;  %v4882_v63 = vmul.f32 -1.442695, %v2585_v58  ;;  %v2586_v53 = vadd.f32 %v2578_v39, %v6592_v15  ;;  %v2985_v62 = vrot.slane %v6512_v43, 1 }
0x18da   :  { %v2573_v4 = vpop.f32.mrf.mxu1 }
0x18db   :  { %5512 = vpow2.f32 %v4882_v63  ;;  %v2986_v4 = vrot.slane %v6509_v37, 1 }
0x18dc   :  { %5514 = vtanh.f32 %v2586_v53 }
0x18e6   :  { %v5511_v17 = vpop.eup %5510 }
0x18e7   :  { %v2593_v19 = vadd.f32 1.0, %v5511_v17 }
0x18e8   :  { %v5513_v18 = vpop.eup %5512 }
0x18e9   :  { %v2594_v60 = vadd.f32 1.0, %v5513_v18  ;;  %v5515_v9 = vpop.eup %5514  ;;  %v4884_v18 = vmul.f32 -1.442695, %v2586_v53 }
0x18eb   :  { %5516 = vrcp.f32 %v2594_v60 }
0x18ec   :  { %5518 = vrcp.f32 %v2593_v19  ;;  %v4883_v19 = vmul.f32 -1.442695, %v2584_v20 }
0x18ed   :  { %5520 = vtanh.f32 %v2584_v20 }
0x18f8   :  { %v5517_v21 = vpop.eup %5516 }
0x18f9   :  { %v2616_v35 = vmul.f32 %v5517_v21, %v5515_v9  ;;  %v5519_v22 = vpop.eup %5518 }
0x18fa   :  { %v5521_v23 = vpop.eup %5520  ;;  %v2613_v37 = vmul.f32 0.0, %v5519_v22 }
0x18fb   :  { %2621 = vrot.lane.b32.xlu1 %v2616_v35, %s5949_s14  ;;  %v2615_v24 = vmul.f32 %v5521_v23, %v5519_v22  ;;  %v2614_v23 = vmul.f32 0.0, %v5517_v21 }
0x18ff   :  { %2619 = vrot.lane.b32.xlu1 %v2615_v24, %s5949_s14 }
0x192d   :  { %v2936_v25 = vpop.f32.mrf.mxu0 }
0x192e   :  { %v2945_v32 = vrot.slane %v2936_v25, 2  ;;  %v2947_v61 = vrot.slane %v2936_v25, 3 }
0x192f   :  { %v2938_v2 = vpop.f32.mrf.mxu0 }
0x1930   :  { %v2953_v41 = vadd.f32 %v2945_v32, %v6486_v40  ;;  %v2955_v42 = vadd.f32 %v2947_v61, %v6483_v36  ;;  %v2946_v49 = vrot.slane %v2938_v2, 2  ;;  %v2948_v53 = vrot.slane %v2938_v2, 3 }
0x1931   :  { %v2940_v44 = vpop.f32.mrf.mxu0 }
0x1932   :  { %v4903_v45 = vmul.f32 -1.442695, %v2953_v41  ;;  %v4904_v47 = vmul.f32 -1.442695, %v2955_v42  ;;  %v2954_v51 = vadd.f32 %v2946_v49, %v6496_v54  ;;  %v2956_v20 = vadd.f32 %v2948_v53, %v6491_v46 }
0x1933   :  { %v2941_v48 = vpop.f32.mrf.mxu0 }
0x1934   :  { %5522 = vpow2.f32 %v4903_v45 }
0x1935   :  { %5524 = vpow2.f32 %v4904_v47 }
0x1936   :  { %5526 = vtanh.f32 %v2954_v51 }
0x1941   :  { %v5523_v55 = vpop.eup %5522 }
0x1942   :  { %v5525_v56 = vpop.eup %5524  ;;  %v2963_v57 = vadd.f32 1.0, %v5523_v55 }
0x1943   :  { %v2964_v58 = vadd.f32 1.0, %v5525_v56  ;;  %v5527_v59 = vpop.eup %5526 }
0x1944   :  { %5528 = vrcp.f32 %v2963_v57 }
0x1945   :  { %5530 = vrcp.f32 %v2964_v58 }
0x1946   :  { %5532 = vpow2.f32 %v4884_v18 }
0x1947   :  { %5534 = vpow2.f32 %v4883_v19 }
0x1951   :  { %v5529_v63 = vpop.eup %5528 }
0x1952   :  { %v5531_v5 = vpop.eup %5530  ;;  %v2991_v14 = vmul.f32 %v5529_v63, %v5527_v59  ;;  %v2989_v39 = vmul.f32 %v5529_v63, %v2985_v62  ;;  %v4905_v62 = vmul.f32 -1.442695, %v2954_v51 }
0x1953   :  { %v2990_v17 = vmul.f32 %v5531_v5, %v2986_v4  ;;  %v5533_v60 = vpop.eup %5532 }
0x1954   :  { %2995 = vrot.lane.b32.xlu0 %v2991_v14, %s5949_s14  ;;  %v2608_v9 = vadd.f32 1.0, %v5533_v60  ;;  %v5535_v35 = vpop.eup %5534 }
0x1955   :  { %v2607_v43 = vadd.f32 1.0, %v5535_v35  ;;  %v4906_v35 = vmul.f32 -1.442695, %v2956_v20 }
0x1956   :  { %5536 = vrcp.f32 %v2608_v9 }
0x1963   :  { %v5537_v41 = vpop.eup %5536 }
0x196d   :  { %v2622_v24 = vpop.permute.xlu1 %2621 }
0x196e   :  { %v6606_v25 = vadd.f32 %v2622_v24, %v2614_v23 }
0x1970   :  { %5538 = vtanh.f32 %v6606_v25 }
0x1971   :  { %v2620_v32 = vpop.permute.xlu1 %2619  ;;  %5540 = vrcp.f32 %v2607_v43 }
0x1972   :  { %v6609_v61 = vadd.f32 %v2620_v32, %v2613_v37 }
0x1974   :  { %5542 = vtanh.f32 %v6609_v61 }
0x1975   :  { %5544 = vtanh.f32 %v2956_v20 }
0x1976   :  { %5546 = vpow2.f32 %v4905_v62 }
0x197d   :  { %v5539_v42 = vpop.eup %5538 }
0x197e   :  { %v2630_v21 = vmul.f32 %v5539_v42, %v5537_v41  ;;  %v5541_v44 = vpop.eup %5540 }
0x1980   :  { %v2771_v45 = vpack.c.bf16 %v2630_v21, %v2630_v21 }
0x1981   :  { %v5543_v47 = vpop.eup %5542 }
0x1982   :  { %v2629_v48 = vmul.f32 %v5543_v47, %v5541_v44  ;;  %v2775_v49 = vunpack.c.l.b16 %v2771_v45  ;;  %v5545_v2 = vpop.eup %5544 }
0x1983   :  { %v2992_v59 = vmul.f32 %v5545_v2, %v5531_v5  ;;  %v5547_v63 = vpop.eup %5546 }
0x1984   :  { %v2770_v55 = vpack.c.bf16 %v2629_v48, %v2629_v48  ;;  %v2776_v56 = vrot.slane %v2775_v49, 7  ;;  %v2977_v4 = vadd.f32 1.0, %v5547_v63 }
0x1986   :  { %v2774_v22 = vunpack.c.l.b16 %v2770_v55  ;;  %5548 = vrcp.f32 %v2977_v4 }
0x1988   :  { %v2777_v57 = vsel %vm2278_vm6, %v2776_v56, %v2774_v22 }
0x1989   :  { %v2778_v58 = vpack.c.b16 %v2777_v57, %v2777_v57 }
0x198b   :  { %2779 = vrot.lane.b32.xlu1 %v2778_v58, %s5949_s14 }
0x198f   :  { %2997 = vrot.lane.b32.xlu1 %v2992_v59, %s5949_s14 }
0x1993   :  { %v5549_v19 = vpop.eup %5548 }
0x19c6   :  { %v2996_v14 = vpop.permute.xlu0 %2995 }
0x19c7   :  { %v6616_v18 = vadd.f32 %v2996_v14, %v2989_v39 }
0x19c9   :  { %5550 = vtanh.f32 %v6616_v18 }
0x19ca   :  { %5552 = vpow2.f32 %v4906_v35 }
0x19d6   :  { %v5551_v60 = vpop.eup %5550 }
0x19d7   :  { %v3005_v9 = vmul.f32 %v5551_v60, %v5549_v19  ;;  %v5553_v23 = vpop.eup %5552 }
0x19d8   :  { %v2978_v5 = vadd.f32 1.0, %v5553_v23 }
0x19d9   :  { %v3126_v37 = vpack.c.bf16 %v3005_v9, %v3005_v9  ;;  %v2866_v9 = vrot.slane %v6606_v25, 7 }
0x19da   :  { %5554 = vrcp.f32 %v2978_v5 }
0x19db   :  { %v3130_v20 = vunpack.c.l.b16 %v3126_v37 }
0x19dd   :  { %v3132_v42 = vrot.slane %v3130_v20, 6 }
0x19e7   :  { %v5555_v43 = vpop.eup %5554 }
0x19fd   :  { %v2780_v24 = vpop.permute.xlu1 %2779 }
0x19fe   :  { %4897 = vmatmul.mubr.msk.bf16.vlgmr.msra.gmra.mxu1 %vm1130_vm5, %v2780_v24  ;;  %v2865_v24 = vrot.slane %v6609_v61, 7 }
0x19ff   :  { %3030 = vmatpush1.bf16.msra.mxu1 %v6529_v27  ;;  %3053 = vmatprep.mubr.bf16.mxu1 %v5948_v1 }
0x1a00   :  { %3031 = vmatprep.subr.bf16.mxu1 %v6532_v28 }
0x1a01   :  { %v2998_v51 = vpop.permute.xlu1 %2997 }
0x1a02   :  { %v6623_v39 = vadd.f32 %v2998_v51, %v2990_v17 }
0x1a03   :  { %3032 = vmatpush1.bf16.msra.mxu1 %v6538_v30 }
0x1a04   :  { %5556 = vtanh.f32 %v6623_v39  ;;  %3033 = vmatprep.subr.bf16.mxu1 %v6543_v12 }
0x1a07   :  { %3034 = vmatpush1.bf16.msra.mxu1 %v6547_v29 }
0x1a08   :  { %3035 = vmatprep.subr.bf16.mxu1 %v6551_v31 }
0x1a0b   :  { %3036 = vmatpush1.bf16.msra.mxu1 %v6555_v33 }
0x1a0c   :  { %3269 = vmatprep.subr.bf16.mxu1 %v6523_v26 }
0x1a11   :  { %v5557_v32 = vpop.eup %5556 }
0x1a12   :  { %v3006_v17 = vmul.f32 %v5557_v32, %v5555_v43 }
0x1a14   :  { %v3127_v53 = vpack.c.bf16 %v3006_v17, %v3006_v17 }
0x1a16   :  { %v3131_v41 = vunpack.c.l.b16 %v3127_v53 }
0x1a18   :  { %v3133_v21 = vrot.slane %v3131_v41, 5 }
0x1a1a   :  { %v3134_v44 = vsel %vm2278_vm6, %v3133_v21, %v3132_v42 }
0x1a1b   :  { %v3135_v17 = vpack.c.b16 %v3134_v44, %v3134_v44 }
0x1abe   :  { %v2818_v45 = vpop.f32.mrf.mxu1 }
0x1abf   :  { %v2827_v47 = vrot.slane %v2818_v45, 7  ;;  %v2835_v48 = vadd.f32 %v2818_v45, %v6586_v52 }
0x1ac0   :  { %v2820_v49 = vpop.f32.mrf.mxu1 }
0x1ac1   :  { %v2833_v55 = vadd.f32 %v2827_v47, %v6584_v50  ;;  %v4899_v22 = vmul.f32 -1.442695, %v2835_v48  ;;  %v2828_v2 = vrot.slane %v2820_v49, 7  ;;  %v2836_v59 = vadd.f32 %v2820_v49, %v6592_v15 }
0x1ac2   :  { %v2822_v56 = vpop.f32.mrf.mxu1 }
0x1ac3   :  { %v4898_v57 = vmul.f32 -1.442695, %v2833_v55  ;;  %5558 = vpow2.f32 %v4899_v22  ;;  %v2834_v63 = vadd.f32 %v2828_v2, %v6595_v6  ;;  %v4901_v53 = vmul.f32 -1.442695, %v2836_v59 }
0x1ac4   :  { %v2823_v58 = vpop.f32.mrf.mxu1 }
0x1ac5   :  { %5560 = vpow2.f32 %v4898_v57  ;;  %v4900_v20 = vmul.f32 -1.442695, %v2834_v63 }
0x1ac6   :  { %5562 = vtanh.f32 %v2836_v59 }
0x1ad0   :  { %v5559_v62 = vpop.eup %5558 }
0x1ad1   :  { %v2844_v4 = vadd.f32 1.0, %v5559_v62 }
0x1ad2   :  { %v5561_v14 = vpop.eup %5560 }
0x1ad3   :  { %v2843_v19 = vadd.f32 1.0, %v5561_v14  ;;  %5564 = vrcp.f32 %v2844_v4  ;;  %v5563_v60 = vpop.eup %5562 }
0x1ad4   :  { %5566 = vtanh.f32 %v2834_v63 }
0x1ad5   :  { %5568 = vrcp.f32 %v2843_v19 }
0x1ad6   :  { %5570 = vpow2.f32 %v4901_v53 }
0x1ad7   :  { %5572 = vpow2.f32 %v4900_v20 }
0x1ae0   :  { %v5565_v35 = vpop.eup %5564 }
0x1ae1   :  { %v5567_v23 = vpop.eup %5566  ;;  %v2872_v5 = vmul.f32 %v5565_v35, %v5563_v60  ;;  %v2870_v51 = vmul.f32 %v5565_v35, %v2866_v9 }
0x1ae2   :  { %v5569_v43 = vpop.eup %5568 }
0x1ae3   :  { %2877 = vrot.lane.b32.xlu1 %v2872_v5, %s5949_s14  ;;  %v2871_v37 = vmul.f32 %v5569_v43, %v5567_v23  ;;  %v2869_v32 = vmul.f32 %v5569_v43, %v2865_v24  ;;  %v5571_v25 = vpop.eup %5570 }
0x1ae4   :  { %v5573_v41 = vpop.eup %5572  ;;  %v2858_v42 = vadd.f32 1.0, %v5571_v25  ;;  %v3224_v25 = vrot.slane %v6616_v18, 1 }
0x1ae5   :  { %2875 = vrot.lane.b32.xlu0 %v2871_v37, %s5949_s14  ;;  %v2857_v61 = vadd.f32 1.0, %v5573_v41 }
0x1ae6   :  { %5574 = vrcp.f32 %v2858_v42  ;;  %v3225_v42 = vrot.slane %v6623_v39, 1 }
0x1ae9   :  { %3136 = vrot.lane.b32.xlu0 %v3135_v17, %s5949_s14 }
0x1af3   :  { %v5575_v49 = vpop.eup %5574 }
0x1b55   :  { %v2878_v21 = vpop.permute.xlu1 %2877 }
0x1b56   :  { %v6642_v45 = vadd.f32 %v2878_v21, %v2870_v51 }
0x1b57   :  { %v2876_v47 = vpop.permute.xlu0 %2875 }
0x1b58   :  { %5576 = vtanh.f32 %v6642_v45  ;;  %v6645_v48 = vadd.f32 %v2876_v47, %v2869_v32 }
0x1b59   :  { %5578 = vrcp.f32 %v2857_v61 }
0x1b5a   :  { %5580 = vtanh.f32 %v6645_v48 }
0x1b5b   :  { %v3137_v44 = vpop.permute.xlu0 %3136 }
0x1b5c   :  { %4912 = vmatmul.mubr.msk.bf16.vlgmr.msra.gmra.mxu0 %vm1130_vm5, %v3137_v44 }
0x1b5d   :  { %3390 = vmatpush1.bf16.msra.mxu0 %v6430_v7  ;;  %3413 = vmatprep.mubr.bf16.mxu0 %v5948_v1 }
0x1b5e   :  { %3391 = vmatprep.subr.bf16.mxu0 %v6433_v8 }
0x1b61   :  { %3392 = vmatpush1.bf16.msra.mxu0 %v6439_v10 }
0x1b62   :  { %3393 = vmatprep.subr.bf16.mxu0 %v6444_v38 }
0x1b65   :  { %v5577_v55 = vpop.eup %5576  ;;  %3394 = vmatpush1.bf16.msra.mxu0 %v6448_v34 }
0x1b66   :  { %v5579_v22 = vpop.eup %5578  ;;  %v2886_v56 = vmul.f32 %v5577_v55, %v5575_v49  ;;  %3395 = vmatprep.subr.bf16.mxu0 %v6452_v11 }
0x1b67   :  { %v5581_v57 = vpop.eup %5580 }
0x1b68   :  { %v2885_v58 = vmul.f32 %v5581_v57, %v5579_v22  ;;  %v3008_v2 = vpack.c.bf16 %v2886_v56, %v2886_v56 }
0x1b69   :  { %3396 = vmatpush1.bf16.msra.mxu0 %v6456_v13 }
0x1b6a   :  { %v3007_v7 = vpack.c.bf16 %v2885_v58, %v2885_v58  ;;  %3629 = vmatprep.subr.bf16.mxu0 %v6420_v0  ;;  %v3012_v10 = vunpack.c.l.b16 %v3008_v2 }
0x1b6c   :  { %v3011_v8 = vunpack.c.l.b16 %v3007_v7 }
0x1b6e   :  { %v3013_v59 = vrot.slane %v3011_v8, 1 }
0x1b70   :  { %v3014_v38 = vsel %vm2278_vm6, %v3012_v10, %v3013_v59 }
0x1b71   :  { %v3015_v62 = vpack.c.b16 %v3014_v38, %v3014_v38 }
0x1b73   :  { %3016 = vrot.lane.b32.xlu1 %v3015_v62, %s5949_s14 }
0x1be5   :  { %v3017_v34 = vpop.permute.xlu1 %3016 }
0x1be6   :  { %4907 = vmatmul.mubr.msk.bf16.vlgmr.msra.gmra.mxu1 %vm1130_vm5, %v3017_v34 }
0x1be7   :  { %3270 = vmatpush1.bf16.msra.mxu1 %v6529_v27  ;;  %3293 = vmatprep.mubr.bf16.mxu1 %v5948_v1 }
0x1be8   :  { %3271 = vmatprep.subr.bf16.mxu1 %v6532_v28 }
0x1beb   :  { %3272 = vmatpush1.bf16.msra.mxu1 %v6538_v30 }
0x1bec   :  { %3273 = vmatprep.subr.bf16.mxu1 %v6543_v12 }
0x1bef   :  { %3274 = vmatpush1.bf16.msra.mxu1 %v6547_v29 }
0x1bf0   :  { %3275 = vmatprep.subr.bf16.mxu1 %v6551_v31 }
0x1bf3   :  { %3276 = vmatpush1.bf16.msra.mxu1 %v6555_v33 }
0x1bf4   :  { %3509 = vmatprep.subr.bf16.mxu1 %v6523_v26 }
0x1c1c   :  { %v3175_v0 = vpop.f32.mrf.mxu0 }
0x1c1d   :  { %v3184_v11 = vrot.slane %v3175_v0, 3  ;;  %v3186_v13 = vrot.slane %v3175_v0, 4 }
0x1c1e   :  { %v3177_v63 = vpop.f32.mrf.mxu0 }
0x1c1f   :  { %v3192_v4 = vadd.f32 %v3184_v11, %v6486_v40  ;;  %v3194_v14 = vadd.f32 %v3186_v13, %v6483_v36  ;;  %v3185_v23 = vrot.slane %v3177_v63, 3  ;;  %v3187_v24 = vrot.slane %v3177_v63, 4 }
0x1c20   :  { %v3179_v19 = vpop.f32.mrf.mxu0 }
0x1c21   :  { %v4913_v60 = vmul.f32 -1.442695, %v3192_v4  ;;  %v4914_v9 = vmul.f32 -1.442695, %v3194_v14  ;;  %v3193_v5 = vadd.f32 %v3185_v23, %v6496_v54  ;;  %v3195_v51 = vadd.f32 %v3187_v24, %v6491_v46 }
0x1c22   :  { %v3180_v35 = vpop.f32.mrf.mxu0 }
0x1c23   :  { %5582 = vpow2.f32 %v4913_v60  ;;  %v4915_v55 = vmul.f32 -1.442695, %v3193_v5  ;;  %v4916_v22 = vmul.f32 -1.442695, %v3195_v51 }
0x1c24   :  { %5584 = vpow2.f32 %v4914_v9 }
0x1c25   :  { %5586 = vtanh.f32 %v3193_v5 }
0x1c26   :  { %5588 = vtanh.f32 %v3195_v51 }
0x1c30   :  { %v5583_v43 = vpop.eup %5582 }
0x1c31   :  { %v5585_v37 = vpop.eup %5584  ;;  %v3202_v32 = vadd.f32 1.0, %v5583_v43 }
0x1c32   :  { %v3203_v17 = vadd.f32 1.0, %v5585_v37  ;;  %v5587_v53 = vpop.eup %5586 }
0x1c33   :  { %5590 = vrcp.f32 %v3202_v32  ;;  %v5589_v20 = vpop.eup %5588 }
0x1c34   :  { %5592 = vrcp.f32 %v3203_v17 }
0x1c35   :  { %5594 = vpow2.f32 %v4915_v55 }
0x1c36   :  { %5596 = vpow2.f32 %v4916_v22 }
0x1c40   :  { %v5591_v41 = vpop.eup %5590 }
0x1c41   :  { %v5593_v61 = vpop.eup %5592  ;;  %v3230_v21 = vmul.f32 %v5591_v41, %v5587_v53  ;;  %v3228_v47 = vmul.f32 %v5591_v41, %v3224_v25 }
0x1c42   :  { %v3231_v44 = vmul.f32 %v5593_v61, %v5589_v20  ;;  %v3229_v49 = vmul.f32 %v5593_v61, %v3225_v42  ;;  %v5595_v38 = vpop.eup %5594  ;;  %v3104_v42 = vrot.slane %v6645_v48, 7 }
0x1c43   :  { %3234 = vrot.lane.b32.xlu0 %v3230_v21, %s5949_s14  ;;  %v5597_v62 = vpop.eup %5596  ;;  %v3216_v34 = vadd.f32 1.0, %v5595_v38 }
0x1c44   :  { %3236 = vrot.lane.b32.xlu1 %v3231_v44, %s5949_s14  ;;  %v3217_v0 = vadd.f32 1.0, %v5597_v62 }
0x1ca6   :  { %v3055_v56 = vpop.f32.mrf.mxu1 }
0x1ca7   :  { %v3064_v57 = vrot.slane %v3055_v56, 6  ;;  %v3066_v58 = vrot.slane %v3055_v56, 7 }
0x1ca8   :  { %v3057_v18 = vpop.f32.mrf.mxu1 }
0x1ca9   :  { %v3072_v7 = vadd.f32 %v3064_v57, %v6584_v50  ;;  %v3074_v39 = vadd.f32 %v3066_v58, %v6586_v52  ;;  %v3065_v11 = vrot.slane %v3057_v18, 6  ;;  %v3067_v13 = vrot.slane %v3057_v18, 7 }
0x1caa   :  { %v3059_v2 = vpop.f32.mrf.mxu1 }
0x1cab   :  { %v4908_v8 = vmul.f32 -1.442695, %v3072_v7  ;;  %v4909_v10 = vmul.f32 -1.442695, %v3074_v39  ;;  %v3073_v19 = vadd.f32 %v3065_v11, %v6595_v6  ;;  %v3075_v9 = vadd.f32 %v3067_v13, %v6592_v15 }
0x1cac   :  { %v3060_v59 = vpop.f32.mrf.mxu1 }
0x1cad   :  { %5598 = vpow2.f32 %v4908_v8  ;;  %v4910_v2 = vmul.f32 -1.442695, %v3073_v19 }
0x1cae   :  { %5600 = vpow2.f32 %v4909_v10 }
0x1caf   :  { %5602 = vrcp.f32 %v3216_v34 }
0x1cb0   :  { %5604 = vrcp.f32 %v3217_v0 }
0x1cb5   :  { %v3235_v63 = vpop.permute.xlu0 %3234 }
0x1cb6   :  { %v3237_v4 = vpop.permute.xlu1 %3236  ;;  %v6680_v14 = vadd.f32 %v3235_v63, %v3228_v47  ;;  %v3105_v47 = vrot.slane %v6642_v45, 7  ;;  %v4911_v45 = vmul.f32 -1.442695, %v3075_v9  ;;  %v6702_v63 = vld [vmem:[%s7048_s25 + $0x30] ss:$8 sps:$4 sm:$0xff]  }
0x1cb7   :  { %v6683_v60 = vadd.f32 %v3237_v4, %v3229_v49  ;;  %v6707_v4 = vld [vmem:[%s7048_s25 + $0x24] ss:$8 sps:$4 sm:$0xff]  }
0x1cb8   :  { %5606 = vtanh.f32 %v6680_v14 }
0x1cb9   :  { %5608 = vtanh.f32 %v6683_v60 }
0x1cba   :  { %v5599_v35 = vpop.eup %5598  ;;  %5610 = vtanh.f32 %v3073_v19  ;;  %v6711_v19 = vld [vmem:[%s7048_s25 + $0x20] ss:$8 sps:$4 sm:$0xff]  }
0x1cbb   :  { %v5601_v23 = vpop.eup %5600  ;;  %v3082_v24 = vadd.f32 1.0, %v5599_v35  ;;  %5612 = vtanh.f32 %v3075_v9  ;;  %v6715_v9 = vld [vmem:[%s7048_s25 + $0x14] ss:$8 sps:$4 sm:$0xff]  }
0x1cbc   :  { %v3083_v5 = vadd.f32 1.0, %v5601_v23  ;;  %v5603_v51 = vpop.eup %5602 }
0x1cbd   :  { %5614 = vrcp.f32 %v3082_v24  ;;  %v5605_v43 = vpop.eup %5604  ;;  %v6719_v24 = vld [vmem:[%s7048_s25 + $0x10] ss:$8 sps:$4 sm:$0xff]  }
0x1cbe   :  { %5616 = vrcp.f32 %v3083_v5 }
0x1cbf   :  { %5618 = vpow2.f32 %v4910_v2 }
0x1cc0   :  { %5620 = vpow2.f32 %v4911_v45 }
0x1cc5   :  { %v5607_v37 = vpop.eup %5606 }
0x1cc6   :  { %v5609_v32 = vpop.eup %5608  ;;  %v3244_v17 = vmul.f32 %v5607_v37, %v5603_v51  ;;  %v6723_v51 = vld [vmem:[%s7048_s25 + $0x4] ss:$8 sps:$4 sm:$0xff]  }
0x1cc7   :  { %v3245_v53 = vmul.f32 %v5609_v32, %v5605_v43  ;;  %v5611_v20 = vpop.eup %5610 }
0x1cc8   :  { %v3366_v25 = vpack.c.bf16 %v3244_v17, %v3244_v17  ;;  %v5613_v41 = vpop.eup %5612 }
0x1cc9   :  { %v3367_v61 = vpack.c.bf16 %v3245_v53, %v3245_v53  ;;  %v6727_v53 = vld [vmem:[%s7048_s25] ss:$8 sps:$4 sm:$0xff]  }
0x1cca   :  { %v5615_v21 = vpop.eup %5614  ;;  %v3370_v44 = vunpack.c.l.b16 %v3366_v25  ;;  %v6731_v25 = vld [vmem:[%s7048_s25 + $0x34] ss:$8 sps:$4 sm:$0xff]  }
0x1ccb   :  { %v5617_v49 = vpop.eup %5616  ;;  %v3110_v55 = vmul.f32 %v5615_v21, %v5611_v20  ;;  %v3371_v22 = vunpack.c.l.b16 %v3367_v61  ;;  %v3108_v56 = vmul.f32 %v5615_v21, %v3104_v42 }
0x1ccc   :  { %v3111_v57 = vmul.f32 %v5617_v49, %v5613_v41  ;;  %v3372_v58 = vrot.slane %v3370_v44, 5  ;;  %v3109_v18 = vmul.f32 %v5617_v49, %v3105_v47  ;;  %v5619_v8 = vpop.eup %5618 }
0x1ccd   :  { %3114 = vrot.lane.b32.xlu0 %v3110_v55, %s5949_s14  ;;  %v3373_v7 = vrot.slane %v3371_v22, 4  ;;  %v5621_v10 = vpop.eup %5620  ;;  %v3096_v59 = vadd.f32 1.0, %v5619_v8 }
0x1cce   :  { %3116 = vrot.lane.b32.xlu1 %v3111_v57, %s5949_s14  ;;  %v3097_v38 = vadd.f32 1.0, %v5621_v10  ;;  %v3464_v10 = vrot.slane %v6680_v14, 1 }
0x1ccf   :  { %v3374_v39 = vsel %vm2278_vm6, %v3373_v7, %v3372_v58  ;;  %5622 = vrcp.f32 %v3096_v59 }
0x1cd0   :  { %v3375_v48 = vpack.c.b16 %v3374_v39, %v3374_v39  ;;  %5624 = vrcp.f32 %v3097_v38  ;;  %v3465_v38 = vrot.slane %v6683_v60, 1 }
0x1cd2   :  { %3376 = vrot.lane.b32.xlu0 %v3375_v48, %s5949_s14 }
0x1cdc   :  { %v5623_v35 = vpop.eup %5622 }
0x1cdd   :  { %v5625_v23 = vpop.eup %5624 }
0x1d3f   :  { %v3115_v62 = vpop.permute.xlu0 %3114 }
0x1d40   :  { %v3117_v34 = vpop.permute.xlu1 %3116  ;;  %v6694_v0 = vadd.f32 %v3115_v62, %v3108_v56 }
0x1d41   :  { %v6696_v11 = vadd.f32 %v3117_v34, %v3109_v18 }
0x1d42   :  { %5626 = vtanh.f32 %v6694_v0 }
0x1d43   :  { %5628 = vtanh.f32 %v6696_v11 }
0x1d44   :  { %v3377_v13 = vpop.permute.xlu0 %3376 }
0x1d45   :  { %4922 = vmatmul.mubr.msk.bf16.vlgmr.msra.gmra.mxu0 %vm1130_vm5, %v3377_v13 }
0x1d46   :  { %3630 = vmatpush1.bf16.msra.mxu0 %v6702_v63  ;;  %3653 = vmatprep.mubr.bf16.mxu0 %v5948_v1 }
0x1d47   :  { %3631 = vmatprep.subr.bf16.mxu0 %v6707_v4 }
0x1d4a   :  { %3632 = vmatpush1.bf16.msra.mxu0 %v6711_v19 }
0x1d4b   :  { %3633 = vmatprep.subr.bf16.mxu0 %v6715_v9 }
0x1d4e   :  { %3634 = vmatpush1.bf16.msra.mxu0 %v6719_v24 }
0x1d4f   :  { %v5627_v5 = vpop.eup %5626  ;;  %3635 = vmatprep.subr.bf16.mxu0 %v6723_v51 }
0x1d50   :  { %v5629_v43 = vpop.eup %5628  ;;  %v3124_v37 = vmul.f32 %v5627_v5, %v5623_v35 }
0x1d51   :  { %v3125_v32 = vmul.f32 %v5629_v43, %v5625_v23 }
0x1d52   :  { %v3246_v17 = vpack.c.bf16 %v3124_v37, %v3124_v37  ;;  %3636 = vmatpush1.bf16.msra.mxu0 %v6727_v53 }
0x1d53   :  { %v3247_v20 = vpack.c.bf16 %v3125_v32, %v3125_v32  ;;  %3869 = vmatprep.subr.bf16.mxu0 %v6731_v25 }
0x1d54   :  { %v3250_v41 = vunpack.c.l.b16 %v3246_v17 }
0x1d55   :  { %v3251_v42 = vunpack.c.l.b16 %v3247_v20 }
0x1d56   :  { %v3252_v61 = vrot.slane %v3250_v41, 2 }
0x1d57   :  { %v3253_v21 = vrot.slane %v3251_v42, 1 }
0x1d59   :  { %v3254_v47 = vsel %vm2278_vm6, %v3253_v21, %v3252_v61 }
0x1d5a   :  { %v3255_v44 = vpack.c.b16 %v3254_v47, %v3254_v47 }
0x1d5c   :  { %3256 = vrot.lane.b32.xlu1 %v3255_v44, %s5949_s14 }
0x1dce   :  { %v3257_v49 = vpop.permute.xlu1 %3256 }
0x1dcf   :  { %4917 = vmatmul.mubr.msk.bf16.vlgmr.msra.gmra.mxu1 %vm1130_vm5, %v3257_v49 }
0x1dd0   :  { %3510 = vmatpush1.bf16.msra.mxu1 %v6529_v27  ;;  %3533 = vmatprep.mubr.bf16.mxu1 %v5948_v1 }
0x1dd1   :  { %3511 = vmatprep.subr.bf16.mxu1 %v6532_v28 }
0x1dd4   :  { %3512 = vmatpush1.bf16.msra.mxu1 %v6538_v30 }
0x1dd5   :  { %3513 = vmatprep.subr.bf16.mxu1 %v6543_v12 }
0x1dd8   :  { %3514 = vmatpush1.bf16.msra.mxu1 %v6547_v29 }
0x1dd9   :  { %3515 = vmatprep.subr.bf16.mxu1 %v6551_v31 }
0x1ddc   :  { %3516 = vmatpush1.bf16.msra.mxu1 %v6555_v33 }
0x1ddd   :  { %3749 = vmatprep.subr.bf16.mxu1 %v6523_v26 }
0x1e05   :  { %v3415_v55 = vpop.f32.mrf.mxu0 }
0x1e06   :  { %v3424_v22 = vrot.slane %v3415_v55, 4  ;;  %v3426_v56 = vrot.slane %v3415_v55, 5 }
0x1e07   :  { %v3417_v27 = vpop.f32.mrf.mxu0 }
0x1e08   :  { %v3432_v57 = vadd.f32 %v3424_v22, %v6486_v40  ;;  %v3434_v28 = vadd.f32 %v3426_v56, %v6483_v36  ;;  %v3425_v29 = vrot.slane %v3417_v27, 4  ;;  %v3427_v31 = vrot.slane %v3417_v27, 5 }
0x1e09   :  { %v3419_v58 = vpop.f32.mrf.mxu0 }
0x1e0a   :  { %v4923_v30 = vmul.f32 -1.442695, %v3432_v57  ;;  %v4924_v18 = vmul.f32 -1.442695, %v3434_v28  ;;  %v3433_v33 = vadd.f32 %v3425_v29, %v6496_v54  ;;  %v3435_v26 = vadd.f32 %v3427_v31, %v6491_v46 }
0x1e0b   :  { %v3420_v12 = vpop.f32.mrf.mxu0 }
0x1e0c   :  { %5630 = vpow2.f32 %v4923_v30  ;;  %v4925_v5 = vmul.f32 -1.442695, %v3433_v33  ;;  %v4926_v43 = vmul.f32 -1.442695, %v3435_v26 }
0x1e0d   :  { %5632 = vpow2.f32 %v4924_v18 }
0x1e0e   :  { %5634 = vtanh.f32 %v3433_v33 }
0x1e0f   :  { %5636 = vtanh.f32 %v3435_v26 }
0x1e19   :  { %v5631_v7 = vpop.eup %5630 }
0x1e1a   :  { %v5633_v39 = vpop.eup %5632  ;;  %v3442_v48 = vadd.f32 1.0, %v5631_v7 }
0x1e1b   :  { %v3443_v2 = vadd.f32 1.0, %v5633_v39  ;;  %v5635_v45 = vpop.eup %5634 }
0x1e1c   :  { %5638 = vrcp.f32 %v3442_v48  ;;  %v5637_v8 = vpop.eup %5636 }
0x1e1d   :  { %5640 = vrcp.f32 %v3443_v2 }
0x1e1e   :  { %5642 = vpow2.f32 %v4925_v5 }
0x1e1f   :  { %5644 = vpow2.f32 %v4926_v43 }
0x1e29   :  { %v5639_v59 = vpop.eup %5638 }
0x1e2a   :  { %v5641_v62 = vpop.eup %5640  ;;  %v3470_v34 = vmul.f32 %v5639_v59, %v5635_v45  ;;  %v3468_v13 = vmul.f32 %v5639_v59, %v3464_v10 }
0x1e2b   :  { %v3471_v35 = vmul.f32 %v5641_v62, %v5637_v8  ;;  %v3469_v23 = vmul.f32 %v5641_v62, %v3465_v38  ;;  %v5643_v47 = vpop.eup %5642  ;;  %v3344_v38 = vrot.slane %v6694_v0, 7 }
0x1e2c   :  { %3474 = vrot.lane.b32.xlu0 %v3470_v34, %s5949_s14  ;;  %v5645_v44 = vpop.eup %5644  ;;  %v3456_v49 = vadd.f32 1.0, %v5643_v47 }
0x1e2d   :  { %3476 = vrot.lane.b32.xlu1 %v3471_v35, %s5949_s14  ;;  %v3457_v55 = vadd.f32 1.0, %v5645_v44 }
0x1e8f   :  { %v3295_v37 = vpop.f32.mrf.mxu1 }
0x1e90   :  { %v3304_v32 = vrot.slane %v3295_v37, 5  ;;  %v3306_v17 = vrot.slane %v3295_v37, 6 }
0x1e91   :  { %v3297_v14 = vpop.f32.mrf.mxu1 }
0x1e92   :  { %v3312_v20 = vadd.f32 %v3304_v32, %v6584_v50  ;;  %v3314_v60 = vadd.f32 %v3306_v17, %v6586_v52  ;;  %v3305_v22 = vrot.slane %v3297_v14, 5  ;;  %v3307_v56 = vrot.slane %v3297_v14, 6 }
0x1e93   :  { %v3299_v41 = vpop.f32.mrf.mxu1 }
0x1e94   :  { %v4918_v42 = vmul.f32 -1.442695, %v3312_v20  ;;  %v4919_v61 = vmul.f32 -1.442695, %v3314_v60  ;;  %v3313_v58 = vadd.f32 %v3305_v22, %v6595_v6  ;;  %v3315_v18 = vadd.f32 %v3307_v56, %v6592_v15 }
0x1e95   :  { %v3300_v21 = vpop.f32.mrf.mxu1 }
0x1e96   :  { %5646 = vpow2.f32 %v4918_v42  ;;  %v4920_v41 = vmul.f32 -1.442695, %v3313_v58 }
0x1e97   :  { %5648 = vpow2.f32 %v4919_v61 }
0x1e98   :  { %5650 = vrcp.f32 %v3456_v49 }
0x1e99   :  { %5652 = vrcp.f32 %v3457_v55 }
0x1e9e   :  { %v3475_v27 = vpop.permute.xlu0 %3474 }
0x1e9f   :  { %v3477_v57 = vpop.permute.xlu1 %3476  ;;  %v6756_v28 = vadd.f32 %v3475_v27, %v3468_v13  ;;  %v3345_v13 = vrot.slane %v6696_v11, 7  ;;  %v4921_v11 = vmul.f32 -1.442695, %v3315_v18 }
0x1ea0   :  { %v6759_v30 = vadd.f32 %v3477_v57, %v3469_v23 }
0x1ea1   :  { %5654 = vtanh.f32 %v6756_v28 }
0x1ea2   :  { %5656 = vtanh.f32 %v6759_v30 }
0x1ea3   :  { %v5647_v12 = vpop.eup %5646  ;;  %5658 = vtanh.f32 %v3313_v58 }
0x1ea4   :  { %v5649_v29 = vpop.eup %5648  ;;  %v3322_v31 = vadd.f32 1.0, %v5647_v12  ;;  %5660 = vtanh.f32 %v3315_v18 }
0x1ea5   :  { %v3323_v33 = vadd.f32 1.0, %v5649_v29  ;;  %v5651_v26 = vpop.eup %5650 }
0x1ea6   :  { %5662 = vrcp.f32 %v3322_v31  ;;  %v5653_v7 = vpop.eup %5652 }
0x1ea7   :  { %5664 = vrcp.f32 %v3323_v33 }
0x1ea8   :  { %5666 = vpow2.f32 %v4920_v41 }
0x1ea9   :  { %5668 = vpow2.f32 %v4921_v11 }
0x1eae   :  { %v5655_v39 = vpop.eup %5654 }
0x1eaf   :  { %v5657_v48 = vpop.eup %5656  ;;  %v3484_v2 = vmul.f32 %v5655_v39, %v5651_v26 }
0x1eb0   :  { %v3485_v45 = vmul.f32 %v5657_v48, %v5653_v7  ;;  %v5659_v8 = vpop.eup %5658 }
0x1eb1   :  { %v3606_v10 = vpack.c.bf16 %v3484_v2, %v3484_v2  ;;  %v5661_v59 = vpop.eup %5660 }
0x1eb2   :  { %v3607_v62 = vpack.c.bf16 %v3485_v45, %v3485_v45 }
0x1eb3   :  { %v5663_v34 = vpop.eup %5662  ;;  %v3610_v35 = vunpack.c.l.b16 %v3606_v10  ;;  %v6790_v10 = vld [vmem:[%s7052_s19 + $0x30] ss:$8 sps:$4 sm:$0xff]  }
0x1eb4   :  { %v5665_v23 = vpop.eup %5664  ;;  %v3350_v5 = vmul.f32 %v5663_v34, %v5659_v8  ;;  %v3611_v43 = vunpack.c.l.b16 %v3607_v62  ;;  %v3348_v37 = vmul.f32 %v5663_v34, %v3344_v38  ;;  %v6799_v38 = vld [vmem:[%s7052_s19 + $0x20] ss:$8 sps:$4 sm:$0xff]   ;;  %v6803_v62 = vld [vmem:[%s7052_s19 + $0x14] ss:$8 sps:$4 sm:$0xff]   ;;  %v6807_v34 = vld [vmem:[%s7052_s19 + $0x10] ss:$8 sps:$4 sm:$0xff]  }
0x1eb5   :  { %v3351_v32 = vmul.f32 %v5665_v23, %v5661_v59  ;;  %v3612_v17 = vrot.slane %v3610_v35, 4  ;;  %v3349_v14 = vmul.f32 %v5665_v23, %v3345_v13  ;;  %v5667_v42 = vpop.eup %5666  ;;  %v6795_v59 = vld [vmem:[%s7052_s19 + $0x24] ss:$8 sps:$4 sm:$0xff]   ;;  %v6815_v35 = vld [vmem:[%s7052_s19] ss:$8 sps:$4 sm:$0xff]  }
0x1eb6   :  { %3354 = vrot.lane.b32.xlu0 %v3350_v5, %s5949_s14  ;;  %v3613_v20 = vrot.slane %v3611_v43, 3  ;;  %v5669_v61 = vpop.eup %5668  ;;  %v3336_v21 = vadd.f32 1.0, %v5667_v42  ;;  %v6811_v13 = vld [vmem:[%s7052_s19 + $0x4] ss:$8 sps:$4 sm:$0xff]   ;;  %v6819_v23 = vld [vmem:[%s7052_s19 + $0x34] ss:$8 sps:$4 sm:$0xff]  }
0x1eb7   :  { %3356 = vrot.lane.b32.xlu1 %v3351_v32, %s5949_s14  ;;  %v3337_v47 = vadd.f32 1.0, %v5669_v61 }
0x1eb8   :  { %v3614_v60 = vsel %vm2278_vm6, %v3613_v20, %v3612_v17  ;;  %5670 = vrcp.f32 %v3336_v21 }
0x1eb9   :  { %v3615_v0 = vpack.c.b16 %v3614_v60, %v3614_v60  ;;  %5672 = vrcp.f32 %v3337_v47 }
0x1ebb   :  { %3616 = vrot.lane.b32.xlu0 %v3615_v0, %s5949_s14 }
0x1ec5   :  { %v5671_v27 = vpop.eup %5670 }
0x1ec6   :  { %v5673_v57 = vpop.eup %5672 }
0x1f28   :  { %v3355_v44 = vpop.permute.xlu0 %3354 }
0x1f29   :  { %v3357_v49 = vpop.permute.xlu1 %3356  ;;  %v6770_v55 = vadd.f32 %v3355_v44, %v3348_v37 }
0x1f2a   :  { %v6772_v22 = vadd.f32 %v3357_v49, %v3349_v14 }
0x1f2b   :  { %5674 = vtanh.f32 %v6770_v55 }
0x1f2c   :  { %5676 = vtanh.f32 %v6772_v22 }
0x1f2d   :  { %v3617_v56 = vpop.permute.xlu0 %3616 }
0x1f2e   :  { %4932 = vmatmul.mubr.msk.bf16.vlgmr.msra.gmra.mxu0 %vm1130_vm5, %v3617_v56 }
0x1f2f   :  { %3870 = vmatpush1.bf16.msra.mxu0 %v6702_v63  ;;  %3893 = vmatprep.mubr.bf16.mxu0 %v5948_v1 }
0x1f30   :  { %3871 = vmatprep.subr.bf16.mxu0 %v6707_v4 }
0x1f33   :  { %3872 = vmatpush1.bf16.msra.mxu0 %v6711_v19 }
0x1f34   :  { %3873 = vmatprep.subr.bf16.mxu0 %v6715_v9 }
0x1f37   :  { %3874 = vmatpush1.bf16.msra.mxu0 %v6719_v24 }
0x1f38   :  { %v5675_v58 = vpop.eup %5674  ;;  %3875 = vmatprep.subr.bf16.mxu0 %v6723_v51 }
0x1f39   :  { %v5677_v18 = vpop.eup %5676  ;;  %v3364_v12 = vmul.f32 %v5675_v58, %v5671_v27  ;;  %v3704_v58 = vrot.slane %v6756_v28, 1 }
0x1f3a   :  { %v3365_v29 = vmul.f32 %v5677_v18, %v5673_v57 }
0x1f3b   :  { %v3486_v31 = vpack.c.bf16 %v3364_v12, %v3364_v12  ;;  %3876 = vmatpush1.bf16.msra.mxu0 %v6727_v53  ;;  %v3705_v12 = vrot.slane %v6759_v30, 1 }
0x1f3c   :  { %v3487_v33 = vpack.c.bf16 %v3365_v29, %v3365_v29  ;;  %4109 = vmatprep.subr.bf16.mxu0 %v6731_v25 }
0x1f3d   :  { %v3490_v26 = vunpack.c.l.b16 %v3486_v31 }
0x1f3e   :  { %v3491_v7 = vunpack.c.l.b16 %v3487_v33 }
0x1f3f   :  { %v3492_v39 = vrot.slane %v3490_v26, 3 }
0x1f40   :  { %v3493_v48 = vrot.slane %v3491_v7, 2 }
0x1f42   :  { %v3494_v2 = vsel %vm2278_vm6, %v3493_v48, %v3492_v39 }
0x1f43   :  { %v3495_v45 = vpack.c.b16 %v3494_v2, %v3494_v2 }
0x1f45   :  { %3496 = vrot.lane.b32.xlu1 %v3495_v45, %s5949_s14 }
0x1fb7   :  { %v3497_v8 = vpop.permute.xlu1 %3496 }
0x1fb8   :  { %4927 = vmatmul.mubr.msk.bf16.vlgmr.msra.gmra.mxu1 %vm1130_vm5, %v3497_v8 }
0x1fb9   :  { %3750 = vmatpush1.bf16.msra.mxu1 %v6790_v10  ;;  %3773 = vmatprep.mubr.bf16.mxu1 %v5948_v1 }
0x1fba   :  { %3751 = vmatprep.subr.bf16.mxu1 %v6795_v59 }
0x1fbd   :  { %3752 = vmatpush1.bf16.msra.mxu1 %v6799_v38 }
0x1fbe   :  { %3753 = vmatprep.subr.bf16.mxu1 %v6803_v62 }
0x1fc1   :  { %3754 = vmatpush1.bf16.msra.mxu1 %v6807_v34 }
0x1fc2   :  { %3755 = vmatprep.subr.bf16.mxu1 %v6811_v13 }
0x1fc5   :  { %3756 = vmatpush1.bf16.msra.mxu1 %v6815_v35 }
0x1fc6   :  { %3989 = vmatprep.subr.bf16.mxu1 %v6819_v23 }
0x1fee   :  { %v3655_v5 = vpop.f32.mrf.mxu0 }
0x1fef   :  { %v3664_v43 = vrot.slane %v3655_v5, 5  ;;  %v3666_v37 = vrot.slane %v3655_v5, 6 }
0x1ff0   :  { %v3657_v32 = vpop.f32.mrf.mxu0 }
0x1ff1   :  { %v3672_v17 = vadd.f32 %v3664_v43, %v6486_v40  ;;  %v3674_v14 = vadd.f32 %v3666_v37, %v6483_v36  ;;  %v3665_v11 = vrot.slane %v3657_v32, 5  ;;  %v3667_v42 = vrot.slane %v3657_v32, 6 }
0x1ff2   :  { %v3659_v20 = vpop.f32.mrf.mxu0 }
0x1ff3   :  { %v4933_v60 = vmul.f32 -1.442695, %v3672_v17  ;;  %v4934_v0 = vmul.f32 -1.442695, %v3674_v14  ;;  %v3673_v61 = vadd.f32 %v3665_v11, %v6496_v54  ;;  %v3675_v21 = vadd.f32 %v3667_v42, %v6491_v46 }
0x1ff4   :  { %v3660_v41 = vpop.f32.mrf.mxu0 }
0x1ff5   :  { %5678 = vpow2.f32 %v4933_v60  ;;  %v4935_v39 = vmul.f32 -1.442695, %v3673_v61  ;;  %v4936_v48 = vmul.f32 -1.442695, %v3675_v21 }
0x1ff6   :  { %5680 = vpow2.f32 %v4934_v0 }
0x1ff7   :  { %5682 = vtanh.f32 %v3673_v61 }
0x1ff8   :  { %5684 = vtanh.f32 %v3675_v21 }
0x2002   :  { %v5679_v47 = vpop.eup %5678 }
0x2003   :  { %v5681_v44 = vpop.eup %5680  ;;  %v3682_v49 = vadd.f32 1.0, %v5679_v47 }
0x2004   :  { %v3683_v56 = vadd.f32 1.0, %v5681_v44  ;;  %v5683_v27 = vpop.eup %5682 }
0x2005   :  { %5686 = vrcp.f32 %v3682_v49  ;;  %v5685_v57 = vpop.eup %5684 }
0x2006   :  { %5688 = vrcp.f32 %v3683_v56 }
0x2007   :  { %5690 = vpow2.f32 %v4935_v39 }
0x2008   :  { %5692 = vpow2.f32 %v4936_v48 }
0x2012   :  { %v5687_v18 = vpop.eup %5686 }
0x2013   :  { %v5689_v29 = vpop.eup %5688  ;;  %v3710_v31 = vmul.f32 %v5687_v18, %v5683_v27  ;;  %v3708_v33 = vmul.f32 %v5687_v18, %v3704_v58 }
0x2014   :  { %v3711_v26 = vmul.f32 %v5689_v29, %v5685_v57  ;;  %v3709_v7 = vmul.f32 %v5689_v29, %v3705_v12  ;;  %v5691_v14 = vpop.eup %5690 }
0x2015   :  { %3714 = vrot.lane.b32.xlu0 %v3710_v31, %s5949_s14  ;;  %v5693_v20 = vpop.eup %5692  ;;  %v3696_v60 = vadd.f32 1.0, %v5691_v14 }
0x2016   :  { %3716 = vrot.lane.b32.xlu1 %v3711_v26, %s5949_s14  ;;  %v3697_v0 = vadd.f32 1.0, %v5693_v20 }
0x2078   :  { %v3535_v2 = vpop.f32.mrf.mxu1 }
0x2079   :  { %v3544_v45 = vrot.slane %v3535_v2, 4  ;;  %v3546_v8 = vrot.slane %v3535_v2, 5  ;;  %v3584_v2 = vrot.slane %v6770_v55, 7 }
0x207a   :  { %v3537_v28 = vpop.f32.mrf.mxu1 }
0x207b   :  { %v3552_v5 = vadd.f32 %v3544_v45, %v6584_v50  ;;  %v3554_v30 = vadd.f32 %v3546_v8, %v6586_v52  ;;  %v3545_v41 = vrot.slane %v3537_v28, 4  ;;  %v3547_v11 = vrot.slane %v3537_v28, 5 }
0x207c   :  { %v3539_v43 = vpop.f32.mrf.mxu1  ;;  %v3585_v28 = vrot.slane %v6772_v22, 7 }
0x207d   :  { %v4928_v37 = vmul.f32 -1.442695, %v3552_v5  ;;  %v4929_v32 = vmul.f32 -1.442695, %v3554_v30  ;;  %v3553_v47 = vadd.f32 %v3545_v41, %v6595_v6  ;;  %v3555_v49 = vadd.f32 %v3547_v11, %v6592_v15 }
0x207e   :  { %v3540_v17 = vpop.f32.mrf.mxu1 }
0x207f   :  { %5694 = vpow2.f32 %v4928_v37  ;;  %v4930_v41 = vmul.f32 -1.442695, %v3553_v47  ;;  %v4931_v22 = vmul.f32 -1.442695, %v3555_v49 }
0x2080   :  { %5696 = vpow2.f32 %v4929_v32 }
0x2081   :  { %5698 = vrcp.f32 %v3696_v60 }
0x2082   :  { %5700 = vrcp.f32 %v3697_v0 }
0x2087   :  { %v3715_v42 = vpop.permute.xlu0 %3714 }
0x2088   :  { %v3717_v61 = vpop.permute.xlu1 %3716  ;;  %v6832_v21 = vadd.f32 %v3715_v42, %v3708_v33 }
0x2089   :  { %v6835_v44 = vadd.f32 %v3717_v61, %v3709_v7 }
0x208a   :  { %5702 = vtanh.f32 %v6832_v21 }
0x208b   :  { %5704 = vtanh.f32 %v6835_v44 }
0x208c   :  { %v5695_v56 = vpop.eup %5694  ;;  %5706 = vtanh.f32 %v3553_v47 }
0x208d   :  { %v5697_v27 = vpop.eup %5696  ;;  %v3562_v57 = vadd.f32 1.0, %v5695_v56  ;;  %5708 = vtanh.f32 %v3555_v49 }
0x208e   :  { %v3563_v58 = vadd.f32 1.0, %v5697_v27  ;;  %v5699_v18 = vpop.eup %5698 }
0x208f   :  { %5710 = vrcp.f32 %v3562_v57  ;;  %v5701_v12 = vpop.eup %5700 }
0x2090   :  { %5712 = vrcp.f32 %v3563_v58 }
0x2091   :  { %5714 = vpow2.f32 %v4930_v41 }
0x2092   :  { %5716 = vpow2.f32 %v4931_v22 }
0x2097   :  { %v5703_v29 = vpop.eup %5702 }
0x2098   :  { %v5705_v31 = vpop.eup %5704  ;;  %v3724_v33 = vmul.f32 %v5703_v29, %v5699_v18 }
0x2099   :  { %v3725_v26 = vmul.f32 %v5705_v31, %v5701_v12  ;;  %v5707_v7 = vpop.eup %5706 }
0x209a   :  { %v3846_v39 = vpack.c.bf16 %v3724_v33, %v3724_v33  ;;  %v5709_v48 = vpop.eup %5708 }
0x209b   :  { %v3847_v45 = vpack.c.bf16 %v3725_v26, %v3725_v26 }
0x209c   :  { %v5711_v8 = vpop.eup %5710  ;;  %v3850_v5 = vunpack.c.l.b16 %v3846_v39 }
0x209d   :  { %v5713_v30 = vpop.eup %5712  ;;  %v3590_v43 = vmul.f32 %v5711_v8, %v5707_v7  ;;  %v3851_v37 = vunpack.c.l.b16 %v3847_v45  ;;  %v3588_v32 = vmul.f32 %v5711_v8, %v3584_v2 }
0x209e   :  { %v3591_v17 = vmul.f32 %v5713_v30, %v5709_v48  ;;  %v3852_v14 = vrot.slane %v3850_v5, 3  ;;  %v3589_v20 = vmul.f32 %v5713_v30, %v3585_v28  ;;  %v5715_v11 = vpop.eup %5714 }
0x209f   :  { %3594 = vrot.lane.b32.xlu0 %v3590_v43, %s5949_s14  ;;  %v3853_v60 = vrot.slane %v3851_v37, 2  ;;  %v5717_v42 = vpop.eup %5716  ;;  %v3576_v61 = vadd.f32 1.0, %v5715_v11 }
0x20a0   :  { %3596 = vrot.lane.b32.xlu1 %v3591_v17, %s5949_s14  ;;  %v3577_v56 = vadd.f32 1.0, %v5717_v42 }
0x20a1   :  { %v3854_v0 = vsel %vm2278_vm6, %v3853_v60, %v3852_v14  ;;  %5718 = vrcp.f32 %v3576_v61 }
0x20a2   :  { %v3855_v55 = vpack.c.b16 %v3854_v0, %v3854_v0  ;;  %5720 = vrcp.f32 %v3577_v56 }
0x20a4   :  { %3856 = vrot.lane.b32.xlu0 %v3855_v55, %s5949_s14 }
0x20ae   :  { %v5719_v49 = vpop.eup %5718 }
0x20af   :  { %v5721_v12 = vpop.eup %5720 }
0x2111   :  { %v3595_v27 = vpop.permute.xlu0 %3594 }
0x2112   :  { %v3597_v57 = vpop.permute.xlu1 %3596  ;;  %v6846_v58 = vadd.f32 %v3595_v27, %v3588_v32 }
0x2113   :  { %v6848_v18 = vadd.f32 %v3597_v57, %v3589_v20 }
0x2114   :  { %5722 = vtanh.f32 %v6846_v58 }
0x2115   :  { %5724 = vtanh.f32 %v6848_v18 }
0x2116   :  { %v3857_v47 = vpop.permute.xlu0 %3856 }
0x2117   :  { %4942 = vmatmul.mubr.msk.bf16.vlgmr.msra.gmra.mxu0 %vm1130_vm5, %v3857_v47 }
0x2118   :  { %4110 = vmatpush1.bf16.msra.mxu0 %v6702_v63  ;;  %4133 = vmatprep.mubr.bf16.mxu0 %v5948_v1 }
0x2119   :  { %4111 = vmatprep.subr.bf16.mxu0 %v6707_v4 }
0x211c   :  { %4112 = vmatpush1.bf16.msra.mxu0 %v6711_v19 }
0x211d   :  { %4113 = vmatprep.subr.bf16.mxu0 %v6715_v9 }
0x2120   :  { %4114 = vmatpush1.bf16.msra.mxu0 %v6719_v24 }
0x2121   :  { %v5723_v29 = vpop.eup %5722  ;;  %4115 = vmatprep.subr.bf16.mxu0 %v6723_v51 }
0x2122   :  { %v5725_v31 = vpop.eup %5724  ;;  %v3604_v33 = vmul.f32 %v5723_v29, %v5719_v49  ;;  %v3944_v49 = vrot.slane %v6832_v21, 1  ;;  %v3945_v29 = vrot.slane %v6835_v44, 1 }
0x2123   :  { %v3605_v26 = vmul.f32 %v5725_v31, %v5721_v12 }
0x2124   :  { %v3726_v7 = vpack.c.bf16 %v3604_v33, %v3604_v33  ;;  %4116 = vmatpush1.bf16.msra.mxu0 %v6727_v53 }
0x2125   :  { %v3727_v39 = vpack.c.bf16 %v3605_v26, %v3605_v26  ;;  %4346 = vmatprep.subr.bf16.mxu0 %v6731_v25 }
0x2126   :  { %v3730_v48 = vunpack.c.l.b16 %v3726_v7 }
0x2127   :  { %v3731_v2 = vunpack.c.l.b16 %v3727_v39 }
0x2128   :  { %v3732_v45 = vrot.slane %v3730_v48, 4 }
0x2129   :  { %v3733_v8 = vrot.slane %v3731_v2, 3 }
0x212b   :  { %v3734_v28 = vsel %vm2278_vm6, %v3733_v8, %v3732_v45 }
0x212c   :  { %v3735_v5 = vpack.c.b16 %v3734_v28, %v3734_v28 }
0x212e   :  { %3736 = vrot.lane.b32.xlu1 %v3735_v5, %s5949_s14 }
0x21a0   :  { %v3737_v30 = vpop.permute.xlu1 %3736 }
0x21a1   :  { %4937 = vmatmul.mubr.msk.bf16.vlgmr.msra.gmra.mxu1 %vm1130_vm5, %v3737_v30 }
0x21a2   :  { %3990 = vmatpush1.bf16.msra.mxu1 %v6790_v10  ;;  %4013 = vmatprep.mubr.bf16.mxu1 %v5948_v1 }
0x21a3   :  { %3991 = vmatprep.subr.bf16.mxu1 %v6795_v59 }
0x21a6   :  { %3992 = vmatpush1.bf16.msra.mxu1 %v6799_v38 }
0x21a7   :  { %3993 = vmatprep.subr.bf16.mxu1 %v6803_v62 }
0x21aa   :  { %3994 = vmatpush1.bf16.msra.mxu1 %v6807_v34 }
0x21ab   :  { %3995 = vmatprep.subr.bf16.mxu1 %v6811_v13 }
0x21ae   :  { %3996 = vmatpush1.bf16.msra.mxu1 %v6815_v35 }
0x21af   :  { %4227 = vmatprep.subr.bf16.mxu1 %v6819_v23 }
0x21d7   :  { %v3895_v25 = vpop.f32.mrf.mxu0 }
0x21d8   :  { %v3904_v43 = vrot.slane %v3895_v25, 6  ;;  %v3906_v37 = vrot.slane %v3895_v25, 7 }
0x21d9   :  { %v3897_v32 = vpop.f32.mrf.mxu0 }
0x21da   :  { %v3912_v17 = vadd.f32 %v3904_v43, %v6486_v40  ;;  %v3914_v14 = vadd.f32 %v3906_v37, %v6483_v36  ;;  %v3905_v41 = vrot.slane %v3897_v32, 6  ;;  %v3907_v22 = vrot.slane %v3897_v32, 7 }
0x21db   :  { %v3899_v20 = vpop.f32.mrf.mxu0 }
0x21dc   :  { %v4943_v60 = vmul.f32 -1.442695, %v3912_v17  ;;  %v4944_v0 = vmul.f32 -1.442695, %v3914_v14  ;;  %v3913_v11 = vadd.f32 %v3905_v41, %v6496_v54  ;;  %v3915_v23 = vadd.f32 %v3907_v22, %v6491_v46 }
0x21dd   :  { %v3900_v55 = vpop.f32.mrf.mxu0 }
0x21de   :  { %5726 = vpow2.f32 %v4943_v60  ;;  %v4945_v48 = vmul.f32 -1.442695, %v3913_v11  ;;  %v4946_v2 = vmul.f32 -1.442695, %v3915_v23 }
0x21df   :  { %5728 = vpow2.f32 %v4944_v0 }
0x21e0   :  { %5730 = vtanh.f32 %v3913_v11 }
0x21e1   :  { %5732 = vtanh.f32 %v3915_v23 }
0x21eb   :  { %v5727_v42 = vpop.eup %5726 }
0x21ec   :  { %v5729_v61 = vpop.eup %5728  ;;  %v3922_v56 = vadd.f32 1.0, %v5727_v42 }
0x21ed   :  { %v3923_v27 = vadd.f32 1.0, %v5729_v61  ;;  %v5731_v57 = vpop.eup %5730 }
0x21ee   :  { %5734 = vrcp.f32 %v3922_v56  ;;  %v5733_v47 = vpop.eup %5732 }
0x21ef   :  { %5736 = vrcp.f32 %v3923_v27 }
0x21f0   :  { %5738 = vpow2.f32 %v4945_v48  ;;  %v3824_v48 = vrot.slane %v6846_v58, 7 }
0x21f1   :  { %5740 = vpow2.f32 %v4946_v2 }
0x21fb   :  { %v5735_v12 = vpop.eup %5734 }
0x21fc   :  { %v5737_v31 = vpop.eup %5736  ;;  %v3950_v33 = vmul.f32 %v5735_v12, %v5731_v57  ;;  %v3948_v26 = vmul.f32 %v5735_v12, %v3944_v49 }
0x21fd   :  { %v3951_v7 = vmul.f32 %v5737_v31, %v5733_v47  ;;  %v3949_v39 = vmul.f32 %v5737_v31, %v3945_v29  ;;  %v5739_v32 = vpop.eup %5738 }
0x21fe   :  { %3954 = vrot.lane.b32.xlu0 %v3950_v33, %s5949_s14  ;;  %v5741_v17 = vpop.eup %5740  ;;  %v3936_v14 = vadd.f32 1.0, %v5739_v32 }
0x21ff   :  { %3956 = vrot.lane.b32.xlu1 %v3951_v7, %s5949_s14  ;;  %v3937_v20 = vadd.f32 1.0, %v5741_v17 }
0x2261   :  { %v3775_v45 = vpop.f32.mrf.mxu1 }
0x2262   :  { %v3784_v8 = vrot.slane %v3775_v45, 3  ;;  %v3786_v28 = vrot.slane %v3775_v45, 4 }
0x2263   :  { %v3777_v21 = vpop.f32.mrf.mxu1 }
0x2264   :  { %v3792_v5 = vadd.f32 %v3784_v8, %v6584_v50  ;;  %v3794_v44 = vadd.f32 %v3786_v28, %v6586_v52  ;;  %v3785_v60 = vrot.slane %v3777_v21, 3  ;;  %v3787_v0 = vrot.slane %v3777_v21, 4 }
0x2265   :  { %v3779_v30 = vpop.f32.mrf.mxu1  ;;  %v3825_v8 = vrot.slane %v6848_v18, 7 }
0x2266   :  { %v4938_v25 = vmul.f32 -1.442695, %v3792_v5  ;;  %v4939_v43 = vmul.f32 -1.442695, %v3794_v44  ;;  %v3793_v11 = vadd.f32 %v3785_v60, %v6595_v6  ;;  %v3795_v42 = vadd.f32 %v3787_v0, %v6592_v15 }
0x2267   :  { %v3780_v37 = vpop.f32.mrf.mxu1 }
0x2268   :  { %5742 = vpow2.f32 %v4938_v25  ;;  %v4941_v18 = vmul.f32 -1.442695, %v3795_v42 }
0x2269   :  { %5744 = vpow2.f32 %v4939_v43 }
0x226a   :  { %5746 = vrcp.f32 %v3936_v14  ;;  %v4940_v14 = vmul.f32 -1.442695, %v3793_v11 }
0x226b   :  { %5748 = vrcp.f32 %v3937_v20 }
0x2270   :  { %v3955_v55 = vpop.permute.xlu0 %3954 }
0x2271   :  { %v3957_v41 = vpop.permute.xlu1 %3956  ;;  %v6884_v22 = vadd.f32 %v3955_v55, %v3948_v26 }
0x2272   :  { %v6887_v23 = vadd.f32 %v3957_v41, %v3949_v39 }
0x2273   :  { %5750 = vtanh.f32 %v6884_v22 }
0x2274   :  { %5752 = vtanh.f32 %v6887_v23 }
0x2275   :  { %v5743_v61 = vpop.eup %5742  ;;  %5754 = vtanh.f32 %v3793_v11 }
0x2276   :  { %v5745_v56 = vpop.eup %5744  ;;  %v3802_v27 = vadd.f32 1.0, %v5743_v61  ;;  %5756 = vtanh.f32 %v3795_v42 }
0x2277   :  { %v3803_v57 = vadd.f32 1.0, %v5745_v56  ;;  %v5747_v47 = vpop.eup %5746 }
0x2278   :  { %5758 = vrcp.f32 %v3802_v27  ;;  %v5749_v49 = vpop.eup %5748 }
0x2279   :  { %5760 = vrcp.f32 %v3803_v57 }
0x227a   :  { %5762 = vpow2.f32 %v4940_v14 }
0x227b   :  { %5764 = vpow2.f32 %v4941_v18 }
0x2280   :  { %v5751_v12 = vpop.eup %5750 }
0x2281   :  { %v5753_v29 = vpop.eup %5752  ;;  %v3964_v31 = vmul.f32 %v5751_v12, %v5747_v47 }
0x2282   :  { %v3965_v33 = vmul.f32 %v5753_v29, %v5749_v49  ;;  %v5755_v26 = vpop.eup %5754 }
0x2283   :  { %v4086_v7 = vpack.c.bf16 %v3964_v31, %v3964_v31  ;;  %v5757_v39 = vpop.eup %5756 }
0x2284   :  { %v4087_v2 = vpack.c.bf16 %v3965_v33, %v3965_v33 }
0x2285   :  { %v5759_v45 = vpop.eup %5758  ;;  %v4090_v28 = vunpack.c.l.b16 %v4086_v7 }
0x2286   :  { %v5761_v21 = vpop.eup %5760  ;;  %v3830_v5 = vmul.f32 %v5759_v45, %v5755_v26  ;;  %v4091_v44 = vunpack.c.l.b16 %v4087_v2  ;;  %v3828_v30 = vmul.f32 %v5759_v45, %v3824_v48 }
0x2287   :  { %v3831_v25 = vmul.f32 %v5761_v21, %v5757_v39  ;;  %v4092_v43 = vrot.slane %v4090_v28, 2  ;;  %v3829_v37 = vmul.f32 %v5761_v21, %v3825_v8  ;;  %v5763_v20 = vpop.eup %5762 }
0x2288   :  { %3834 = vrot.lane.b32.xlu0 %v3830_v5, %s5949_s14  ;;  %v4093_v32 = vrot.slane %v4091_v44, 1  ;;  %v5765_v60 = vpop.eup %5764  ;;  %v3816_v0 = vadd.f32 1.0, %v5763_v20  ;;  %v4183_v5 = vrot.slane %v6887_v23, 1 }
0x2289   :  { %3836 = vrot.lane.b32.xlu1 %v3831_v25, %s5949_s14  ;;  %v3817_v55 = vadd.f32 1.0, %v5765_v60  ;;  %v4182_v25 = vrot.slane %v6884_v22, 1 }
0x228a   :  { %v4094_v17 = vsel %vm2278_vm6, %v4093_v32, %v4092_v43  ;;  %5766 = vrcp.f32 %v3816_v0 }
0x228b   :  { %v4095_v58 = vpack.c.b16 %v4094_v17, %v4094_v17  ;;  %5768 = vrcp.f32 %v3817_v55 }
0x228d   :  { %4096 = vrot.lane.b32.xlu0 %v4095_v58, %s5949_s14 }
0x2297   :  { %v5767_v42 = vpop.eup %5766 }
0x2298   :  { %v5769_v57 = vpop.eup %5768 }
0x22fa   :  { %v3835_v41 = vpop.permute.xlu0 %3834 }
0x22fb   :  { %v3837_v61 = vpop.permute.xlu1 %3836  ;;  %v6898_v56 = vadd.f32 %v3835_v41, %v3828_v30 }
0x22fc   :  { %v6900_v27 = vadd.f32 %v3837_v61, %v3829_v37 }
0x22fd   :  { %5770 = vtanh.f32 %v6898_v56 }
0x22fe   :  { %5772 = vtanh.f32 %v6900_v27 }
0x22ff   :  { %v4097_v11 = vpop.permute.xlu0 %4096 }
0x2300   :  { %4952 = vmatmul.mubr.msk.bf16.vlgmr.msra.gmra.mxu0 %vm1130_vm5, %v4097_v11 }
0x2301   :  { %4347 = vmatpush1.bf16.msra.mxu0 %v6702_v63  ;;  %4370 = vmatprep.mubr.bf16.mxu0 %v5948_v1 }
0x2302   :  { %4348 = vmatprep.subr.bf16.mxu0 %v6707_v4 }
0x2305   :  { %4349 = vmatpush1.bf16.msra.mxu0 %v6711_v19 }
0x2306   :  { %4350 = vmatprep.subr.bf16.mxu0 %v6715_v9 }
0x2309   :  { %4351 = vmatpush1.bf16.msra.mxu0 %v6719_v24 }
0x230a   :  { %v5771_v47 = vpop.eup %5770  ;;  %4352 = vmatprep.subr.bf16.mxu0 %v6723_v51 }
0x230b   :  { %v5773_v49 = vpop.eup %5772  ;;  %v3844_v12 = vmul.f32 %v5771_v47, %v5767_v42 }
0x230c   :  { %v3845_v29 = vmul.f32 %v5773_v49, %v5769_v57 }
0x230d   :  { %v3966_v31 = vpack.c.bf16 %v3844_v12, %v3844_v12  ;;  %4353 = vmatpush1.bf16.msra.mxu0 %v6727_v53 }
0x230e   :  { %v3967_v63 = vpack.c.bf16 %v3845_v29, %v3845_v29  ;;  %5299 = vmatprep.subr.bf16.mxu0 %v5945_v16 }
0x230f   :  { %v3970_v4 = vunpack.c.l.b16 %v3966_v31 }
0x2310   :  { %v3971_v19 = vunpack.c.l.b16 %v3967_v63 }
0x2311   :  { %v3972_v33 = vrot.slane %v3970_v4, 5 }
0x2312   :  { %v3973_v9 = vrot.slane %v3971_v19, 4 }
0x2314   :  { %v3974_v26 = vsel %vm2278_vm6, %v3973_v9, %v3972_v33 }
0x2315   :  { %v3975_v7 = vpack.c.b16 %v3974_v26, %v3974_v26 }
0x2317   :  { %3976 = vrot.lane.b32.xlu1 %v3975_v7, %s5949_s14 }
0x2389   :  { %v3977_v24 = vpop.permute.xlu1 %3976 }
0x238a   :  { %4947 = vmatmul.mubr.msk.bf16.vlgmr.msra.gmra.mxu1 %vm1130_vm5, %v3977_v24 }
0x238b   :  { %4228 = vmatpush1.bf16.msra.mxu1 %v6790_v10  ;;  %4251 = vmatprep.mubr.bf16.mxu1 %v5948_v1 }
0x238c   :  { %4229 = vmatprep.subr.bf16.mxu1 %v6795_v59 }
0x238f   :  { %4230 = vmatpush1.bf16.msra.mxu1 %v6799_v38 }
0x2390   :  { %4231 = vmatprep.subr.bf16.mxu1 %v6803_v62 }
0x2393   :  { %4232 = vmatpush1.bf16.msra.mxu1 %v6807_v34 }
0x2394   :  { %4233 = vmatprep.subr.bf16.mxu1 %v6811_v13 }
0x2397   :  { %4234 = vmatpush1.bf16.msra.mxu1 %v6815_v35 }
0x2398   :  { %5287 = vmatprep.subr.bf16.mxu1 %v5945_v16 }
0x23c0   :  { %v4135_v51 = vpop.f32.mrf.mxu0 }
0x23c1   :  { %v4144_v53 = vrot.slane %v4135_v51, 7  ;;  %v4152_v10 = vadd.f32 %v4135_v51, %v6483_v36 }
0x23c2   :  { %v4137_v39 = vpop.f32.mrf.mxu0 }
0x23c3   :  { %v4150_v1 = vadd.f32 %v4144_v53, %v6486_v40  ;;  %v4954_v59 = vmul.f32 -1.442695, %v4152_v10  ;;  %v4145_v34 = vrot.slane %v4137_v39, 7  ;;  %v4153_v13 = vadd.f32 %v4137_v39, %v6491_v46 }
0x23c4   :  { %v4139_v48 = vpop.f32.mrf.mxu0 }
0x23c5   :  { %v4953_v38 = vmul.f32 -1.442695, %v4150_v1  ;;  %5774 = vpow2.f32 %v4954_v59  ;;  %v4151_v35 = vadd.f32 %v4145_v34, %v6496_v54  ;;  %v4956_v14 = vmul.f32 -1.442695, %v4153_v13 }
0x23c6   :  { %v4140_v62 = vpop.f32.mrf.mxu0 }
0x23c7   :  { %5776 = vpow2.f32 %v4953_v38  ;;  %v4955_v18 = vmul.f32 -1.442695, %v4151_v35 }
0x23c8   :  { %5778 = vtanh.f32 %v4153_v13 }
0x23d2   :  { %v5775_v2 = vpop.eup %5774 }
0x23d3   :  { %v4161_v45 = vadd.f32 1.0, %v5775_v2 }
0x23d4   :  { %v5777_v8 = vpop.eup %5776 }
0x23d5   :  { %v4160_v28 = vadd.f32 1.0, %v5777_v8  ;;  %5780 = vrcp.f32 %v4161_v45  ;;  %v5779_v21 = vpop.eup %5778  ;;  %v4065_v8 = vrot.slane %v6900_v27, 7 }
0x23d6   :  { %5782 = vtanh.f32 %v4151_v35  ;;  %v4064_v35 = vrot.slane %v6898_v56, 7 }
0x23d7   :  { %5784 = vrcp.f32 %v4160_v28 }
0x23d8   :  { %5786 = vpow2.f32 %v4956_v14 }
0x23d9   :  { %5788 = vpow2.f32 %v4955_v18 }
0x23e2   :  { %v5781_v44 = vpop.eup %5780 }
0x23e3   :  { %v5783_v30 = vpop.eup %5782  ;;  %v4189_v43 = vmul.f32 %v5781_v44, %v5779_v21  ;;  %v4187_v37 = vmul.f32 %v5781_v44, %v4183_v5 }
0x23e4   :  { %v5785_v32 = vpop.eup %5784 }
0x23e5   :  { %4194 = vrot.lane.b32.xlu1 %v4189_v43, %s5949_s14  ;;  %v4188_v17 = vmul.f32 %v5785_v32, %v5783_v30  ;;  %v4186_v58 = vmul.f32 %v5785_v32, %v4182_v25  ;;  %v5787_v57 = vpop.eup %5786 }
0x23e6   :  { %v5789_v47 = vpop.eup %5788  ;;  %v4175_v49 = vadd.f32 1.0, %v5787_v57 }
0x23e7   :  { %4192 = vrot.lane.b32.xlu0 %v4188_v17, %s5949_s14  ;;  %v4174_v12 = vadd.f32 1.0, %v5789_v47 }
0x244a   :  { %v4015_v20 = vpop.f32.mrf.mxu1 }
0x244b   :  { %v4024_v60 = vrot.slane %v4015_v20, 2  ;;  %v4026_v23 = vrot.slane %v4015_v20, 3 }
0x244c   :  { %v4017_v0 = vpop.f32.mrf.mxu1 }
0x244d   :  { %v4032_v55 = vadd.f32 %v4024_v60, %v6584_v50  ;;  %v4034_v22 = vadd.f32 %v4026_v23, %v6586_v52  ;;  %v4025_v29 = vrot.slane %v4017_v0, 2  ;;  %v4027_v63 = vrot.slane %v4017_v0, 3 }
0x244e   :  { %v4019_v41 = vpop.f32.mrf.mxu1 }
0x244f   :  { %v4948_v61 = vmul.f32 -1.442695, %v4032_v55  ;;  %v4949_v11 = vmul.f32 -1.442695, %v4034_v22  ;;  %v4033_v9 = vadd.f32 %v4025_v29, %v6595_v6  ;;  %v4035_v26 = vadd.f32 %v4027_v63, %v6592_v15 }
0x2450   :  { %v4020_v42 = vpop.f32.mrf.mxu1 }
0x2451   :  { %5790 = vpow2.f32 %v4948_v61  ;;  %v4950_v56 = vmul.f32 -1.442695, %v4033_v9 }
0x2452   :  { %5792 = vpow2.f32 %v4949_v11 }
0x2453   :  { %5794 = vrcp.f32 %v4175_v49 }
0x2457   :  { %v4195_v31 = vpop.permute.xlu1 %4194 }
0x2458   :  { %v6936_v4 = vadd.f32 %v4195_v31, %v4187_v37 }
0x2459   :  { %v4193_v19 = vpop.permute.xlu0 %4192 }
0x245a   :  { %5796 = vtanh.f32 %v6936_v4  ;;  %v6939_v33 = vadd.f32 %v4193_v19, %v4186_v58  ;;  %v4951_v58 = vmul.f32 -1.442695, %v4035_v26 }
0x245b   :  { %5798 = vrcp.f32 %v4174_v12 }
0x245c   :  { %5800 = vtanh.f32 %v6939_v33 }
0x245d   :  { %5802 = vtanh.f32 %v4033_v9 }
0x245e   :  { %v5791_v7 = vpop.eup %5790  ;;  %5804 = vtanh.f32 %v4035_v26 }
0x245f   :  { %v5793_v24 = vpop.eup %5792  ;;  %v4042_v51 = vadd.f32 1.0, %v5791_v7 }
0x2460   :  { %v4043_v53 = vadd.f32 1.0, %v5793_v24  ;;  %v5795_v10 = vpop.eup %5794 }
0x2461   :  { %5806 = vrcp.f32 %v4042_v51 }
0x2462   :  { %5808 = vrcp.f32 %v4043_v53 }
0x2463   :  { %5810 = vpow2.f32 %v4950_v56 }
0x2464   :  { %5812 = vpow2.f32 %v4951_v58 }
0x2467   :  { %v5797_v39 = vpop.eup %5796 }
0x2468   :  { %v5799_v1 = vpop.eup %5798  ;;  %v4203_v59 = vmul.f32 %v5797_v39, %v5795_v10 }
0x2469   :  { %v5801_v48 = vpop.eup %5800 }
0x246a   :  { %v4202_v38 = vmul.f32 %v5801_v48, %v5799_v1  ;;  %v5803_v62 = vpop.eup %5802  ;;  %v4325_v13 = vpack.c.bf16 %v4203_v59, %v4203_v59 }
0x246b   :  { %v5805_v2 = vpop.eup %5804 }
0x246c   :  { %v4324_v34 = vpack.c.bf16 %v4202_v38, %v4202_v38  ;;  %v4329_v25 = vunpack.c.l.b16 %v4325_v13 }
0x246e   :  { %v5807_v45 = vpop.eup %5806  ;;  %v4328_v28 = vunpack.c.l.b16 %v4324_v34 }
0x246f   :  { %v5809_v21 = vpop.eup %5808  ;;  %v4070_v5 = vmul.f32 %v5807_v45, %v5803_v62  ;;  %v4068_v44 = vmul.f32 %v5807_v45, %v4064_v35 }
0x2470   :  { %v4071_v30 = vmul.f32 %v5809_v21, %v5805_v2  ;;  %v4330_v43 = vrot.slane %v4328_v28, 1  ;;  %v4069_v37 = vmul.f32 %v5809_v21, %v4065_v8  ;;  %v5811_v27 = vpop.eup %5810 }
0x2471   :  { %4074 = vrot.lane.b32.xlu0 %v4070_v5, %s5949_s14  ;;  %v5813_v14 = vpop.eup %5812  ;;  %v4056_v18 = vadd.f32 1.0, %v5811_v27 }
0x2472   :  { %4076 = vrot.lane.b32.xlu1 %v4071_v30, %s5949_s14  ;;  %v4331_v32 = vsel %vm2278_vm6, %v4329_v25, %v4330_v43  ;;  %v4057_v20 = vadd.f32 1.0, %v5813_v14  ;;  %v5416_v43 = vld [vmem:[%s6099_s27 + $0x18] sm:$0xff]  }
0x2473   :  { %v4332_v17 = vpack.c.b16 %v4331_v32, %v4331_v32  ;;  %5814 = vrcp.f32 %v4056_v18 }
0x2474   :  { %5816 = vrcp.f32 %v4057_v20 }
0x2475   :  { %4333 = vrot.lane.b32.xlu0 %v4332_v17, %s5949_s14 }
0x2480   :  { %v5815_v41 = vpop.eup %5814 }
0x2481   :  { %v5817_v61 = vpop.eup %5816 }
0x24e3   :  { %v4075_v60 = vpop.permute.xlu0 %4074 }
0x24e4   :  { %v4077_v23 = vpop.permute.xlu1 %4076  ;;  %v6950_v0 = vadd.f32 %v4075_v60, %v4068_v44 }
0x24e5   :  { %v6952_v55 = vadd.f32 %v4077_v23, %v4069_v37  ;;  %v5417_v37 = vld [vmem:[%s6099_s27 + $0x10] sm:$0xff]  }
0x24e6   :  { %5818 = vtanh.f32 %v6950_v0 }
0x24e7   :  { %5820 = vtanh.f32 %v6952_v55  ;;  %v4334_v22 = vpop.permute.xlu0 %4333 }
0x24e8   :  { %4962 = vmatmul.mubr.msk.bf16.vlgmr.msra.gmra.mxu0 %vm1130_vm5, %v4334_v22 }
0x24e9   :  { %5307 = vmatprep.mubr.msk.bf16.mxu0 %vm5946_vm1, %v5945_v16 }
0x24f3   :  { %v5819_v11 = vpop.eup %5818 }
0x24f4   :  { %v5821_v42 = vpop.eup %5820  ;;  %v4084_v57 = vmul.f32 %v5819_v11, %v5815_v41 }
0x24f5   :  { %v4085_v47 = vmul.f32 %v5821_v42, %v5817_v61 }
0x24f6   :  { %v4204_v49 = vpack.c.bf16 %v4084_v57, %v4084_v57 }
0x24f7   :  { %v4205_v12 = vpack.c.bf16 %v4085_v47, %v4085_v47 }
0x24f8   :  { %v4208_v29 = vunpack.c.l.b16 %v4204_v49 }
0x24f9   :  { %v4209_v31 = vunpack.c.l.b16 %v4205_v12 }
0x24fa   :  { %v4210_v63 = vrot.slane %v4208_v29, 6 }
0x24fb   :  { %v4211_v19 = vrot.slane %v4209_v31, 5 }
0x24fd   :  { %v4212_v9 = vsel %vm2278_vm6, %v4211_v19, %v4210_v63 }
0x24fe   :  { %v4213_v26 = vpack.c.b16 %v4212_v9, %v4212_v9 }
0x2500   :  { %4214 = vrot.lane.b32.xlu1 %v4213_v26, %s5949_s14 }
0x2572   :  { %v4215_v7 = vpop.permute.xlu1 %4214 }
0x2573   :  { %4957 = vmatmul.mubr.msk.bf16.vlgmr.msra.gmra.mxu1 %vm1130_vm5, %v4215_v7 }
0x2574   :  { %5295 = vmatprep.mubr.msk.bf16.mxu1 %vm5946_vm1, %v5945_v16  ;;  %5288 = vmatpush3.bf16.msra.mxu1 %v5416_v43 }
0x2575   :  { %5289 = vmatprep.subr.bf16.mxu1 %v5945_v16 }
0x2578   :  { %5290 = vmatpush3.bf16.msra.mxu1 %v5417_v37 }
0x2579   :  { %5291 = vmatprep.subr.bf16.mxu1 %v5945_v16 }
0x25a8   :  { %v4372_v24 = vpop.f32.mrf.mxu0 }
0x25a9   :  { %v4381_v51 = vrot.slane %v4372_v24, 1  ;;  %v4387_v53 = vadd.f32 %v4372_v24, %v6486_v40  ;;  %v4419_v40 = vrot.slane %v6939_v33, 1  ;;  %v5418_v33 = vld [vmem:[%s6099_s27 + $0x8] sm:$0xff]  }
0x25aa   :  { %v4374_v10 = vpop.f32.mrf.mxu0  ;;  %5292 = vmatpush3.bf16.msra.mxu1 %v5418_v33 }
0x25ab   :  { %v4389_v39 = vadd.f32 %v4381_v51, %v6483_v36  ;;  %v4963_v1 = vmul.f32 -1.442695, %v4387_v53  ;;  %v4382_v62 = vrot.slane %v4374_v10, 1  ;;  %v4388_v34 = vadd.f32 %v4374_v10, %v6496_v54  ;;  %5293 = vmatprep.subr.bf16.mxu1 %v5945_v16  ;;  %v5419_v51 = vld [vmem:[%s6099_s27] sm:$0xff]  }
0x25ac   :  { %v4376_v59 = vpop.f32.mrf.mxu0  ;;  %v4420_v54 = vrot.slane %v6936_v4, 1 }
0x25ad   :  { %5822 = vpow2.f32 %v4963_v1  ;;  %v4964_v48 = vmul.f32 -1.442695, %v4389_v39  ;;  %v4390_v2 = vadd.f32 %v4382_v62, %v6491_v46  ;;  %v4965_v4 = vmul.f32 -1.442695, %v4388_v34 }
0x25ae   :  { %v4377_v38 = vpop.f32.mrf.mxu0  ;;  %5294 = vmatpush3.bf16.msra.mxu1 %v5419_v51 }
0x25af   :  { %5824 = vpow2.f32 %v4964_v48  ;;  %v4966_v32 = vmul.f32 -1.442695, %v4390_v2  ;;  %5311 = vmatprep.subr.bf16.mxu1 %v5945_v16  ;;  %v4302_v38 = vrot.slane %v6950_v0, 7 }
0x25b0   :  { %5826 = vtanh.f32 %v4388_v34 }
0x25ba   :  { %v5823_v13 = vpop.eup %5822 }
0x25bb   :  { %v4397_v35 = vadd.f32 1.0, %v5823_v13  ;;  %v4303_v13 = vrot.slane %v6952_v55, 7  ;;  %v5422_v55 = vld [vmem:[%s7053_s24 + $0x18] sm:$0xff]  }
0x25bc   :  { %v5825_v45 = vpop.eup %5824  ;;  %5300 = vmatpush3.bf16.msra.mxu0 %v5422_v55 }
0x25bd   :  { %v4398_v8 = vadd.f32 1.0, %v5825_v45  ;;  %5828 = vrcp.f32 %v4397_v35  ;;  %v5827_v36 = vpop.eup %5826  ;;  %5301 = vmatprep.subr.bf16.mxu0 %v5945_v16 }
0x25be   :  { %5830 = vtanh.f32 %v4390_v2 }
0x25bf   :  { %5832 = vrcp.f32 %v4398_v8 }
0x25c0   :  { %5834 = vpow2.f32 %v4965_v4 }
0x25c1   :  { %5836 = vpow2.f32 %v4966_v32 }
0x25ca   :  { %v5829_v28 = vpop.eup %5828 }
0x25cb   :  { %v5831_v21 = vpop.eup %5830  ;;  %v4425_v5 = vmul.f32 %v5829_v28, %v5827_v36  ;;  %v4423_v44 = vmul.f32 %v5829_v28, %v4419_v40 }
0x25cc   :  { %v5833_v46 = vpop.eup %5832 }
0x25cd   :  { %4429 = vrot.lane.b32.xlu1 %v4425_v5, %s5949_s14  ;;  %v4426_v30 = vmul.f32 %v5833_v46, %v5831_v21  ;;  %v4424_v25 = vmul.f32 %v5833_v46, %v4420_v54  ;;  %v5835_v41 = vpop.eup %5834  ;;  %v5423_v54 = vld [vmem:[%s7053_s24 + $0x10] sm:$0xff]   ;;  %v5424_v5 = vld [vmem:[%s7053_s24 + $0x8] sm:$0xff]  }
0x25ce   :  { %v5837_v61 = vpop.eup %5836  ;;  %v4411_v11 = vadd.f32 1.0, %v5835_v41  ;;  %5302 = vmatpush3.bf16.msra.mxu0 %v5423_v54 }
0x25cf   :  { %4431 = vrot.lane.b32.xlu0 %v4426_v30, %s5949_s14  ;;  %v4412_v42 = vadd.f32 1.0, %v5837_v61  ;;  %5303 = vmatprep.subr.bf16.mxu0 %v5945_v16 }
0x25d2   :  { %5304 = vmatpush3.bf16.msra.mxu0 %v5424_v5 }
0x25d3   :  { %5305 = vmatprep.subr.bf16.mxu0 %v5945_v16 }
0x2633   :  { %v4253_v17 = vpop.f32.mrf.mxu1 }
0x2634   :  { %v4262_v56 = vrot.slane %v4253_v17, 1  ;;  %v4264_v58 = vrot.slane %v4253_v17, 2 }
0x2635   :  { %v4255_v27 = vpop.f32.mrf.mxu1 }
0x2636   :  { %v4270_v14 = vadd.f32 %v4262_v56, %v6584_v50  ;;  %v4272_v18 = vadd.f32 %v4264_v58, %v6586_v52  ;;  %v4263_v47 = vrot.slane %v4255_v27, 1  ;;  %v4265_v12 = vrot.slane %v4255_v27, 2 }
0x2637   :  { %v4257_v20 = vpop.f32.mrf.mxu1 }
0x2638   :  { %v4958_v60 = vmul.f32 -1.442695, %v4270_v14  ;;  %v4959_v23 = vmul.f32 -1.442695, %v4272_v18  ;;  %v4271_v52 = vadd.f32 %v4263_v47, %v6595_v6  ;;  %v4273_v31 = vadd.f32 %v4265_v12, %v6592_v15  ;;  %v5420_v14 = vld [vmem:[%s6104_s4 + $0x8] sm:$0xff]  }
0x2639   :  { %v4258_v22 = vpop.f32.mrf.mxu1 }
0x263a   :  { %5838 = vpow2.f32 %v4958_v60  ;;  %v4960_v46 = vmul.f32 -1.442695, %v4271_v52  ;;  %v4961_v30 = vmul.f32 -1.442695, %v4273_v31 }
0x263b   :  { %5840 = vpow2.f32 %v4959_v23 }
0x263c   :  { %5842 = vrcp.f32 %v4411_v11 }
0x263f   :  { %v4430_v57 = vpop.permute.xlu1 %4429 }
0x2640   :  { %v4435_v49 = vadd.f32 %v4430_v57, %v4423_v44  ;;  %v5425_v44 = vld [vmem:[%s7053_s24] sm:$0xff]  }
0x2641   :  { %v4432_v29 = vpop.permute.xlu0 %4431  ;;  %5306 = vmatpush3.bf16.msra.mxu0 %v5425_v44 }
0x2642   :  { %5844 = vtanh.f32 %v4435_v49  ;;  %v4436_v50 = vadd.f32 %v4432_v29, %v4424_v25  ;;  %v4863_v25 = vld [vmem:[%s7054_s30] ss:$0 sm:$0xff] }
0x2643   :  { %5846 = vrcp.f32 %v4412_v42  ;;  %v2331_v43 = vadd.f32 %v4863_v25, %v6580_v3  ;;  %v5421_v3 = vld [vmem:[%s6104_s4] sm:$0xff]  }
0x2644   :  { %5848 = vtanh.f32 %v4436_v50 }
0x2645   :  { %5850 = vtanh.f32 %v4271_v52 }
0x2646   :  { %5852 = vtanh.f32 %v4273_v31 }
0x2647   :  { %v5839_v63 = vpop.eup %5838 }
0x2648   :  { %v5841_v19 = vpop.eup %5840  ;;  %v4280_v9 = vadd.f32 1.0, %v5839_v63 }
0x2649   :  { %v4281_v26 = vadd.f32 1.0, %v5841_v19  ;;  %v5843_v7 = vpop.eup %5842 }
0x264a   :  { %5854 = vrcp.f32 %v4280_v9 }
0x264b   :  { %5856 = vrcp.f32 %v4281_v26 }
0x264c   :  { %5858 = vpow2.f32 %v4960_v46 }
0x264d   :  { %5860 = vpow2.f32 %v4961_v30 }
0x264e   :  { %5862 = vtanh.f32 %v2331_v43 }
0x264f   :  { %v5845_v24 = vpop.eup %5844 }
0x2650   :  { %v5847_v53 = vpop.eup %5846  ;;  %v4439_v10 = vmul.f32 %v5845_v24, %v5843_v7 }
0x2651   :  { %v5849_v39 = vpop.eup %5848 }
0x2652   :  { %v4440_v1 = vmul.f32 %v5849_v39, %v5847_v53  ;;  %v4451_v6 = vpack.c.bf16 %v4439_v10, %v4439_v10  ;;  %v5851_v59 = vpop.eup %5850 }
0x2653   :  { %v5853_v48 = vpop.eup %5852 }
0x2654   :  { %v4452_v15 = vpack.c.bf16 %v4440_v1, %v4440_v1  ;;  %v4463_v45 = vunpack.c.l.b16 %v4451_v6  ;;  %v4980_v1 = vld [vmem:[%s6109_s6] ss:$0 sm:$0xff]  ;;  %s5950_s6 = smov [#allocation2]  }
0x2655   :  { %s4704_s12 = sshll.u32 %s5950_s6, 4  ;;  %s4705_s12 = int_to_ptr.vmem [resolvable:$true] %s4704_s12 }
0x2656   :  { %v4464_v62 = vunpack.c.l.b16 %v4452_v15  ;;  %s5892_s27 = scalar_lea.vmem %s4705_s12, 32  ;;  %p5897_p1 = scmp.lt.s32.totalorder %s4705_s12, %s4705_s12 }
0x2657   :  { %v5855_v34 = vpop.eup %5854  ;;  %p5893_p0 = scmp.ne.s32.totalorder %s4705_s12, %s5892_s27  ;;  %p5898_p2 = scmp.lt.s32.totalorder %s5892_s27, %s5892_s27 }
0x2658   :  { %v5857_v2 = vpop.eup %5856  ;;  %v4308_v35 = vmul.f32 %v5855_v34, %v5851_v59  ;;  %v4465_v8 = vrot.slane %v4464_v62, 7  ;;  %v4306_v36 = vmul.f32 %v5855_v34, %v4302_v38 }
0x2659   :  { %v4309_v40 = vmul.f32 %v5857_v2, %v5853_v48  ;;  %v4307_v28 = vmul.f32 %v5857_v2, %v4303_v13  ;;  %v5859_v37 = vpop.eup %5858  ;;  %p5899_p3 = por %p5898_p2, %p5897_p1 }
0x265a   :  { %4312 = vrot.lane.b32.xlu0 %v4308_v35, %s5949_s14  ;;  %v4466_v21 = vsel %vm2278_vm6, %v4465_v8, %v4463_v45  ;;  %v5861_v33 = vpop.eup %5860  ;;  %v4294_v4 = vadd.f32 1.0, %v5859_v37 }
0x265b   :  { %4314 = vrot.lane.b32.xlu1 %v4309_v40, %s5949_s14  ;;  %v4467_v0 = vpack.c.b16 %v4466_v21, %v4466_v21  ;;  %v4295_v32 = vadd.f32 1.0, %v5861_v33  ;;  %v5863_v20 = vpop.eup %5862  ;;  %p5900_p4 = pnand %p5899_p3, %p5893_p0 }
0x265c   :  { %5864 = vrcp.f32 %v4294_v4  ;;  %v4614_v60 = vpack.c.bf16 %v5863_v20, %v5863_v20 }
0x265d   :  { %5866 = vrcp.f32 %v4295_v32 }
0x265e   :  { %4468 = vrot.lane.b32.xlu0 %v4467_v0, %s5949_s14 }
0x2669   :  { %v5865_v23 = vpop.eup %5864 }
0x266a   :  { %v5867_v22 = vpop.eup %5866 }
0x26cc   :  { %v4313_v17 = vpop.permute.xlu0 %4312 }
0x26cd   :  { %v4315_v56 = vpop.permute.xlu1 %4314  ;;  %v4318_v58 = vadd.f32 %v4313_v17, %v4306_v36 }
0x26ce   :  { %v4319_v27 = vadd.f32 %v4315_v56, %v4307_v28 }
0x26cf   :  { %5868 = vtanh.f32 %v4318_v58 }
0x26d0   :  { %5870 = vtanh.f32 %v4319_v27  ;;  %v4469_v18 = vpop.permute.xlu0 %4468 }
0x26d1   :  { %5296 = vmatmul.mubr.msk.bf16.vlgmr.msra.gmra.mxu1 %vm1130_vm5, %v4469_v18 }
0x26d2   :  { %5312 = vmatpush3.bf16.msra.mxu1 %v5420_v14  ;;  %5315 = vmatprep.mubr.msk.bf16.mxu1 %vm5946_vm1, %v5945_v16 }
0x26d3   :  { %5313 = vmatprep.subr.bf16.mxu1 %v5945_v16 }
0x26d6   :  { %5314 = vmatpush3.bf16.msra.mxu1 %v5421_v3 }
0x26d9   :  { %5316 = vmatmul.mubr.msk.bf16.vlgmr.msra.gmra.mxu1 %vm136_vm0, %v4614_v60 }
0x26dc   :  { %v5869_v41 = vpop.eup %5868 }
0x26dd   :  { %v5871_v61 = vpop.eup %5870  ;;  %v4322_v11 = vmul.f32 %v5869_v41, %v5865_v23 }
0x26de   :  { %v4323_v42 = vmul.f32 %v5871_v61, %v5867_v22 }
0x26df   :  { %v4441_v57 = vpack.c.bf16 %v4322_v11, %v4322_v11 }
0x26e0   :  { %v4442_v47 = vpack.c.bf16 %v4323_v42, %v4323_v42 }
0x26e1   :  { %v4539_v49 = vunpack.c.l.b16 %v4441_v57 }
0x26e2   :  { %v4540_v12 = vunpack.c.l.b16 %v4442_v47 }
0x26e3   :  { %v4541_v29 = vrot.slane %v4539_v49, 7 }
0x26e4   :  { %v4542_v50 = vrot.slane %v4540_v12, 6 }
0x26e6   :  { %v4543_v16 = vsel %vm2278_vm6, %v4542_v50, %v4541_v29 }
0x26e7   :  { %v4544_v52 = vpack.c.b16 %v4543_v16, %v4543_v16 }
0x26e9   :  { %4545 = vrot.lane.b32.xlu1 %v4544_v52, %s5949_s14 }
0x275b   :  { %v4546_v31 = vpop.permute.xlu1 %4545 }
0x275c   :  { %5308 = vmatmul.mubr.msk.bf16.vlgmr.msra.gmra.mxu0 %vm1130_vm5, %v4546_v31 }
0x2791   :  { %v4531_v63 = vpop.f32.mrf.mxu1 }
0x2793   :  { %v5297_v19 = vpop.f32.mrf.mxu1 }
0x2795   :  { %v4534_v9 = vpop.f32.mrf.mxu1 }
0x2797   :  { %v5298_v26 = vpop.f32.mrf.mxu1 }
0x2799   :  { %v4668_v7 = vpop.f32.mrf.mxu1 }
0x279b   :  { %v5317_v24 = vpop.f32.mrf.mxu1 }
0x279d   :  { %v4671_v51 = vpop.f32.mrf.mxu1 }
0x279f   :  { %v5318_v53 = vpop.f32.mrf.mxu1 }
0x281c   :  { %v4608_v10 = vpop.f32.mrf.mxu0 }
0x281d   :  { %v4609_v39 = vadd.f32 %v4608_v10, %v4531_v63 }
0x281e   :  { %v5309_v6 = vpop.f32.mrf.mxu0 }
0x281f   :  { %v4674_v15 = vadd.f32 %v4668_v7, %v4609_v39 }
0x2820   :  { %v4611_v59 = vpop.f32.mrf.mxu0 }
0x2821   :  { %v4682_v48 = vadd.f32 %v4980_v1, %v4674_v15 }
0x2822   :  { %v5310_v38 = vpop.f32.mrf.mxu0 }
0x2823   :  { %v4684_v62 = vsel %vm4683_vm7, %v4682_v48, -inf }
0x2824   :  { %4685 = vmax.xlane.f32.xlu0 %v4684_v62 }
0x28ad   :  { %v4686_v34 = vpop.xlane.xlu0 %4685 }
0x28ae   :  { %v4687_v13 = vsub.f32 %v4682_v48, %v4686_v34 }
0x28b0   :  { %v4688_v2 = vmul.f32 1.442695, %v4687_v13 }
0x28b2   :  { %5872 = vpow2.f32 %v4688_v2 }
0x28bf   :  { %v5873_v35 = vpop.eup %5872 }
0x28c0   :  { %v4690_v45 = vsel %vm4683_vm7, %v5873_v35, 0.0 }
0x28c1   :  { %4691 = vadd.xlane.f32.xlu1 %v4690_v45 }
0x294a   :  { %v4692_v8 = vpop.xlane.xlu1 %4691 }
0x294b   :  { %5874 = vlog2.f32 %v4692_v8 }
0x2958   :  { %v5875_v36 = vpop.eup %5874 }
0x2959   :  { %v4694_v40 = vmul.f32 0.6931472, %v5875_v36 }
0x295b   :  { %v4695_v28 = vadd.f32 %v4694_v40, %v4686_v34 }
0x295d   :  { %v4696_v21 = vsub.f32 %v4682_v48, %v4695_v28 }
0x295f   :  { %4697 = vst.msk [vmem:[#allocation2] sm:$0x3] %vm4683_vm7, %v4696_v21 }
0x2960   :  { %5903 = shalt.err (!%p5900_p4)
}
0x2961   :  { %4707 = dma.vmem_to_hbm [thread:$0]  %s4705_s12, 32, %s6114_s20, [#allocation3]  }
0x2962   :  { %5912 = dma.done.wait [#allocation3], 32  }
0x2963   :  { %5913 = vsyncadd [#allocation3], 4294967264 }
0x2964   :  { %4711 = vsyncpa [#allocation3], 1 }

</bundles_post_ra>
